<compile_context>
chip_gen: v7x
topology: tpu7x:2x2x1
jax: 0.10.0
libtpu: 0.0.40
codegen_flags: <defaults>
</compile_context>

<pallas_src>
import functools

import numpy as np
import jax
import jax.numpy as jnp
from jax.experimental import pallas as pl
from jax.experimental.pallas import tpu as pltpu


# ----------------------------------------------------------------------------
# Host-side matrix builders (tiny, computed once per shape)
# ----------------------------------------------------------------------------
def _pool1d_matrix(n):
    """1D 3-tap average (stride 1, pad 1, count_include_pad=True) as (n, n)."""
    P = np.zeros((n, n), dtype=np.float32)
    for i in range(n):
        for j in (i - 1, i, i + 1):
            if 0 <= j < n:
                P[i, j] = 1.0 / 3.0
    return P


def _interp_matrix(out_size, in_size):
    """Row matrix reproducing F.interpolate bilinear, align_corners=False."""
    R = np.zeros((out_size, in_size), dtype=np.float32)
    if in_size == 1:
        R[:, 0] = 1.0
        return R
    scale = in_size / out_size
    for i in range(out_size):
        src = scale * (i + 0.5) - 0.5
        src = max(src, 0.0)                        # PyTorch clamps negatives to 0
        i0 = min(int(np.floor(src)), in_size - 1)
        i1 = min(i0 + 1, in_size - 1)
        frac = src - i0
        R[i, i0] += 1.0 - frac
        R[i, i1] += frac
    return R


# ----------------------------------------------------------------------------
# Fused descriptor kernel: pool + resize + concat + CoordConv 1x1 in one pass
# ----------------------------------------------------------------------------
def _descriptor_kernel(*refs, num_levels, compute_dtype):
    # refs = (x0, L0, R0, ..., x_{k-1}, L_{k-1}, R_{k-1},
    #         weight, bias, coords, out, cat_scratch)
    w_ref = refs[3 * num_levels]
    b_ref = refs[3 * num_levels + 1]
    coord_ref = refs[3 * num_levels + 2]
    out_ref = refs[3 * num_levels + 3]
    cat_ref = refs[3 * num_levels + 4]

    nb = out_ref.shape[0]
    ho = refs[1].shape[0]            # L0 is (Ho, H0)
    wo = refs[2].shape[0]            # R0 is (Wo, W0)

    # 1) Per-level fused (3x3 avg-pool o bilinear resize), written straight into
    #    the VMEM concat scratch; L/R and features stay f32 for accuracy and the
    #    result is rounded to bf16 exactly once (for the MXU conv below).
    off = 0
    for i in range(num_levels):
        x_ref, l_ref, r_ref = refs[3 * i: 3 * i + 3]
        _, ci, _ = x_ref.shape
        hi = l_ref.shape[1]
        wi = r_ref.shape[1]

        x = x_ref[...].astype(jnp.float32).reshape(nb, ci, hi, wi)
        # H direction then W direction; both einsums already produce the natural
        # dot_general output order, so no transposes are emitted in the kernel.
        t = jnp.einsum('nchw,ph->ncwp', x, l_ref[...],
                       preferred_element_type=jnp.float32)        # (nb,ci,Wi,Ho)
        u = jnp.einsum('ncwp,ow->ncpo', t, r_ref[...],
                       preferred_element_type=jnp.float32)        # (nb,ci,Ho,Wo)
        cat_ref[:, off:off + ci, :] = (
            u.reshape(nb, ci, ho * wo).astype(compute_dtype))     # lane-dense
        off += ci

    # 2) CoordConv coordinate channels: tiny (2, Ho*Wo) grid-invariant operand
    #    (replaces the old (Cout, Ho, Wo) bias-map HBM read -> Cout x smaller).
    cat_ref[:, off:off + 2, :] = jnp.broadcast_to(
        coord_ref[...].astype(compute_dtype)[None], (nb, 2, ho * wo))

    # 3) 1x1 CoordConv: ONE 2D MXU matmul per sample with level-fused
    #    K = sum(Ci) + 2 and lane-dense N = Ho*Wo (bf16 operands, f32 acc).
    w = w_ref[...]                                                 # (Cout, K) bf16
    b = b_ref[...]                                                 # (Cout, 1) f32
    for n in range(nb):
        acc = jnp.dot(w, cat_ref[n], preferred_element_type=jnp.float32)
        out_ref[n] = (acc + b).astype(out_ref.dtype)


def _pick_batch_block(n, per_sample_bytes, nb_max=8,
                      vmem_budget=36 * 1024 * 1024):
    """Largest batch block that divides N, fits the VMEM budget, and keeps
    >= 2 grid steps whenever N >= 2 (so both v7x TensorCores get work)."""
    cap = max(1, min(nb_max, n, int(vmem_budget // max(per_sample_bytes, 1))))
    best = 1
    for d in range(1, cap + 1):
        if n % d == 0 and (n // d >= 2 or n == 1):
            best = d
    return best


def descriptor_forward(p, weight, bias, cnn='res18',
                       compute_dtype=jnp.bfloat16, batch_block=8):
    """p: list of (N, Ci, Hi, Wi); weight: (Cout, sum(Ci)+2); bias: (Cout,)."""
    N, _, Ho, Wo = p[0].shape
    Cout = weight.shape[0]
    c_total = sum(int(o.shape[1]) for o in p)
    assert weight.shape[1] == c_total + 2

    # --- batch block size from a rough per-sample VMEM footprint -------------
    x_bytes = jnp.dtype(p[0].dtype).itemsize
    cat_bytes = jnp.dtype(compute_dtype).itemsize
    per_sample = 2 * Cout * Ho * Wo * x_bytes            # double-buffered output
    per_sample += Cout * Ho * Wo * 4                     # f32 conv accumulator
    per_sample += (c_total + 2) * Ho * Wo * cat_bytes    # VMEM concat scratch
    for o in p:
        _, Ci, Hi, Wi = o.shape
        per_sample += 2 * Ci * Hi * Wi * (x_bytes + 4)   # dbl-buffered in + f32 tmp
    nb = _pick_batch_block(N, per_sample, nb_max=batch_block)
    grid = (N // nb,)

    # --- per-level fused (pool o interp) matrices + flat-spatial inputs -----
    operands, in_specs = [], []
    for idx, o in enumerate(p):
        _, Ci, Hi, Wi = o.shape
        extra = (1.0 / Ci) if cnn == 'effnet-b5' else 1.0
        PH = _pool1d_matrix(Hi) * extra
        PW = _pool1d_matrix(Wi)
        if idx == 0:
            L, R = PH, PW
        else:
            L = _interp_matrix(Ho, Hi) @ PH
            R = _interp_matrix(Wo, Wi) @ PW
        # Flat spatial input: lane-dense VMEM tiles and long DMA rows.
        operands += [o.reshape(N, Ci, Hi * Wi),
                     jnp.asarray(L, jnp.float32),        # pool/bilinear taps f32
                     jnp.asarray(R, jnp.float32)]
        in_specs += [
            pl.BlockSpec((nb, Ci, Hi * Wi), lambda n: (n, 0, 0)),
            pl.BlockSpec((Ho, Hi), lambda n: (0, 0)),
            pl.BlockSpec((Wo, Wi), lambda n: (0, 0)),
        ]

    # Coordinate channels of the CoordConv (batch independent): (2, Ho*Wo).
    xx = 2.0 * jnp.arange(Ho, dtype=jnp.float32) / max(Ho - 1, 1) - 1.0
    yy = 2.0 * jnp.arange(Wo, dtype=jnp.float32) / max(Wo - 1, 1) - 1.0
    coords = jnp.stack(
        [jnp.broadcast_to(xx[:, None], (Ho, Wo)).reshape(-1),
         jnp.broadcast_to(yy[None, :], (Ho, Wo)).reshape(-1)], axis=0)

    operands += [weight.astype(compute_dtype),
                 bias.astype(jnp.float32).reshape(Cout, 1),
                 coords]
    in_specs += [pl.BlockSpec((Cout, c_total + 2), lambda n: (0, 0)),
                 pl.BlockSpec((Cout, 1), lambda n: (0, 0)),
                 pl.BlockSpec((2, Ho * Wo), lambda n: (0, 0))]

    kernel = functools.partial(_descriptor_kernel, num_levels=len(p),
                               compute_dtype=compute_dtype)

    out_flat = pl.pallas_call(
        kernel,
        out_shape=jax.ShapeDtypeStruct((N, Cout, Ho * Wo), p[0].dtype),
        grid=grid,
        in_specs=in_specs,
        out_specs=pl.BlockSpec((nb, Cout, Ho * Wo), lambda n: (n, 0, 0)),
        scratch_shapes=[pltpu.VMEM((nb, c_total + 2, Ho * Wo), compute_dtype)],
        compiler_params=pltpu.CompilerParams(
            dimension_semantics=("parallel",),
            vmem_limit_bytes=48 * 1024 * 1024),
    )(*operands)
    # TODO(synk): when N == 1 the grid has a single step and one v7x TensorCore
    # idles; a second parallel axis over Cout/Ho tiles would be needed there.
    return out_flat.reshape(N, Cout, Ho, Wo)


# ----------------------------------------------------------------------------
# Pure-JAX reference mirroring the PyTorch ops (unfused, f32) for a cross-check
# ----------------------------------------------------------------------------
def _descriptor_forward_ref(p, weight, bias, cnn='res18'):
    def pool(x, scale):
        xp = jnp.pad(x, ((0, 0), (0, 0), (1, 1), (1, 1)))
        H, W = x.shape[2], x.shape[3]
        acc = sum(xp[:, :, di:di + H, dj:dj + W]
                  for di in range(3) for dj in range(3))
        return acc * scale

    sample = None
    for o in p:
        scale = (1.0 / 9.0) / o.shape[1] if cnn == 'effnet-b5' else 1.0 / 9.0
        o = pool(o, scale)
        if sample is None:
            sample = o
        else:
            ry = jnp.asarray(_interp_matrix(sample.shape[2], o.shape[2]))
            rx = jnp.asarray(_interp_matrix(sample.shape[3], o.shape[3]))
            o = jnp.einsum('nchw,oh,pw->ncop', o, ry, rx)
            sample = jnp.concatenate([sample, o], axis=1)

    N, C, H, W = sample.shape
    xx = jnp.broadcast_to(
        (2.0 * jnp.arange(H, dtype=sample.dtype) / max(H - 1, 1) - 1.0)[:, None],
        (H, W))
    yy = jnp.broadcast_to(
        (2.0 * jnp.arange(W, dtype=sample.dtype) / max(W - 1, 1) - 1.0)[None, :],
        (H, W))
    coords = jnp.broadcast_to(jnp.stack([xx, yy], axis=0)[None], (N, 2, H, W))
    xcat = jnp.concatenate([sample, coords], axis=1)
    return jnp.einsum('nchw,oc->nohw', xcat, weight) + bias[None, :, None, None]


if __name__ == "__main__":
    key = jax.random.PRNGKey(0)
    k1, k2, k3, kw, kb = jax.random.split(key, 5)

    # Small synthetic multi-scale pyramid (square maps, as CFA assumes):
    # channels (4, 8, 16) stand in for the res18 (64, 128, 256) pyramid.
    p = [jax.random.normal(k1, (4, 4, 16, 16), jnp.float32),
         jax.random.normal(k2, (4, 8, 8, 8), jnp.float32),
         jax.random.normal(k3, (4, 16, 4, 4), jnp.float32)]

    gamma_d = 2
    dim = sum(o.shape[1] for o in p)          # concatenated channel dim (28)
    c_out = dim // gamma_d                    # CoordConv2d(dim, dim//gamma_d, 1)
    weight = 0.05 * jax.random.normal(kw, (c_out, dim + 2), jnp.float32)
    bias = 0.05 * jax.random.normal(kb, (c_out,), jnp.float32)

    phi_p = descriptor_forward(p, weight, bias, cnn='res18')
    phi_p = jax.block_until_ready(phi_p)
    assert phi_p.shape == (4, c_out, 16, 16), phi_p.shape

    ref = jax.block_until_ready(_descriptor_forward_ref(p, weight, bias, cnn='res18'))
    # f32 resize + bf16 MXU conv operands with f32 accumulation.
    np.testing.assert_allclose(np.asarray(phi_p), np.asarray(ref),
                               rtol=1e-2, atol=1e-2)
    print("KERNEL_OK")
</pallas_src>

<mosaic_0001>
module attributes {stable_mosaic.version = 11 : i64} {
  func.func @_descriptor_kernel(%arg0: i32, %arg1: memref<2x4x256xf32, #tpu.memory_space<vmem>>, %arg2: memref<16x16xf32, #tpu.memory_space<vmem>>, %arg3: memref<16x16xf32, #tpu.memory_space<vmem>>, %arg4: memref<2x8x64xf32, #tpu.memory_space<vmem>>, %arg5: memref<16x8xf32, #tpu.memory_space<vmem>>, %arg6: memref<16x8xf32, #tpu.memory_space<vmem>>, %arg7: memref<2x16x16xf32, #tpu.memory_space<vmem>>, %arg8: memref<16x4xf32, #tpu.memory_space<vmem>>, %arg9: memref<16x4xf32, #tpu.memory_space<vmem>>, %arg10: memref<14x30xbf16, #tpu.memory_space<vmem>>, %arg11: memref<14x1xf32, #tpu.memory_space<vmem>>, %arg12: memref<2x256xf32, #tpu.memory_space<vmem>>, %arg13: memref<2x14x256xf32, #tpu.memory_space<vmem>>, %arg14: memref<2x30x256xbf16, #tpu.memory_space<vmem>>) attributes {dimension_semantics = [#tpu.dimension_semantics<parallel>], iteration_bounds = array<i64: 2>, scalar_prefetch = 0 : i64, scratch_operands = 1 : i64, tpu.core_type = #tpu.core_type<tc>, window_params = [{transform_indices = @transform_0, window_bounds = array<i64: 2, 4, 256>}, {pipeline_mode = #tpu.pipeline_mode<synchronous>, transform_indices = @transform_1, window_bounds = array<i64: 16, 16>}, {pipeline_mode = #tpu.pipeline_mode<synchronous>, transform_indices = @transform_2, window_bounds = array<i64: 16, 16>}, {transform_indices = @transform_3, window_bounds = array<i64: 2, 8, 64>}, {pipeline_mode = #tpu.pipeline_mode<synchronous>, transform_indices = @transform_4, window_bounds = array<i64: 16, 8>}, {pipeline_mode = #tpu.pipeline_mode<synchronous>, transform_indices = @transform_5, window_bounds = array<i64: 16, 8>}, {transform_indices = @transform_6, window_bounds = array<i64: 2, 16, 16>}, {pipeline_mode = #tpu.pipeline_mode<synchronous>, transform_indices = @transform_7, window_bounds = array<i64: 16, 4>}, {pipeline_mode = #tpu.pipeline_mode<synchronous>, transform_indices = @transform_8, window_bounds = array<i64: 16, 4>}, {pipeline_mode = #tpu.pipeline_mode<synchronous>, transform_indices = @transform_9, window_bounds = array<i64: 14, 30>}, {pipeline_mode = #tpu.pipeline_mode<synchronous>, transform_indices = @transform_10, window_bounds = array<i64: 14, 1>}, {pipeline_mode = #tpu.pipeline_mode<synchronous>, transform_indices = @transform_11, window_bounds = array<i64: 2, 256>}, {transform_indices = @transform_12, window_bounds = array<i64: 2, 14, 256>}]} {
    %c0 = arith.constant 0 : index
    %c0_0 = arith.constant 0 : index
    %c0_1 = arith.constant 0 : index
    %0 = vector.load %arg1[%c0, %c0_0, %c0_1] : memref<2x4x256xf32, #tpu.memory_space<vmem>>, vector<2x4x256xf32>
    %1 = vector.shape_cast %0 : vector<2x4x256xf32> to vector<2x4x16x16xf32>
    %c0_2 = arith.constant 0 : index
    %c0_3 = arith.constant 0 : index
    %2 = vector.load %arg2[%c0_2, %c0_3] : memref<16x16xf32, #tpu.memory_space<vmem>>, vector<16x16xf32>
    "tpu.trace_start"() <{level = 10 : i32, message = "nchw,ph->ncwp"}> : () -> ()
    %cst = arith.constant dense<0.000000e+00> : vector<2x4x16x16xf32>
    %3 = tpu.matmul %1, %2, %cst {dimension_numbers = #tpu.dot_dimension_numbers<[2], [1], [0, 1, 3], [0], [0, 0, 0, 1, 0, 3, 1, 0], [], []>} : vector<2x4x16x16xf32>, vector<16x16xf32>, vector<2x4x16x16xf32> -> vector<2x4x16x16xf32>
    "tpu.trace_stop"() : () -> ()
    %c0_4 = arith.constant 0 : index
    %c0_5 = arith.constant 0 : index
    %4 = vector.load %arg3[%c0_4, %c0_5] : memref<16x16xf32, #tpu.memory_space<vmem>>, vector<16x16xf32>
    "tpu.trace_start"() <{level = 10 : i32, message = "ncwp,ow->ncpo"}> : () -> ()
    %cst_6 = arith.constant dense<0.000000e+00> : vector<2x4x16x16xf32>
    %5 = tpu.matmul %3, %4, %cst_6 {dimension_numbers = #tpu.dot_dimension_numbers<[2], [1], [0, 1, 3], [0], [0, 0, 0, 1, 0, 3, 1, 0], [], []>} : vector<2x4x16x16xf32>, vector<16x16xf32>, vector<2x4x16x16xf32> -> vector<2x4x16x16xf32>
    "tpu.trace_stop"() : () -> ()
    %6 = vector.shape_cast %5 : vector<2x4x16x16xf32> to vector<2x4x256xf32>
    %7 = arith.truncf %6 : vector<2x4x256xf32> to vector<2x4x256xbf16>
    %c0_7 = arith.constant 0 : index
    %c0_8 = arith.constant 0 : index
    %c0_9 = arith.constant 0 : index
    %8 = vector.load %arg14[%c0_7, %c0_8, %c0_9] : memref<2x30x256xbf16, #tpu.memory_space<vmem>>, vector<2x4x256xbf16>
    tpu.vector_store %arg14[%c0_7, %c0_8, %c0_9], %7 {strides = array<i32>} : memref<2x30x256xbf16, #tpu.memory_space<vmem>>, vector<2x4x256xbf16>,
    %c0_10 = arith.constant 0 : index
    %c0_11 = arith.constant 0 : index
    %c0_12 = arith.constant 0 : index
    %9 = vector.load %arg4[%c0_10, %c0_11, %c0_12] : memref<2x8x64xf32, #tpu.memory_space<vmem>>, vector<2x8x64xf32>
    %10 = vector.shape_cast %9 : vector<2x8x64xf32> to vector<2x8x8x8xf32>
    %c0_13 = arith.constant 0 : index
    %c0_14 = arith.constant 0 : index
    %11 = vector.load %arg5[%c0_13, %c0_14] : memref<16x8xf32, #tpu.memory_space<vmem>>, vector<16x8xf32>
    "tpu.trace_start"() <{level = 10 : i32, message = "nchw,ph->ncwp"}> : () -> ()
    %cst_15 = arith.constant dense<0.000000e+00> : vector<2x8x8x16xf32>
    %12 = tpu.matmul %10, %11, %cst_15 {dimension_numbers = #tpu.dot_dimension_numbers<[2], [1], [0, 1, 3], [0], [0, 0, 0, 1, 0, 3, 1, 0], [], []>} : vector<2x8x8x8xf32>, vector<16x8xf32>, vector<2x8x8x16xf32> -> vector<2x8x8x16xf32>
    "tpu.trace_stop"() : () -> ()
    %c0_16 = arith.constant 0 : index
    %c0_17 = arith.constant 0 : index
    %13 = vector.load %arg6[%c0_16, %c0_17] : memref<16x8xf32, #tpu.memory_space<vmem>>, vector<16x8xf32>
    "tpu.trace_start"() <{level = 10 : i32, message = "ncwp,ow->ncpo"}> : () -> ()
    %cst_18 = arith.constant dense<0.000000e+00> : vector<2x8x16x16xf32>
    %14 = tpu.matmul %12, %13, %cst_18 {dimension_numbers = #tpu.dot_dimension_numbers<[2], [1], [0, 1, 3], [0], [0, 0, 0, 1, 0, 3, 1, 0], [], []>} : vector<2x8x8x16xf32>, vector<16x8xf32>, vector<2x8x16x16xf32> -> vector<2x8x16x16xf32>
    "tpu.trace_stop"() : () -> ()
    %15 = vector.shape_cast %14 : vector<2x8x16x16xf32> to vector<2x8x256xf32>
    %16 = arith.truncf %15 : vector<2x8x256xf32> to vector<2x8x256xbf16>
    %c0_19 = arith.constant 0 : index
    %c4 = arith.constant 4 : index
    %c0_20 = arith.constant 0 : index
    %17 = vector.load %arg14[%c0_19, %c4, %c0_20] : memref<2x30x256xbf16, #tpu.memory_space<vmem>>, vector<2x8x256xbf16>
    tpu.vector_store %arg14[%c0_19, %c4, %c0_20], %16 {strides = array<i32>} : memref<2x30x256xbf16, #tpu.memory_space<vmem>>, vector<2x8x256xbf16>,
    %c0_21 = arith.constant 0 : index
    %c0_22 = arith.constant 0 : index
    %c0_23 = arith.constant 0 : index
    %18 = vector.load %arg7[%c0_21, %c0_22, %c0_23] : memref<2x16x16xf32, #tpu.memory_space<vmem>>, vector<2x16x16xf32>
    %19 = vector.shape_cast %18 : vector<2x16x16xf32> to vector<2x16x4x4xf32>
    %c0_24 = arith.constant 0 : index
    %c0_25 = arith.constant 0 : index
    %20 = vector.load %arg8[%c0_24, %c0_25] : memref<16x4xf32, #tpu.memory_space<vmem>>, vector<16x4xf32>
    "tpu.trace_start"() <{level = 10 : i32, message = "nchw,ph->ncwp"}> : () -> ()
    %cst_26 = arith.constant dense<0.000000e+00> : vector<2x16x4x16xf32>
    %21 = tpu.matmul %19, %20, %cst_26 {dimension_numbers = #tpu.dot_dimension_numbers<[2], [1], [0, 1, 3], [0], [0, 0, 0, 1, 0, 3, 1, 0], [], []>} : vector<2x16x4x4xf32>, vector<16x4xf32>, vector<2x16x4x16xf32> -> vector<2x16x4x16xf32>
    "tpu.trace_stop"() : () -> ()
    %c0_27 = arith.constant 0 : index
    %c0_28 = arith.constant 0 : index
    %22 = vector.load %arg9[%c0_27, %c0_28] : memref<16x4xf32, #tpu.memory_space<vmem>>, vector<16x4xf32>
    "tpu.trace_start"() <{level = 10 : i32, message = "ncwp,ow->ncpo"}> : () -> ()
    %cst_29 = arith.constant dense<0.000000e+00> : vector<2x16x16x16xf32>
    %23 = tpu.matmul %21, %22, %cst_29 {dimension_numbers = #tpu.dot_dimension_numbers<[2], [1], [0, 1, 3], [0], [0, 0, 0, 1, 0, 3, 1, 0], [], []>} : vector<2x16x4x16xf32>, vector<16x4xf32>, vector<2x16x16x16xf32> -> vector<2x16x16x16xf32>
    "tpu.trace_stop"() : () -> ()
    %24 = vector.shape_cast %23 : vector<2x16x16x16xf32> to vector<2x16x256xf32>
    %25 = arith.truncf %24 : vector<2x16x256xf32> to vector<2x16x256xbf16>
    %c0_30 = arith.constant 0 : index
    %c12 = arith.constant 12 : index
    %c0_31 = arith.constant 0 : index
    %26 = vector.load %arg14[%c0_30, %c12, %c0_31] : memref<2x30x256xbf16, #tpu.memory_space<vmem>>, vector<2x16x256xbf16>
    tpu.vector_store %arg14[%c0_30, %c12, %c0_31], %25 {strides = array<i32>} : memref<2x30x256xbf16, #tpu.memory_space<vmem>>, vector<2x16x256xbf16>,
    %c0_32 = arith.constant 0 : index
    %c0_33 = arith.constant 0 : index
    %27 = vector.load %arg12[%c0_32, %c0_33] : memref<2x256xf32, #tpu.memory_space<vmem>>, vector<2x256xf32>
    %28 = arith.truncf %27 : vector<2x256xf32> to vector<2x256xbf16>
    %29 = vector.shape_cast %28 : vector<2x256xbf16> to vector<1x2x256xbf16>
    %30 = vector.shape_cast %29 : vector<1x2x256xbf16> to vector<1x2x256xbf16>
    %31 = vector.broadcast %30 : vector<1x2x256xbf16> to vector<2x2x256xbf16>
    %c0_34 = arith.constant 0 : index
    %c28 = arith.constant 28 : index
    %c0_35 = arith.constant 0 : index
    %32 = vector.load %arg14[%c0_34, %c28, %c0_35] : memref<2x30x256xbf16, #tpu.memory_space<vmem>>, vector<2x2x256xbf16>
    tpu.vector_store %arg14[%c0_34, %c28, %c0_35], %31 {strides = array<i32>} : memref<2x30x256xbf16, #tpu.memory_space<vmem>>, vector<2x2x256xbf16>,
    %c0_36 = arith.constant 0 : index
    %c0_37 = arith.constant 0 : index
    %33 = vector.load %arg10[%c0_36, %c0_37] : memref<14x30xbf16, #tpu.memory_space<vmem>>, vector<14x30xbf16>
    %c0_38 = arith.constant 0 : index
    %c0_39 = arith.constant 0 : index
    %34 = vector.load %arg11[%c0_38, %c0_39] : memref<14x1xf32, #tpu.memory_space<vmem>>, vector<14x1xf32>
    %c0_40 = arith.constant 0 : index
    %c0_41 = arith.constant 0 : index
    %c0_42 = arith.constant 0 : index
    %35 = vector.load %arg14[%c0_40, %c0_41, %c0_42] : memref<2x30x256xbf16, #tpu.memory_space<vmem>>, vector<1x30x256xbf16>
    %36 = vector.shape_cast %35 : vector<1x30x256xbf16> to vector<30x256xbf16>
    %cst_43 = arith.constant dense<0.000000e+00> : vector<14x256xf32>
    %37 = tpu.matmul %33, %36, %cst_43 {dimension_numbers = #tpu.dot_dimension_numbers<[1], [0], [0], [1], [0, 0, 1, 1], [], []>} : vector<14x30xbf16>, vector<30x256xbf16>, vector<14x256xf32> -> vector<14x256xf32>
    %38 = vector.broadcast %34 : vector<14x1xf32> to vector<14x256xf32>
    %39 = arith.addf %37, %38 : vector<14x256xf32>
    %c0_44 = arith.constant 0 : index
    %c0_45 = arith.constant 0 : index
    %c0_46 = arith.constant 0 : index
    %40 = vector.load %arg13[%c0_44, %c0_45, %c0_46] : memref<2x14x256xf32, #tpu.memory_space<vmem>>, vector<1x14x256xf32>
    %41 = vector.shape_cast %40 : vector<1x14x256xf32> to vector<14x256xf32>
    %42 = vector.shape_cast %39 : vector<14x256xf32> to vector<1x14x256xf32>
    tpu.vector_store %arg13[%c0_44, %c0_45, %c0_46], %42 {strides = array<i32>} : memref<2x14x256xf32, #tpu.memory_space<vmem>>, vector<1x14x256xf32>,
    %c1 = arith.constant 1 : index
    %c0_47 = arith.constant 0 : index
    %c0_48 = arith.constant 0 : index
    %43 = vector.load %arg14[%c1, %c0_47, %c0_48] : memref<2x30x256xbf16, #tpu.memory_space<vmem>>, vector<1x30x256xbf16>
    %44 = vector.shape_cast %43 : vector<1x30x256xbf16> to vector<30x256xbf16>
    %cst_49 = arith.constant dense<0.000000e+00> : vector<14x256xf32>
    %45 = tpu.matmul %33, %44, %cst_49 {dimension_numbers = #tpu.dot_dimension_numbers<[1], [0], [0], [1], [0, 0, 1, 1], [], []>} : vector<14x30xbf16>, vector<30x256xbf16>, vector<14x256xf32> -> vector<14x256xf32>
    %46 = vector.broadcast %34 : vector<14x1xf32> to vector<14x256xf32>
    %47 = arith.addf %45, %46 : vector<14x256xf32>
    %c1_50 = arith.constant 1 : index
    %c0_51 = arith.constant 0 : index
    %c0_52 = arith.constant 0 : index
    %48 = vector.load %arg13[%c1_50, %c0_51, %c0_52] : memref<2x14x256xf32, #tpu.memory_space<vmem>>, vector<1x14x256xf32>
    %49 = vector.shape_cast %48 : vector<1x14x256xf32> to vector<14x256xf32>
    %50 = vector.shape_cast %47 : vector<14x256xf32> to vector<1x14x256xf32>
    tpu.vector_store %arg13[%c1_50, %c0_51, %c0_52], %50 {strides = array<i32>} : memref<2x14x256xf32, #tpu.memory_space<vmem>>, vector<1x14x256xf32>,
    return
  }
  func.func @transform_0(%arg0: i32) -> (i32, i32, i32) {
    %c0_i32 = arith.constant 0 : i32
    %c0_i32_0 = arith.constant 0 : i32
    %c0_i32_1 = arith.constant 0 : i32
    return %arg0, %c0_i32, %c0_i32_0 : i32, i32, i32
  }
  func.func @transform_1(%arg0: i32) -> (i32, i32) {
    %c0_i32 = arith.constant 0 : i32
    %c0_i32_0 = arith.constant 0 : i32
    %c0_i32_1 = arith.constant 0 : i32
    return %c0_i32, %c0_i32_0 : i32, i32
  }
  func.func @transform_2(%arg0: i32) -> (i32, i32) {
    %c0_i32 = arith.constant 0 : i32
    %c0_i32_0 = arith.constant 0 : i32
    %c0_i32_1 = arith.constant 0 : i32
    return %c0_i32, %c0_i32_0 : i32, i32
  }
  func.func @transform_3(%arg0: i32) -> (i32, i32, i32) {
    %c0_i32 = arith.constant 0 : i32
    %c0_i32_0 = arith.constant 0 : i32
    %c0_i32_1 = arith.constant 0 : i32
    return %arg0, %c0_i32, %c0_i32_0 : i32, i32, i32
  }
  func.func @transform_4(%arg0: i32) -> (i32, i32) {
    %c0_i32 = arith.constant 0 : i32
    %c0_i32_0 = arith.constant 0 : i32
    %c0_i32_1 = arith.constant 0 : i32
    return %c0_i32, %c0_i32_0 : i32, i32
  }
  func.func @transform_5(%arg0: i32) -> (i32, i32) {
    %c0_i32 = arith.constant 0 : i32
    %c0_i32_0 = arith.constant 0 : i32
    %c0_i32_1 = arith.constant 0 : i32
    return %c0_i32, %c0_i32_0 : i32, i32
  }
  func.func @transform_6(%arg0: i32) -> (i32, i32, i32) {
    %c0_i32 = arith.constant 0 : i32
    %c0_i32_0 = arith.constant 0 : i32
    %c0_i32_1 = arith.constant 0 : i32
    return %arg0, %c0_i32, %c0_i32_0 : i32, i32, i32
  }
  func.func @transform_7(%arg0: i32) -> (i32, i32) {
    %c0_i32 = arith.constant 0 : i32
    %c0_i32_0 = arith.constant 0 : i32
    %c0_i32_1 = arith.constant 0 : i32
    return %c0_i32, %c0_i32_0 : i32, i32
  }
  func.func @transform_8(%arg0: i32) -> (i32, i32) {
    %c0_i32 = arith.constant 0 : i32
    %c0_i32_0 = arith.constant 0 : i32
    %c0_i32_1 = arith.constant 0 : i32
    return %c0_i32, %c0_i32_0 : i32, i32
  }
  func.func @transform_9(%arg0: i32) -> (i32, i32) {
    %c0_i32 = arith.constant 0 : i32
    %c0_i32_0 = arith.constant 0 : i32
    %c0_i32_1 = arith.constant 0 : i32
    return %c0_i32, %c0_i32_0 : i32, i32
  }
  func.func @transform_10(%arg0: i32) -> (i32, i32) {
    %c0_i32 = arith.constant 0 : i32
    %c0_i32_0 = arith.constant 0 : i32
    %c0_i32_1 = arith.constant 0 : i32
    return %c0_i32, %c0_i32_0 : i32, i32
  }
  func.func @transform_11(%arg0: i32) -> (i32, i32) {
    %c0_i32 = arith.constant 0 : i32
    %c0_i32_0 = arith.constant 0 : i32
    %c0_i32_1 = arith.constant 0 : i32
    return %c0_i32, %c0_i32_0 : i32, i32
  }
  func.func @transform_12(%arg0: i32) -> (i32, i32, i32) {
    %c0_i32 = arith.constant 0 : i32
    %c0_i32_0 = arith.constant 0 : i32
    %c0_i32_1 = arith.constant 0 : i32
    return %arg0, %c0_i32, %c0_i32_0 : i32, i32, i32
  }
}

</mosaic_0001>

<bundles_post_ra>
// kernel: tpu_custom_call.1
= control target key start
LH: loop header
LB: loop body
LE: loop exit
PB: predicated region body
PF: predicated region fallthrough
CT: control target
= control target key end

     0   :  { %s16492_s0 = inlined_call_operand.vmem [shape: f32[4,4,256], index: 0, kind: input, shape index: {}]   ;;  %s16493_s1 = inlined_call_operand.vmem [shape: f32[16,16], index: 1, kind: input, shape index: {}]   ;;  %s16494_s2 = inlined_call_operand.hbm [shape: f32[16,16], index: 2, kind: input, shape index: {}]   ;;  %s16495_s3 = inlined_call_operand.hbm [shape: f32[4,8,64], index: 3, kind: input, shape index: {}]   ;;  %s16496_s4 = inlined_call_operand.vmem [shape: f32[16,8], index: 4, kind: input, shape index: {}]   ;;  %s16497_s5 = inlined_call_operand.vmem [shape: f32[16,8], index: 5, kind: input, shape index: {}]   ;;  %s16498_s6 = inlined_call_operand.vmem [shape: f32[4,16,16], index: 6, kind: input, shape index: {}]   ;;  %s16499_s7 = inlined_call_operand.vmem [shape: f32[16,4], index: 7, kind: input, shape index: {}]   ;;  %s16500_s8 = inlined_call_operand.vmem [shape: f32[16,4], index: 8, kind: input, shape index: {}]   ;;  %s16501_s9 = inlined_call_operand.vmem [shape: bf16[14,30], index: 9, kind: input, shape index: {}]   ;;  %s16502_s10 = inlined_call_operand.vmem [shape: f32[14,1], index: 10, kind: input, shape index: {}]   ;;  %s16503_s11 = inlined_call_operand.vmem [shape: f32[2,256], index: 11, kind: input, shape index: {}]   ;;  %s16504_s12 = inlined_call_operand.vmem [shape: f32[4,14,256], index: 12, kind: output, shape index: {}]  }
   0x1   :  { %16525 = sst [smem:[#allocation21_spill]] %s16501_s9 }
   0x2   :  { %16526 = sst [smem:[#allocation22_spill]] %s16504_s12 }
   0x3   :  { %17 = vsyncpa [#allocation4], 0 }
   0x4   :  { %18 = vsyncpa [#allocation6], 0 }
   0x5   :  { %20 = vsyncpa [#allocation6 + $0x1], 0  ;;  %s14211_s21 = smov 0   ;;  %s14213_s22 = smov 0  }
   0x6   :  { %s14215_s23 = smov 0   ;;  %s14217_s24 = smov 0  }
   0x7 LB: > { %s16505_s25 = sadd.s32 4294967295, %s14123_s24   ;;  %p114_p0 = scmp.ne.s32.totalorder %s14115_s22, %s14111_s21  ;;  %s14123_s24 = sphi %s14217_s24, %s16613_s24   ;;  %s14119_s23 = sphi %s14215_s23, %s16616_s23   ;;  %s14115_s22 = sphi %s14213_s22, %s16615_s22   ;;  %s14111_s21 = sphi %s14211_s21, %s16614_s21  }
   0x8   : > { %p14233_p1 = scmp.eq.s32.totalorder %s16505_s25, 0  ;;  %p12958_p2 = scmp.ge.s32.totalorder %s14123_s24, 1 }
   0x9   : > { %p324_p3 = scmp.lt.s32.totalorder %s14123_s24, 3  ;;  %s14125_s29 = smov [#allocation3]  }
   0xa   : > { %s16527_s26 = scalar_select %p14233_p1, 1, 0 }
   0xb   : > { %p14241_p4 = por %p14233_p1, %p114_p0  ;;  %p14245_p5 = pnand %p12958_p2, %p324_p3 }
   0xc   : > { %s339_s30 = sshll.u32 %s14125_s29, 4  ;;  %s14258_s14 = sadd.s32 1, %s14123_s24   ;;  %s340_s30 = int_to_ptr.vmem [resolvable:$true] %s339_s30 }
   0xd   : > { %s16528_s27 = scalar_select %p14241_p4, 1, 0 }
   0xe   : > { %s16529_s28 = scalar_select %p14245_p5, 1, 0 }
   0xf   : > { %p13670_p6 = pneg %p14245_p5  ;;  %16531 = sst [smem:[#allocation9_spill]] %s14258_s14 }
  0x10   : > { %s101_s15 = sadd.s32 1, %s14119_s23  ;;  %s98_s16 = ssub.s32 %s14123_s24, %s14258_s14 }
  0x11   : > { %p14253_p7 = pnand %p13670_p6, %p14233_p1  ;;  %s14027_s19 = scalar_lea.hbm %s16494_s2, 256 }
  0x12   : > { %p14028_p8 = scmp.ne.s32.totalorder %s16494_s2, %s14027_s19  ;;  %p14034_p12 = scmp.lt.u32.totalorder %s14027_s19, %s16494_s2 }
  0x13   : > { %p14029_p9 = pneg %p14253_p7 }
  0x15   : > { %p14030_p10 = pnand %p14029_p9, %p14028_p8 }
  0x17   : > { %p14031_p11 = pneg %p14030_p10 }
  0x19   : > { %p14036_p13 = pnand %p14034_p12, %p14031_p11 }
  0x1b   : > { %14039 = shalt.err (!%p14036_p13)
}
  0x1c   : > { %s14040_s12 = scalar_lea.vmem %s340_s30, 256  ;;  %p14048_p6 = scmp.lt.s32.totalorder %s340_s30, %s340_s30 }
  0x1d   : > { %p14041_p0 = scmp.ne.s32.totalorder %s340_s30, %s14040_s12  ;;  %p14049_p4 = scmp.lt.s32.totalorder %s14040_s12, %s14040_s12 }
  0x1f   : > { %p14043_p2 = pnand %p14041_p0, %p14029_p9  ;;  %p14050_p1 = por %p14049_p4, %p14048_p6 }
  0x21   : > { %p14044_p3 = pneg %p14043_p2 }
  0x23   : > { %p14051_p5 = pnand %p14050_p1, %p14044_p3 }
  0x25   : > { %14054 = shalt.err (!%p14051_p5)
}
  0x26   : > { %s14126_s17 = smov 128   ;;  %s14127_s25 = smov 8  }
  0x27   : > { %13673 = dma.hbm_to_vmem [thread:$0]  (!%p14253_p7), %s16494_s2, 256, %s340_s30, [#allocation4], %s14126_s17, %s14126_s17, %s14127_s25  }
  0x28   : > { %p99_p1 = scmp.eq.s32.totalorder %s98_s16, 0  ;;  %p108_p4 = scmp.ne.s32.totalorder %s14119_s23, %s14115_s22 }
  0x29   : > { %p109_p5 = scmp.eq.s32.totalorder %s14123_s24, 0  ;;  %p13679_p8 = scmp.lt.s32.totalorder %s14123_s24, 2 }
  0x2a   : > { %s14287_s12 = scalar_select %p99_p1, %s14119_s23, %s101_s15  }
  0x2b   : > { %p110_p9 = por %p109_p5, %p108_p4  ;;  %s384_s20 = sand.u32 1, %s14119_s23  }
  0x2c   : > { %s12961_s21 = sshll.u32 %s384_s20, 4  ;;  %s13177_s29 = sshll.u32 %s14123_s24, 8 }
  0x2d   : > { %s14294_s13 = scalar_lea.hbm %s16495_s3, %s13177_s29  ;;  %s388_s30 = scalar_lea.vmem [#allocation5], %s12961_s21 }
  0x2e   : > { %s395_s16 = sshll.u32 %s388_s30, 4  ;;  %p14298_p7 = pnand %p13679_p8, %p110_p9  ;;  %s14296_s16 = int_to_ptr.vmem [resolvable:$true] %s395_s16 }
  0x2f   : > { %s14302_s18 = scalar_lea.sflag [#allocation6], %s384_s20  ;;  %s14055_s19 = scalar_lea.hbm %s14294_s13, 256 }
  0x30   : > { %p14056_p10 = scmp.ne.s32.totalorder %s14294_s13, %s14055_s19  ;;  %p14057_p11 = pneg %p14298_p7 }
  0x31   : > { %s14060_s21 = scalar_lea.hbm %s16495_s3, 512  ;;  %p14061_p0 = scmp.lt.u32.totalorder %s14294_s13, %s16495_s3 }
  0x32   : > { %p14058_p12 = pnand %p14057_p11, %p14056_p10  ;;  %p14062_p2 = scmp.lt.u32.totalorder %s14060_s21, %s14055_s19 }
  0x33   : > { %p14064_p6 = scmp.lt.u32.totalorder %s14055_s19, %s14294_s13 }
  0x34   : > { %p14059_p13 = pneg %p14058_p12  ;;  %p14063_p3 = por %p14062_p2, %p14061_p0 }
  0x36   : > { %p14065_p1 = por %p14064_p6, %p14063_p3 }
  0x38   : > { %p14066_p4 = pnand %p14065_p1, %p14059_p13 }
  0x3a   : > { %14069 = shalt.err (!%p14066_p4)
}
  0x3b   : > { %s14070_s20 = scalar_lea.vmem %s14296_s16, 256  ;;  %s14128_s9 = smov [#allocation5]  }
  0x3c   : > { %p14071_p5 = scmp.ne.s32.totalorder %s14296_s16, %s14070_s20  ;;  %s14075_s14 = sshll.u32 %s14128_s9, 4  ;;  %s14076_s14 = int_to_ptr.vmem [resolvable:$false] %s14075_s14 }
  0x3d   : > { %s14077_s29 = scalar_lea.vmem %s14076_s14, 512  ;;  %p14078_p10 = scmp.lt.s32.totalorder %s14296_s16, %s14076_s14 }
  0x3e   : > { %p14073_p8 = pnand %p14071_p5, %p14057_p11  ;;  %p14079_p12 = scmp.lt.s32.totalorder %s14077_s29, %s14070_s20 }
  0x40   : > { %p14074_p9 = pneg %p14073_p8  ;;  %p14080_p0 = por %p14079_p12, %p14078_p10 }
  0x42   : > { %p14081_p2 = pnand %p14080_p0, %p14074_p9 }
  0x44   : > { %14084 = shalt.err (!%p14081_p2)
}
  0x45   : > { %13677 = dma.hbm_to_vmem [thread:$0]  (!%p14298_p7), %s14294_s13, 256, %s14296_s16, %s14302_s18, %s14126_s17, %s14126_s17, %s14127_s25  }
  0x46   : > { %p16533_p11 = scmp.ne.s32.totalorder %s16529_s28, 0 }
  0x48   : > { %417 = sbr.rel (%p16533_p11) target bundleno = 1970 (0x7b2), region = 68 }
  0x4f   : > { %p16534_p13 = scmp.ne.s32.totalorder %s16527_s26, 0 }
  0x51   : > { %14102 = dma.done.wait (%p16534_p13), [#allocation4], 256  }
  0x52   : > { %14104 = vsyncadd (%p16534_p13), [#allocation4], 4294967040  ;;  %s423_s19 = sand.u32 1, %s14115_s22   ;;  %p16535_p3 = scmp.ne.s32.totalorder %s16528_s27, 0 }
  0x53   : > { %s12966_s15 = sshll.u32 %s423_s19, 4  ;;  %s424_s21 = scalar_lea.sflag [#allocation6], %s423_s19 }
  0x54   : > { %s14340_s30 = scalar_lea.vmem [#allocation5], %s12966_s15 }
  0x55   : > { %14106 = dma.done.wait (%p16535_p3), %s424_s21, 256  }
  0x56   : > { %14108 = vsyncadd (%p16535_p3), %s424_s21, 4294967040  ;;  %s16536_s28 = sadd.s32 4294967295, %s14123_s24   ;;  %s14129_s18 = smov 80   ;;  %v14387_v2 = vld [vmem:[%s14340_s30] sm:$0xff]  ;;  %v5086_v3 = vld [vmem:[%s14340_s30 + $0x8] sm:$0xff]  ;;  %vm3992_vm0 = vcmask 130048  }
  0x57   : > { %s12967_s17 = sshll.u32 %s16536_s28, 1  ;;  %s14130_s27 = smov 112   ;;  %vm14878_vm1 = vmpackc.low %vm3992_vm0, %vm3992_vm0  ;;  %vm6701_vm2 = vcmask 64512   ;;  %vm9398_vm4 = vcmask 31744   ;;  %vm5035_vm6 = vcmask 261120   ;;  %vm5038_vm7 = vcmask 392192  }
  0x58   : > { %p482_p7 = scmp.lt.s32.totalorder %s12967_s17, 3  ;;  %s14131_s24 = smov 64   ;;  %vm15072_vm3 = vmpackc.low %vm6701_vm2, %vm6701_vm2  ;;  %vm5041_vm8 = vcmask 523264   ;;  %vm5044_vm9 = vcmask 654336   ;;  %vm5047_vm10 = vcmask 785408   ;;  %vm5050_vm11 = vcmask 916480  }
  0x59   : > { %s16512_s20 = smov 96   ;;  %s14133_s9 = smov 32   ;;  %vm15149_vm5 = vmpackc.low %vm9398_vm4, %vm9398_vm4  ;;  %vm12627_vm12 = vcmask 1041408   ;;  %vm12628_vm13 = vcmask 1045508   ;;  %vm12720_vm15 = vcmask 1046528  }
  0x5a   : > { %s16618_s17 = smov (!%p482_p7, %s12967_s17), 3  ;;  %s14134_s14 = smov 48   ;;  %vm16412_vm14 = vmor %vm12627_vm12, %vm12628_vm13 }
  0x5b   : > { %s13178_s26 = sshll.u32 %s16618_s17, 3  ;;  %s14135_s29 = smov 16  }
  0x5c   : > { %s486_s16 = scalar_lea.vmem %s16492_s0, %s13178_s26  ;;  %s14136_s19 = smov 120  }
  0x5d   : > { %v14354_v0 = vld [vmem:[%s486_s16] sm:$0xff]  ;;  %v14368_v1 = vld [vmem:[%s486_s16 + $0x8] sm:$0xff]  ;;  %s14137_s15 = smov 104   ;;  %s14138_s21 = smov 88  }
  0x5e   : > { %528 = vrot.lane.b32.xlu1 %v14354_v0, %s14129_s18  ;;  %512 = vrot.lane.b32.xlu0 %v14354_v0, %s14130_s27  ;;  %s14139_s28 = smov 72   ;;  %s13179_s26 = sshll.u32 %s16618_s17, 4  ;;  %v508_v17 = vrot.slane %v14354_v0, 4  ;;  %v509_v33 = vrot.slane %v14368_v1, 4 }
  0x5f   : > { %s14408_s16 = scalar_lea.vmem %s16498_s6, %s13179_s26  ;;  %s16612_s13 = sld [smem:[#allocation22_spill]] }
  0x60   : > { %v8452_v4 = vld [vmem:[%s14408_s16] sm:$0xff]  ;;  %v8453_v5 = vld [vmem:[%s14408_s16 + $0x8] sm:$0xff]  ;;  %v8454_v6 = vld [vmem:[%s14408_s16 + $0x10] sm:$0xff] }
  0x61   : > { %v8455_v7 = vld [vmem:[%s14408_s16 + $0x18] sm:$0xff] }
  0x62   : > { %536 = vrot.lane.b32.xlu1 %v14354_v0, %s14131_s24  ;;  %520 = vrot.lane.b32.xlu0 %v14354_v0, %s16512_s20 }
  0x66   : > { %552 = vrot.lane.b32.xlu1 %v14354_v0, %s14133_s9  ;;  %544 = vrot.lane.b32.xlu0 %v14354_v0, %s14134_s14 }
  0x6a   : > { %514 = vrot.lane.b32.xlu1 %v14368_v1, %s14130_s27  ;;  %560 = vrot.lane.b32.xlu0 %v14354_v0, %s14135_s29 }
  0x6e   : > { %530 = vrot.lane.b32.xlu1 %v14368_v1, %s14129_s18  ;;  %522 = vrot.lane.b32.xlu0 %v14368_v1, %s16512_s20 }
  0x72   : > { %546 = vrot.lane.b32.xlu1 %v14368_v1, %s14134_s14  ;;  %538 = vrot.lane.b32.xlu0 %v14368_v1, %s14131_s24 }
  0x76   : > { %562 = vrot.lane.b32.xlu1 %v14368_v1, %s14135_s29  ;;  %554 = vrot.lane.b32.xlu0 %v14368_v1, %s14133_s9 }
  0x7a   : > { %5095 = vrot.lane.b32.xlu1 %v14387_v2, %s14130_s27  ;;  %5089 = vrot.lane.b32.xlu0 %v14387_v2, %s14136_s19 }
  0x7e   : > { %5107 = vrot.lane.b32.xlu1 %v14387_v2, %s16512_s20  ;;  %5101 = vrot.lane.b32.xlu0 %v14387_v2, %s14137_s15 }
  0x82   : > { %5119 = vrot.lane.b32.xlu1 %v14387_v2, %s14129_s18  ;;  %5113 = vrot.lane.b32.xlu0 %v14387_v2, %s14138_s21 }
  0x86   : > { %5091 = vrot.lane.b32.xlu1 %v5086_v3, %s14136_s19  ;;  %5125 = vrot.lane.b32.xlu0 %v14387_v2, %s14139_s28 }
  0x8a   : > { %5103 = vrot.lane.b32.xlu1 %v5086_v3, %s14137_s15  ;;  %5097 = vrot.lane.b32.xlu0 %v5086_v3, %s14130_s27  ;;  %s14140_s15 = smov 116  }
  0x8e   : > { %5109 = vrot.lane.b32.xlu1 %v5086_v3, %s16512_s20  ;;  %5127 = vrot.lane.b32.xlu0 %v5086_v3, %s14139_s28  ;;  %s14141_s20 = smov 124   ;;  %s16609_s28 = sld [smem:[#allocation21_spill]] }
  0x92   : > { %5115 = vrot.lane.b32.xlu1 %v5086_v3, %s14138_s21  ;;  %8472 = vrot.lane.b32.xlu0 %v8452_v4, %s14136_s19 }
  0x96   : > { %5121 = vrot.lane.b32.xlu1 %v5086_v3, %s14129_s18  ;;  %8486 = vrot.lane.b32.xlu0 %v8453_v5, %s14140_s15 }
  0x9a   : > { %8460 = vrot.lane.b32.xlu1 %v8452_v4, %s14141_s20  ;;  %8476 = vrot.lane.b32.xlu0 %v8454_v6, %s14136_s19 }
  0x9e   : > { %8484 = vrot.lane.b32.xlu1 %v8452_v4, %s14140_s15  ;;  %8490 = vrot.lane.b32.xlu0 %v8455_v7, %s14140_s15 }
  0xa2   : > { %8462 = vrot.lane.b32.xlu1 %v8453_v5, %s14141_s20 }
  0xa6   : > { %8474 = vrot.lane.b32.xlu1 %v8453_v5, %s14136_s19 }
  0xaa   : > { %8464 = vrot.lane.b32.xlu1 %v8454_v6, %s14141_s20 }
  0xae   : > { %8488 = vrot.lane.b32.xlu1 %v8454_v6, %s14140_s15 }
  0xb2   : > { %8466 = vrot.lane.b32.xlu1 %v8455_v7, %s14141_s20  ;;  %s16572_s20 = smov 96  }
  0xb6   : > { %8478 = vrot.lane.b32.xlu1 %v8455_v7, %s14136_s19 }
  0xd0   : > { %v513_v8 = vpop.permute.xlu0 %512  ;;  %v529_v10 = vpop.permute.xlu1 %528 }
  0xd1   : > { %648 = vxpose.xlu0.b32.start.end [1/1] (short) (narrow) %v513_v8, 16  ;;  %v516_v15 = vrot.slane %v513_v8, 4  ;;  %v532_v18 = vrot.slane %v529_v10, 4  ;;  %v14142_v8 = vmov 1983009808  }
  0xd4   : > { %v521_v9 = vpop.permute.xlu0 %520  ;;  %v537_v12 = vpop.permute.xlu1 %536 }
  0xd5   : > { %v524_v20 = vrot.slane %v521_v9, 4  ;;  %v540_v23 = vrot.slane %v537_v12, 4 }
  0xd6   : > { %712 = vxpose.xlu0.b32.start.end [1/1] (short) (narrow) %v521_v9, 16  ;;  %v1611_v9 = vunpack.c.l.s4 %v14142_v8 }
  0xd8   : > { %v545_v11 = vpop.permute.xlu0 %544  ;;  %v553_v14 = vpop.permute.xlu1 %552 }
  0xd9   : > { %v548_v21 = vrot.slane %v545_v11, 4  ;;  %v556_v26 = vrot.slane %v553_v14, 4 }
  0xdb   : > { %776 = vxpose.xlu0.b32.start.end [1/1] (short) (narrow) %v529_v10, 16  ;;  %v1613_v10 = vlaneseq }
  0xdc   : > { %v561_v13 = vpop.permute.xlu0 %560  ;;  %v515_v16 = vpop.permute.xlu1 %514 }
  0xdd   : > { %v564_v24 = vrot.slane %v561_v13, 4  ;;  %v517_v36 = vrot.slane %v515_v16, 4 }
  0xdf   : > { %584 = vxpose.xlu1.b32.start.end [1/1] (short) (narrow) %v14354_v0, 16 }
  0xe0   : > { %904 = vxpose.xlu0.b32.start.end [1/1] (short) (narrow) %v545_v11, 16  ;;  %v531_v19 = vpop.permute.xlu1 %530  ;;  %v523_v27 = vpop.permute.xlu0 %522 }
  0xe1   : > { %v525_v35 = vrot.slane %v523_v27, 4  ;;  %v533_v40 = vrot.slane %v531_v19, 4 }
  0xe4   : > { %840 = vxpose.xlu1.b32.start.end [1/1] (short) (narrow) %v537_v12, 16  ;;  %v547_v22 = vpop.permute.xlu1 %546  ;;  %v539_v29 = vpop.permute.xlu0 %538 }
  0xe5   : > { %1032 = vxpose.xlu0.b32.start.end [1/1] (short) (narrow) %v561_v13, 16  ;;  %v541_v39 = vrot.slane %v539_v29, 4  ;;  %v549_v43 = vrot.slane %v547_v22, 4  ;;  %v1612_v13 = vunpack.c.0.s8 %v1611_v9 }
  0xe8   : > { %v563_v25 = vpop.permute.xlu1 %562  ;;  %v555_v31 = vpop.permute.xlu0 %554 }
  0xe9   : > { %968 = vxpose.xlu1.b32.start.end [1/1] (short) (narrow) %v553_v14, 16  ;;  %v557_v42 = vrot.slane %v555_v31, 4  ;;  %v565_v46 = vrot.slane %v563_v25, 4  ;;  %v1614_v14 = vshrl.u32 %v1613_v10, 7 }
  0xea   : > { %1160 = vxpose.xlu0.b32.start.end [1/1] (short) (narrow) %v516_v15, 16 }
  0xec   : > { %v5096_v28 = vpop.permute.xlu1 %5095  ;;  %v5090_v37 = vpop.permute.xlu0 %5089 }
  0xee   : > { %1096 = vxpose.xlu1.b32.start.end [1/1] (short) (narrow) %v508_v17, 16  ;;  %v14143_v17 = vmov 1934713408  }
  0xef   : > { %1288 = vxpose.xlu0.b32.start.end [1/1] (short) (narrow) %v532_v18, 16  ;;  %v1675_v18 = vunpack.c.l.s4 %v14143_v17 }
  0xf0   : > { %v5108_v30 = vpop.permute.xlu1 %5107  ;;  %v5102_v41 = vpop.permute.xlu0 %5101 }
  0xf3   : > { %1224 = vxpose.xlu1.b32.start.end [1/1] (short) (narrow) %v524_v20, 16  ;;  %v14488_v20 = vsub.s32 %v1612_v13, %v1614_v14 }
  0xf4   : > { %1416 = vxpose.xlu0.b32.start.end [1/1] (short) (narrow) %v548_v21, 16  ;;  %v5120_v32 = vpop.permute.xlu1 %5119  ;;  %v5114_v45 = vpop.permute.xlu0 %5113 }
  0xf8   : > { %1352 = vxpose.xlu1.b32.start.end [1/1] (short) (narrow) %v540_v23, 16  ;;  %v14423_v34 = vpop.permute.xlu1 %5091  ;;  %v5126_v48 = vpop.permute.xlu0 %5125 }
  0xf9   : > { %1544 = vxpose.xlu0.b32.start.end [1/1] (short) (narrow) %v564_v24, 16 }
  0xfc   : > { %v14425_v38 = vpop.permute.xlu1 %5103  ;;  %v14434_v50 = vpop.permute.xlu0 %5097 }
  0xfd   : > { %1480 = vxpose.xlu1.b32.start.end [1/1] (short) (narrow) %v556_v26, 16 }
  0xfe   : > { %680 = vxpose.xlu0.b32.start.end [1/1] (short) (narrow) %v515_v16, 16 }
 0x100   : > { %v14427_v44 = vpop.permute.xlu1 %5109  ;;  %v14438_v52 = vpop.permute.xlu0 %5127 }
 0x102   : > { %616 = vxpose.xlu1.b32.start.end [1/1] (short) (narrow) %v14368_v1, 16 }
 0x103   : > { %744 = vxpose.xlu0.b32.start.end [1/1] (short) (narrow) %v523_v27, 16 }
 0x104   : > { %v14429_v47 = vpop.permute.xlu1 %5115  ;;  %v14442_v54 = vpop.permute.xlu0 %8472 }
 0x107   : > { %872 = vxpose.xlu1.b32.start.end [1/1] (short) (narrow) %v539_v29, 16 }
 0x108   : > { %808 = vxpose.xlu0.b32.start.end [1/1] (short) (narrow) %v531_v19, 16  ;;  %v14432_v49 = vpop.permute.xlu1 %5121  ;;  %v14446_v56 = vpop.permute.xlu0 %8486 }
 0x109   : > { %16538 = vst [vmem:[#allocation11_spill] sm:$0xff] %v14446_v56 }
 0x10c   : > { %1000 = vxpose.xlu1.b32.start.end [1/1] (short) (narrow) %v555_v31, 16  ;;  %v14436_v51 = vpop.permute.xlu1 %8460  ;;  %v14450_v58 = vpop.permute.xlu0 %8476 }
 0x10d   : > { %936 = vxpose.xlu0.b32.start.end [1/1] (short) (narrow) %v547_v22, 16  ;;  %16539 = vst [vmem:[#allocation12_spill] sm:$0xff] %v14450_v58 }
 0x110   : > { %v14440_v53 = vpop.permute.xlu1 %8484  ;;  %v14454_v60 = vpop.permute.xlu0 %8490 }
 0x111   : > { %1128 = vxpose.xlu1.b32.start.end [1/1] (short) (narrow) %v509_v33, 16  ;;  %16537 = vst [vmem:[#allocation10_spill] sm:$0xff] %v14440_v53  ;;  %16541 = vst [vmem:[#allocation14_spill] sm:$0xff] %v14454_v60 }
 0x112   : > { %1064 = vxpose.xlu0.b32.start.end [1/1] (short) (narrow) %v563_v25, 16  ;;  %v1676_v25 = vunpack.c.0.s8 %v1675_v18 }
 0x114   : > { %v14444_v55 = vpop.permute.xlu1 %8462  ;;  %v14503_v33 = vsub.s32 %v1676_v25, %v1614_v14 }
 0x116   : > { %1256 = vxpose.xlu1.b32.start.end [1/1] (short) (narrow) %v525_v35, 16 }
 0x117   : > { %1192 = vxpose.xlu0.b32.start.end [1/1] (short) (narrow) %v517_v36, 16 }
 0x118   : > { %v14448_v57 = vpop.permute.xlu1 %8474 }
 0x11b   : > { %1384 = vxpose.xlu1.b32.start.end [1/1] (short) (narrow) %v541_v39, 16 }
 0x11c   : > { %1320 = vxpose.xlu0.b32.start.end [1/1] (short) (narrow) %v533_v40, 16  ;;  %v14452_v59 = vpop.permute.xlu1 %8464 }
 0x11d   : > { %16540 = vst [vmem:[#allocation13_spill] sm:$0xff] %v14452_v59 }
 0x120   : > { %1512 = vxpose.xlu1.b32.start.end [1/1] (short) (narrow) %v557_v42, 16  ;;  %v14456_v61 = vpop.permute.xlu1 %8488 }
 0x121   : > { %1448 = vxpose.xlu0.b32.start.end [1/1] (short) (narrow) %v549_v43, 16  ;;  %16542 = vst [vmem:[#allocation15_spill] sm:$0xff] %v14456_v61 }
 0x124   : > { %v14460_v63 = vpop.permute.xlu1 %8466 }
 0x125   : > { %5133 = vxpose.xlu1.b32.start.end [1/1] (short) (narrow) %v14387_v2, 8  ;;  %16543 = vst [vmem:[#allocation16_spill] sm:$0xff] %v14460_v63 }
 0x126   : > { %1576 = vxpose.xlu0.b32.start.end [1/1] (short) (narrow) %v565_v46, 16 }
 0x128   : > { %v14466_v2 = vpop.permute.xlu1 %8478 }
 0x129   : > { %5389 = vxpose.xlu1.b32.start.end [1/1] (short) (narrow) %v5108_v30, 8  ;;  %16544 = vst [vmem:[#allocation17_spill] sm:$0xff] %v14466_v2 }
 0x12b   : > { %5197 = vxpose.xlu0.b32.start.end [1/1] (short) (narrow) %v5090_v37, 8 }
 0x12d   : > { %5517 = vxpose.xlu1.b32.start.end [1/1] (short) (narrow) %v5120_v32, 8 }
 0x12f   : > { %5261 = vxpose.xlu0.b32.start.end [1/1] (short) (narrow) %v5096_v28, 8 }
 0x133   : > { %5325 = vxpose.xlu0.b32.start.end [1/1] (short) (narrow) %v5102_v41, 8 }
 0x137   : > { %5453 = vxpose.xlu0.b32.start.end [1/1] (short) (narrow) %v5114_v45, 8 }
 0x13b   : > { %5581 = vxpose.xlu0.b32.start.end [1/1] (short) (narrow) %v5126_v48, 8 }
 0x151   : > { %v14458_v62 = vpop.trf.xlu0 }
 0x155   : > { %v14462_v0 = vpop.trf.xlu0 }
 0x159   : > { %v14464_v1 = vpop.trf.xlu0 }
 0x15d   : > { %v14468_v3 = vpop.trf.xlu0 }
 0x15f   : > { %v14470_v4 = vpop.trf.xlu1 }
 0x160   : > { %v1608_v21 = vcombine.low %v14470_v4, %v14464_v1 }
 0x161   : > { %v14472_v5 = vpop.trf.xlu0 }
 0x162   : > { %v1624_v16 = vcombine.low %v14458_v62, %v14472_v5  ;;  %v1616_v27 = vrot.slane %v1608_v21, %v14488_v20 }
 0x163   : > { %v14474_v6 = vpop.trf.xlu1 }
 0x164   : > { %v14493_v23 = vrot.slane %v1624_v16, %v14488_v20 }
 0x165   : > { %v14476_v7 = vpop.trf.xlu0 }
 0x166   : > { %v1672_v31 = vcombine.low %v1616_v27, %v14493_v23  ;;  %v1673_v59 = vcombine.high %v1616_v27, %v14493_v23 }
 0x167   : > { %v14478_v11 = vpop.trf.xlu1 }
 0x168   : > { %v1680_v39 = vrot.slane %v1672_v31, %v14503_v33 }
 0x169   : > { %v14480_v12 = vpop.trf.xlu0 }
 0x16b   : > { %v14482_v15 = vpop.trf.xlu1 }
 0x16d   : > { %v14486_v19 = vpop.trf.xlu0 }
 0x16f   : > { %v984_v22 = vpop.trf.xlu1 }
 0x170   : > { %v1640_v24 = vcombine.low %v14478_v11, %v984_v22  ;;  %v1641_v61 = vcombine.high %v14478_v11, %v984_v22 }
 0x171   : > { %v1048_v26 = vpop.trf.xlu0 }
 0x172   : > { %v1648_v28 = vrot.slane %v1640_v24, %v14488_v20  ;;  %v1656_v29 = vcombine.low %v14480_v12, %v1048_v26  ;;  %v1657_v2 = vcombine.high %v14480_v12, %v1048_v26  ;;  %v14547_v12 = vrot.slane %v1641_v61, %v14488_v20 }
 0x173   : > { %v14499_v30 = vpop.trf.xlu1 }
 0x174   : > { %v1664_v32 = vrot.slane %v1656_v29, %v14488_v20  ;;  %v1671_v22 = vrot.slane %v1657_v2, %v14488_v20 }
 0x175   : > { %v14505_v35 = vpop.trf.xlu0 }
 0x176   : > { %v1704_v36 = vcombine.low %v1648_v28, %v1664_v32  ;;  %v1705_v63 = vcombine.high %v1648_v28, %v1664_v32 }
 0x177   : > { %v14507_v37 = vpop.trf.xlu1 }
 0x178   : > { %v1712_v40 = vrot.slane %v1704_v36, %v14503_v33 }
 0x179   : > { %v14511_v41 = vpop.trf.xlu0 }
 0x17a   : > { %v1737_v42 = vcombine.high %v1680_v39, %v1712_v40  ;;  %v1736_v43 = vcombine.low %v1680_v39, %v1712_v40 }
 0x17b   : > { %v14513_v45 = vpop.trf.xlu1 }
 0x17c   : > { %2728 = vxpose.xlu0.b32.start [1/2] (short) (narrow) %v1737_v42, 8  ;;  %2696 = vxpose.xlu1.b32.start [1/2] (short) (narrow) %v1736_v43, 8 }
 0x17d   : > { %v14515_v46 = vpop.trf.xlu0 }
 0x17f   : > { %v1240_v48 = vpop.trf.xlu1 }
 0x180   : > { %v1744_v18 = vcombine.low %v14507_v37, %v1240_v48 }
 0x181   : > { %v1304_v8 = vpop.trf.xlu0 }
 0x182   : > { %v1760_v17 = vcombine.low %v14511_v41, %v1304_v8  ;;  %v1752_v29 = vrot.slane %v1744_v18, %v14488_v20  ;;  %v1625_v18 = vcombine.high %v14458_v62, %v14472_v5  ;;  %v1719_v62 = vrot.slane %v1705_v63, %v14503_v33 }
 0x183   : > { %v14517_v9 = vpop.trf.xlu1  ;;  %v1761_v61 = vcombine.high %v14511_v41, %v1304_v8  ;;  %v1720_v63 = vcombine.low %v14547_v12, %v1671_v22 }
 0x184   : > { %v1768_v25 = vrot.slane %v1760_v17, %v14488_v20 }
 0x185   : > { %v14519_v10 = vpop.trf.xlu0  ;;  %v14573_v8 = vrot.slane %v1761_v61, %v14488_v20 }
 0x186   : > { %v1808_v43 = vcombine.low %v1752_v29, %v1768_v25  ;;  %v1809_v2 = vcombine.high %v1752_v29, %v1768_v25 }
 0x187   : > { %v1368_v13 = vpop.trf.xlu1 }
 0x188   : > { %v1823_v29 = vrot.slane %v1809_v2, %v14503_v33 }
 0x189   : > { %v1432_v14 = vpop.trf.xlu0 }
 0x18b   : > { %v14521_v16 = vpop.trf.xlu1 }
 0x18d   : > { %v14525_v21 = vpop.trf.xlu0 }
 0x18f   : > { %v1496_v24 = vpop.trf.xlu1 }
 0x190   : > { %v1776_v31 = vcombine.low %v1368_v13, %v1496_v24  ;;  %v1777_v26 = vcombine.high %v1368_v13, %v1496_v24 }
 0x191   : > { %v1560_v36 = vpop.trf.xlu0 }
 0x192   : > { %v1792_v39 = vcombine.low %v1432_v14, %v1560_v36  ;;  %v1784_v40 = vrot.slane %v1776_v31, %v14488_v20  ;;  %v1609_v31 = vcombine.high %v14470_v4, %v14464_v1  ;;  %v1793_v5 = vcombine.high %v1432_v14, %v1560_v36 }
 0x193   : > { %v14530_v42 = vpop.trf.xlu1  ;;  %v1639_v1 = vrot.slane %v1625_v18, %v14488_v20  ;;  %v1687_v4 = vrot.slane %v1673_v59, %v14503_v33  ;;  %v14567_v59 = vrot.slane %v1777_v26, %v14488_v20 }
 0x194   : > { %v1800_v60 = vrot.slane %v1792_v39, %v14488_v20  ;;  %v1816_v39 = vrot.slane %v1808_v43, %v14503_v33  ;;  %v1623_v13 = vrot.slane %v1609_v31, %v14488_v20  ;;  %v14564_v24 = vrot.slane %v1793_v5, %v14488_v20 }
 0x195   : > { %v14535_v58 = vpop.trf.xlu0  ;;  %v1738_v14 = vcombine.low %v1687_v4, %v1719_v62  ;;  %v1739_v36 = vcombine.high %v1687_v4, %v1719_v62  ;;  %v1880_v62 = vcombine.low %v14474_v6, %v14468_v3  ;;  %v1928_v4 = vcombine.low %v14486_v19, %v14505_v35 }
 0x196   : > { %v1840_v17 = vcombine.low %v1784_v40, %v1800_v60  ;;  %v1841_v23 = vcombine.high %v1784_v40, %v1800_v60  ;;  %v1856_v18 = vcombine.low %v14567_v59, %v14564_v24 }
 0x197   : > { %v14540_v56 = vpop.trf.xlu1 }
 0x198   : > { %v1848_v11 = vrot.slane %v1840_v17, %v14503_v33  ;;  %v1745_v17 = vcombine.high %v14507_v37, %v1240_v48  ;;  %v1855_v41 = vrot.slane %v1841_v23, %v14503_v33  ;;  %v1688_v37 = vcombine.low %v1623_v13, %v1639_v1 }
 0x199   : > { %v14550_v28 = vpop.trf.xlu0 }
 0x19a   : > { %v1873_v27 = vcombine.high %v1816_v39, %v1848_v11  ;;  %v1872_v32 = vcombine.low %v1816_v39, %v1848_v11  ;;  %v14576_v25 = vrot.slane %v1745_v17, %v14488_v20  ;;  %v1874_v31 = vcombine.low %v1823_v29, %v1855_v41 }
 0x19b   : > { %v14555_v43 = vpop.trf.xlu1  ;;  %v1875_v39 = vcombine.high %v1823_v29, %v1855_v41  ;;  %v1728_v11 = vrot.slane %v1720_v63, %v14503_v33  ;;  %v1696_v23 = vrot.slane %v1688_v37, %v14503_v33  ;;  %v1864_v63 = vrot.slane %v1856_v18, %v14503_v33 }
 0x19c   : > { %2729 = vxpose.xlu0.b32.end [2/2] (short) (narrow) %v1873_v27, 8  ;;  %2697 = vxpose.xlu1.b32.end [2/2] (short) (narrow) %v1872_v32, 8  ;;  %v1824_v5 = vcombine.low %v14576_v25, %v14573_v8  ;;  %v1721_v27 = vcombine.high %v14547_v12, %v1671_v22  ;;  %v1912_v32 = vcombine.low %v14482_v15, %v14499_v30 }
 0x19d   : > { %v14561_v60 = vpop.trf.xlu0  ;;  %v1740_v17 = vcombine.low %v1696_v23, %v1728_v11  ;;  %v1741_v2 = vcombine.high %v1696_v23, %v1728_v11  ;;  %v1881_v12 = vcombine.high %v14474_v6, %v14468_v3  ;;  %v14606_v22 = vrot.slane %v1880_v62, %v14488_v20 }
 0x19e   : > { %v1832_v37 = vrot.slane %v1824_v5, %v14503_v33  ;;  %v14610_v29 = vrot.slane %v1912_v32, %v14488_v20  ;;  %v1735_v3 = vrot.slane %v1721_v27, %v14503_v33  ;;  %v1857_v6 = vcombine.high %v14567_v59, %v14564_v24 }
 0x19f   : > { %v14570_v48 = vpop.trf.xlu1  ;;  %v1897_v62 = vcombine.high %v14462_v0, %v14476_v7  ;;  %v1913_v23 = vcombine.high %v14482_v15, %v14499_v30  ;;  %v1825_v24 = vcombine.high %v14576_v25, %v14573_v8  ;;  %v2032_v59 = vcombine.low %v14515_v46, %v14519_v10 }
 0x1a0   : > { %2760 = vxpose.xlu0.b32.start [1/2] (short) (narrow) %v1738_v14, 8  ;;  %2792 = vxpose.xlu1.b32.start [1/2] (short) (narrow) %v1739_v36, 8  ;;  %v1689_v14 = vcombine.high %v1623_v13, %v1639_v1  ;;  %v1896_v36 = vcombine.low %v14462_v0, %v14476_v7  ;;  %v14613_v1 = vrot.slane %v1928_v4, %v14488_v20 }
 0x1a1   : > { %v14579_v40 = vpop.trf.xlu0  ;;  %v2048_v13 = vcombine.low %v14521_v16, %v14530_v42  ;;  %v1877_v11 = vcombine.high %v1832_v37, %v1864_v63  ;;  %v2016_v27 = vcombine.low %v14513_v45, %v14517_v9  ;;  %v1929_v0 = vcombine.high %v14486_v19, %v14505_v35 }
 0x1a2   : > { %v1904_v5 = vrot.slane %v1896_v36, %v14488_v20  ;;  %v1703_v32 = vrot.slane %v1689_v14, %v14503_v33  ;;  %v1976_v7 = vcombine.low %v14610_v29, %v14613_v1  ;;  %v14654_v19 = vrot.slane %v1897_v62, %v14488_v20 }
 0x1a3   : > { %v14584_v26 = vpop.trf.xlu1  ;;  %v14658_v14 = vrot.slane %v2032_v59, %v14488_v20  ;;  %v14661_v36 = vrot.slane %v2016_v27, %v14488_v20 }
 0x1a4   : > { %2761 = vxpose.xlu0.b32.end [2/2] (short) (narrow) %v1874_v31, 8  ;;  %2793 = vxpose.xlu1.b32.end [2/2] (short) (narrow) %v1875_v39, 8  ;;  %v2064_v31 = vcombine.low %v14525_v21, %v14535_v58  ;;  %v1876_v39 = vcombine.low %v1832_v37, %v1864_v63  ;;  %v1742_v30 = vcombine.low %v1703_v32, %v1735_v3 }
 0x1a5   : > { %v14596_v61 = vpop.trf.xlu0  ;;  %v1871_v63 = vrot.slane %v1857_v6, %v14503_v33  ;;  %v1944_v35 = vcombine.low %v14606_v22, %v1904_v5  ;;  %v1839_v37 = vrot.slane %v1825_v24, %v14503_v33  ;;  %v1927_v6 = vrot.slane %v1913_v23, %v14488_v20 }
 0x1a6   : > { %v14647_v25 = vrot.slane %v2064_v31, %v14488_v20  ;;  %v1943_v31 = vrot.slane %v1929_v0, %v14488_v20  ;;  %v1984_v24 = vrot.slane %v1976_v7, %v14503_v33  ;;  %v2033_v7 = vcombine.high %v14515_v46, %v14519_v10 }
 0x1a7   : > { %v14601_v41 = vpop.trf.xlu1  ;;  %v1879_v59 = vcombine.high %v1839_v37, %v1871_v63  ;;  %v1952_v23 = vrot.slane %v1944_v35, %v14503_v33  ;;  %v2065_v35 = vcombine.high %v14525_v21, %v14535_v58 }
 0x1a8   : > { %2824 = vxpose.xlu0.b32.start [1/2] (short) (narrow) %v1740_v17, 8  ;;  %2856 = vxpose.xlu1.b32.start [1/2] (short) (narrow) %v1741_v2, 8  ;;  %v14650_v17 = vrot.slane %v2048_v13, %v14488_v20  ;;  %v1743_v2 = vcombine.high %v1703_v32, %v1735_v3  ;;  %v14665_v13 = vrot.slane %v1881_v12, %v14488_v20 }
 0x1a9   : > { %v14617_v18 = vpop.trf.xlu0  ;;  %v1945_v3 = vcombine.high %v14606_v22, %v1904_v5  ;;  %v1878_v32 = vcombine.low %v1839_v37, %v1871_v63  ;;  %v1977_v22 = vcombine.high %v14610_v29, %v14613_v1  ;;  %v2080_v5 = vcombine.low %v14661_v36, %v14658_v14 }
 0x1aa   : > { %v2112_v62 = vcombine.low %v14650_v17, %v14647_v25  ;;  %v1960_v12 = vcombine.low %v14665_v13, %v14654_v19  ;;  %v1992_v0 = vcombine.low %v1927_v6, %v1943_v31  ;;  %v2008_v63 = vcombine.low %v1952_v23, %v1984_v24 }
 0x1ab   : > { %v14630_v4 = vpop.trf.xlu1  ;;  %v2009_v29 = vcombine.high %v1952_v23, %v1984_v24  ;;  %v1959_v37 = vrot.slane %v1945_v3, %v14503_v33  ;;  %v1991_v10 = vrot.slane %v1977_v22, %v14503_v33  ;;  %v14706_v3 = vrot.slane %v2033_v7, %v14488_v20 }
 0x1ac   : > { %2825 = vxpose.xlu0.b32.end [2/2] (short) (narrow) %v1876_v39, 8  ;;  %2857 = vxpose.xlu1.b32.end [2/2] (short) (narrow) %v1877_v11, 8  ;;  %v2457_v8 = vcombine.high %v14584_v26, %v14630_v4  ;;  %v2120_v1 = vrot.slane %v2112_v62, %v14503_v33  ;;  %v14699_v46 = vrot.slane %v1960_v12, %v14503_v33 }
 0x1ad   : > { %v14642_v15 = vpop.trf.xlu0  ;;  %v2081_v12 = vcombine.high %v14661_v36, %v14658_v14  ;;  %v14725_v22 = vrot.slane %v2065_v35, %v14488_v20  ;;  %v2011_v14 = vcombine.high %v1959_v37, %v1991_v10  ;;  %v2010_v36 = vcombine.low %v1959_v37, %v1991_v10 }
 0x1ae   : > { %v2471_v10 = vrot.slane %v2457_v8, %v14488_v20  ;;  %v2185_v53 = vcombine.high %v14570_v48, %v14601_v41 }
 0x1af   : > { %v14672_v11 = vpop.trf.xlu1  ;;  %v2095_v35 = vrot.slane %v2081_v12, %v14503_v33 }
 0x1b0   : > { %2888 = vxpose.xlu0.b32.start [1/2] (short) (narrow) %v1742_v30, 8  ;;  %2920 = vxpose.xlu1.b32.start [1/2] (short) (narrow) %v1743_v2, 8  ;;  %v2017_v30 = vcombine.high %v14513_v45, %v14517_v9  ;;  %v2440_v45 = vcombine.low %v14561_v60, %v14642_v15  ;;  %v2088_v9 = vrot.slane %v2080_v5, %v14503_v33 }
 0x1b1   : > { %v14670_v39 = vpop.trf.xlu0  ;;  %v2425_v5 = vcombine.high %v14555_v43, %v14596_v61 }
 0x1b2   : > { %v14709_v58 = vrot.slane %v2017_v30, %v14488_v20  ;;  %v2145_v62 = vcombine.high %v2088_v9, %v2120_v1  ;;  %v2144_v24 = vcombine.low %v2088_v9, %v2120_v1  ;;  %v2448_v23 = vrot.slane %v2440_v45, %v14488_v20 }
 0x1b3   : > { %v14696_v27 = vpop.trf.xlu1 }
 0x1b4   : > { %2889 = vxpose.xlu0.b32.end [2/2] (short) (narrow) %v1878_v32, 8  ;;  %2921 = vxpose.xlu1.b32.end [2/2] (short) (narrow) %v1879_v59, 8  ;;  %v1993_v32 = vcombine.high %v1927_v6, %v1943_v31  ;;  %v2049_v59 = vcombine.high %v14521_v16, %v14530_v42  ;;  %v2113_v16 = vcombine.high %v14650_v17, %v14647_v25 }
 0x1b5   : > { %v953_v2 = vpop.trf.xlu0  ;;  %v14716_v42 = vrot.slane %v1992_v0, %v14503_v33  ;;  %v2424_v6 = vcombine.low %v14555_v43, %v14596_v61  ;;  %v2441_v31 = vcombine.high %v14561_v60, %v14642_v15  ;;  %v2456_v60 = vcombine.low %v14584_v26, %v14630_v4 }
 0x1b6   : > { %v14728_v25 = vrot.slane %v2049_v59, %v14488_v20  ;;  %v14731_v17 = vrot.slane %v1993_v32, %v14503_v33  ;;  %v2096_v43 = vcombine.low %v14709_v58, %v14706_v3  ;;  %v2439_v59 = vrot.slane %v2425_v5, %v14488_v20 }
 0x1b7   : > { %v14738_v0 = vpop.trf.xlu1  ;;  %v2013_v7 = vcombine.high %v14699_v46, %v14716_v42  ;;  %v2012_v30 = vcombine.low %v14699_v46, %v14716_v42  ;;  %v2432_v61 = vrot.slane %v2424_v6, %v14488_v20  ;;  %v2464_v46 = vrot.slane %v2456_v60, %v14488_v20 }
 0x1b8   : > { %2952 = vxpose.xlu0.b32.start [1/2] (short) (narrow) %v2008_v63, 8  ;;  %2984 = vxpose.xlu1.b32.start [1/2] (short) (narrow) %v2009_v29, 8  ;;  %v2455_v63 = vrot.slane %v2441_v31, %v14488_v20  ;;  %v2127_v29 = vrot.slane %v2113_v16, %v14503_v33  ;;  %v2128_v1 = vcombine.low %v14728_v25, %v14725_v22 }
 0x1b9   : > { %v14713_v21 = vpop.trf.xlu0  ;;  %v2488_v45 = vcombine.low %v2432_v61, %v2448_v23  ;;  %v2489_v9 = vcombine.high %v2432_v61, %v2448_v23  ;;  %v2104_v26 = vrot.slane %v2096_v43, %v14503_v33 }
 0x1ba   : > { %v2504_v6 = vcombine.low %v2439_v59, %v2455_v63  ;;  %v2505_v31 = vcombine.high %v2439_v59, %v2455_v63  ;;  %v2136_v4 = vrot.slane %v2128_v1, %v14503_v33  ;;  %v2200_v43 = vcombine.low %v14670_v39, %v14713_v21 }
 0x1bb   : > { %v14762_v23 = vpop.trf.xlu1  ;;  %v14767_v8 = vrot.slane %v2488_v45, %v14503_v33  ;;  %v14775_v61 = vrot.slane %v2489_v9, %v14503_v33  ;;  %v2168_v9 = vcombine.low %v14550_v28, %v14617_v18 }
 0x1bc   : > { %2985 = vxpose.xlu1.b32.end [2/2] (short) (narrow) %v2145_v62, 8  ;;  %2953 = vxpose.xlu0.b32.end [2/2] (short) (narrow) %v2144_v24, 8  ;;  %v2147_v62 = vcombine.high %v2095_v35, %v2127_v29  ;;  %v2146_v24 = vcombine.low %v2095_v35, %v2127_v29  ;;  %v14786_v1 = vrot.slane %v2504_v6, %v14503_v33 }
 0x1bd   : > { %v1081_v15 = vpop.trf.xlu0 }
 0x1be   : > { %v2472_v37 = vcombine.low %v953_v2, %v1081_v15  ;;  %v2473_v32 = vcombine.high %v953_v2, %v1081_v15 }
 0x1c0   : > { %3048 = vxpose.xlu1.b32.start [1/2] (short) (narrow) %v2011_v14, 8  ;;  %3016 = vxpose.xlu0.b32.start [1/2] (short) (narrow) %v2010_v36, 8  ;;  %v2480_v16 = vrot.slane %v2472_v37, %v14488_v20  ;;  %v2487_v42 = vrot.slane %v2473_v32, %v14488_v20  ;;  %v14789_v37 = vrot.slane %v2505_v31, %v14503_v33  ;;  %v14812_v31 = vpop.trf.xlu1 }
 0x1c1   : > { %v14760_v2 = vpop.trf.xlu0 }
 0x1c2   : > { %v2520_v12 = vcombine.low %v2464_v46, %v2480_v16  ;;  %v2521_v5 = vcombine.high %v2464_v46, %v2480_v16  ;;  %v2536_v60 = vcombine.low %v2471_v10, %v2487_v42  ;;  %v2537_v15 = vcombine.high %v2471_v10, %v2487_v42 }
 0x1c3   : > { %v2184_v10 = vcombine.low %v14570_v48, %v14601_v41  ;;  %v2129_v42 = vcombine.high %v14728_v25, %v14725_v22  ;;  %v2149_v22 = vcombine.high %v2104_v26, %v2136_v4  ;;  %v2148_v25 = vcombine.low %v2104_v26, %v2136_v4 }
 0x1c4   : > { %3049 = vxpose.xlu1.b32.end [2/2] (short) (narrow) %v2147_v62, 8  ;;  %3017 = vxpose.xlu0.b32.end [2/2] (short) (narrow) %v2146_v24, 8  ;;  %v14772_v36 = vrot.slane %v2520_v12, %v14503_v33  ;;  %v14778_v63 = vrot.slane %v2521_v5, %v14503_v33  ;;  %v14781_v29 = vrot.slane %v2536_v60, %v14503_v33 }
 0x1c5   : > { %v14769_v14 = vpop.trf.xlu0  ;;  %v14792_v32 = vrot.slane %v2537_v15, %v14503_v33  ;;  %v14823_v12 = vrot.slane %v2200_v43, %v14488_v20  ;;  %v16545_v5 = vcombine.high %v14665_v13, %v14654_v19  ;;  %v2097_v15 = vcombine.high %v14709_v58, %v14706_v3 }
 0x1c6   : > { %v14832_v24 = vrot.slane %v2168_v9, %v14488_v20  ;;  %v2561_v43 = vcombine.high %v14696_v27, %v14762_v23  ;;  %v2143_v58 = vrot.slane %v2129_v42, %v14503_v33  ;;  %v14846_v9 = vpop.trf.xlu1 }
 0x1c7   : > { %v1975_v60 = vrot.slane %v16545_v5, %v14503_v33 }
 0x1c8   : > { %3112 = vxpose.xlu1.b32.start [1/2] (short) (narrow) %v2013_v7, 8  ;;  %3080 = vxpose.xlu0.b32.start [1/2] (short) (narrow) %v2012_v30, 8  ;;  %v2152_v30 = vcombine.low %v14540_v56, %v14579_v40  ;;  %v2192_v7 = vrot.slane %v2184_v10, %v14488_v20 }
 0x1c9   : > { %v14810_v6 = vpop.trf.xlu0  ;;  %v2015_v26 = vcombine.high %v1975_v60, %v14731_v17  ;;  %v2014_v3 = vcombine.low %v1975_v60, %v14731_v17 }
 0x1ca   : > { %v2160_v19 = vrot.slane %v2152_v30, %v14488_v20  ;;  %v2248_v13 = vcombine.low %v2192_v7, %v14823_v12  ;;  %v2305_v41 = vcombine.high %v14760_v2, %v14810_v6 }
 0x1cc   : > { %3113 = vxpose.xlu1.b32.end [2/2] (short) (narrow) %v2149_v22, 8  ;;  %3081 = vxpose.xlu0.b32.end [2/2] (short) (narrow) %v2148_v25, 8  ;;  %v2216_v10 = vcombine.low %v2160_v19, %v14832_v24  ;;  %v2111_v22 = vrot.slane %v2097_v15, %v14503_v33  ;;  %v14851_v25 = vrot.slane %v2561_v43, %v14488_v20 }
 0x1cd   : > { %v14837_v62 = vpop.trf.xlu0  ;;  %v2256_v60 = vrot.slane %v2248_v13, %v14503_v33  ;;  %v2304_v15 = vcombine.low %v14760_v2, %v14810_v6  ;;  %v2217_v35 = vcombine.high %v2160_v19, %v14832_v24  ;;  %v2199_v24 = vrot.slane %v2185_v53, %v14488_v20 }
 0x1ce   : > { %v2577_v4 = vcombine.high %v14769_v14, %v14837_v62  ;;  %v2151_v5 = vcombine.high %v2111_v22, %v2143_v58  ;;  %v2150_v42 = vcombine.low %v2111_v22, %v2143_v58  ;;  %v2224_v43 = vrot.slane %v2216_v10, %v14503_v33  ;;  %v583_v10 = vld [vmem:[%s16493_s1 + $0x8] sm:$0xff] }
 0x1cf   : > { %v2288_v58 = vcombine.low %v14672_v11, %v14738_v0  ;;  %v2312_v16 = vrot.slane %v2304_v15, %v14488_v20  ;;  %v2231_v48 = vrot.slane %v2217_v35, %v14503_v33  ;;  %v2319_v2 = vrot.slane %v2305_v41, %v14488_v20 }
 0x1d0   : > { %3176 = vxpose.xlu1.b32.start [1/2] (short) (narrow) %v2015_v26, 8  ;;  %3144 = vxpose.xlu0.b32.start [1/2] (short) (narrow) %v2014_v3, 8  ;;  %v14854_v30 = vrot.slane %v2577_v4, %v14488_v20  ;;  %v1528_v3 = vpop.trf.xlu1  ;;  %v2281_v13 = vcombine.high %v2224_v43, %v2256_v60  ;;  %v2280_v22 = vcombine.low %v2224_v43, %v2256_v60  ;;  %v16546_v60 = vmov 0 }
 0x1d1   : > { %v1464_v17 = vpop.trf.xlu0  ;;  %v2320_v46 = vcombine.low %v14812_v31, %v1528_v3  ;;  %v16547_v60 = vsel %vm14878_vm1, 4294967295, %v16546_v60  ;;  %v2296_v15 = vrot.slane %v2288_v58, %v14488_v20  ;;  %v2169_v58 = vcombine.high %v14550_v28, %v14617_v18 }
 0x1d2   : > { %16548 = vst [vmem:[#allocation18_spill] sm:$0xff] %v16547_v60 }
 0x1d3   : > { %v2183_v18 = vrot.slane %v2169_v58, %v14488_v20 }
 0x1d4   : > { %3177 = vxpose.xlu1.b32.end [2/2] (short) (narrow) %v2151_v5, 8  ;;  %3145 = vxpose.xlu0.b32.end [2/2] (short) (narrow) %v2150_v42, 8  ;;  %v582_v5 = vld [vmem:[%s16493_s1] sm:$0xff] }
 0x1d5   : > { %v14864_v4 = vpop.trf.xlu0  ;;  %v13626_v26 = vpack.c.bf16 %v583_v10, %v582_v5  ;;  %v2201_v5 = vcombine.high %v14670_v39, %v14713_v21  ;;  %v2249_v10 = vcombine.high %v2192_v7, %v14823_v12 }
 0x1d7   : > { %13628 = vmatprep.subr.msk.bf16.mxu0 %vm14878_vm1, %v13626_v26  ;;  %v2215_v39 = vrot.slane %v2201_v5, %v14488_v20  ;;  %v2263_v21 = vrot.slane %v2249_v10, %v14503_v33 }
 0x1d8   : > { %3240 = vxpose.xlu1.b32.start [1/2] (short) (narrow) %v2281_v13, 8  ;;  %3208 = vxpose.xlu0.b32.start [1/2] (short) (narrow) %v2280_v22, 8  ;;  %v2352_v13 = vcombine.low %v2296_v15, %v2312_v16  ;;  %v2328_v22 = vrot.slane %v2320_v46, %v14488_v20 }
 0x1d9   : > { %v1592_v42 = vpop.trf.xlu0  ;;  %13631 = vmatpush3.bf16.xpose.msk.msra.mxu0 %vm14878_vm1, %v13626_v26  ;;  %v2153_v26 = vcombine.high %v14540_v56, %v14579_v40  ;;  %v2321_v56 = vcombine.high %v14812_v31, %v1528_v3  ;;  %v2264_v19 = vcombine.low %v2199_v24, %v2215_v39  ;;  %v2282_v53 = vcombine.low %v2231_v48, %v2263_v21 }
 0x1da   : > { %v2336_v43 = vcombine.low %v1464_v17, %v1592_v42  ;;  %v2360_v46 = vrot.slane %v2352_v13, %v14503_v33  ;;  %v2337_v7 = vcombine.high %v1464_v17, %v1592_v42  ;;  %v2283_v42 = vcombine.high %v2231_v48, %v2263_v21 }
 0x1db   : > { %v2167_v40 = vrot.slane %v2153_v26, %v14488_v20  ;;  %v2265_v5 = vcombine.high %v2199_v24, %v2215_v39 }
 0x1dc   : > { %v2344_v45 = vrot.slane %v2336_v43, %v14488_v20  ;;  %v2351_v17 = vrot.slane %v2337_v7, %v14488_v20  ;;  %v1529_v7 = vpop.trf.xlu1 }
 0x1dd   : > { %v2232_v13 = vcombine.low %v2167_v40, %v2183_v18  ;;  %v1593_v26 = vpop.trf.xlu0 }
 0x1de   : > { %v2384_v59 = vcombine.low %v2328_v22, %v2344_v45  ;;  %v2385_v12 = vcombine.high %v2328_v22, %v2344_v45  ;;  %v2289_v45 = vcombine.high %v14672_v11, %v14738_v0  ;;  %v2272_v0 = vrot.slane %v2264_v19, %v14503_v33 }
 0x1df   : > { %v2240_v22 = vrot.slane %v2232_v13, %v14503_v33  ;;  %v2608_v48 = vcombine.low %v14864_v4, %v1593_v26 }
 0x1e0   : > { %v2392_v43 = vrot.slane %v2384_v59, %v14503_v33  ;;  %v2353_v59 = vcombine.high %v2296_v15, %v2312_v16  ;;  %v2399_v35 = vrot.slane %v2385_v12, %v14503_v33  ;;  %v2335_v16 = vrot.slane %v2321_v56, %v14488_v20 }
 0x1e1   : > { %v2303_v31 = vrot.slane %v2289_v45, %v14488_v20  ;;  %v2285_v10 = vcombine.high %v2240_v22, %v2272_v0  ;;  %v2284_v58 = vcombine.low %v2240_v22, %v2272_v0  ;;  %v2279_v12 = vrot.slane %v2265_v5, %v14503_v33  ;;  %v14945_v22 = vpop.trf.xlu0 }
 0x1e2   : > { %v2417_v60 = vcombine.high %v2360_v46, %v2392_v43  ;;  %v2416_v28 = vcombine.low %v2360_v46, %v2392_v43  ;;  %v2367_v6 = vrot.slane %v2353_v59, %v14503_v33  ;;  %v2400_v3 = vcombine.low %v2335_v16, %v2351_v17 }
 0x1e3   : > { %v2368_v15 = vcombine.low %v2303_v31, %v2319_v2  ;;  %v2233_v43 = vcombine.high %v2167_v40, %v2183_v18  ;;  %v2369_v24 = vcombine.high %v2303_v31, %v2319_v2  ;;  %v2576_v56 = vcombine.low %v14769_v14, %v14837_v62 }
 0x1e4   : > { %3241 = vxpose.xlu1.b32.end [2/2] (short) (narrow) %v2417_v60, 8  ;;  %3209 = vxpose.xlu0.b32.end [2/2] (short) (narrow) %v2416_v28, 8  ;;  %v2419_v60 = vcombine.high %v2367_v6, %v2399_v35  ;;  %v2418_v11 = vcombine.low %v2367_v6, %v2399_v35  ;;  %v2408_v46 = vrot.slane %v2400_v3, %v14503_v33 }
 0x1e5   : > { %v2376_v21 = vrot.slane %v2368_v15, %v14503_v33  ;;  %v2401_v28 = vcombine.high %v2335_v16, %v2351_v17  ;;  %v2247_v39 = vrot.slane %v2233_v43, %v14503_v33  ;;  %v2592_v18 = vcombine.low %v14846_v9, %v1529_v7 }
 0x1e6   : > { %v2560_v40 = vcombine.low %v14696_v27, %v14762_v23  ;;  %v2616_v19 = vrot.slane %v2608_v48, %v14488_v20  ;;  %v2383_v14 = vrot.slane %v2369_v24, %v14503_v33  ;;  %v16549_v6 = vcombine.high %v14767_v8, %v14772_v36  ;;  %v14963_v48 = vpop.trf.xlu1 }
 0x1e7   : > { %v2421_v41 = vcombine.high %v2376_v21, %v2408_v46  ;;  %v2420_v59 = vcombine.low %v2376_v21, %v2408_v46  ;;  %v2287_v45 = vcombine.high %v2247_v39, %v2279_v12  ;;  %v2286_v17 = vcombine.low %v2247_v39, %v2279_v12 }
 0x1e8   : > { %3304 = vxpose.xlu1.b32.start [1/2] (short) (narrow) %v2283_v42, 8  ;;  %3272 = vxpose.xlu0.b32.start [1/2] (short) (narrow) %v2282_v53, 8  ;;  %v2415_v42 = vrot.slane %v2401_v28, %v14503_v33  ;;  %v2584_v53 = vrot.slane %v2576_v56, %v14488_v20  ;;  %v2600_v35 = vrot.slane %v2592_v18, %v14488_v20 }
 0x1e9   : > { %v2568_v62 = vrot.slane %v2560_v40, %v14488_v20  ;;  %v16550_v31 = vcombine.low %v14767_v8, %v14772_v36  ;;  %v16551_v36 = vcombine.high %v14775_v61, %v14778_v63 }
 0x1ea   : > { %v2656_v13 = vcombine.low %v2600_v35, %v2616_v19  ;;  %v2423_v2 = vcombine.high %v2383_v14, %v2415_v42  ;;  %v2422_v16 = vcombine.low %v2383_v14, %v2415_v42  ;;  %v5405_v40 = vpop.trf.xlu1 }
 0x1eb   : > { %v2624_v27 = vcombine.low %v2568_v62, %v2584_v53  ;;  %v2625_v5 = vcombine.high %v2568_v62, %v2584_v53 }
 0x1ec   : > { %3305 = vxpose.xlu1.b32.end [2/2] (short) (narrow) %v2419_v60, 8  ;;  %3273 = vxpose.xlu0.b32.end [2/2] (short) (narrow) %v2418_v11, 8  ;;  %v2664_v23 = vrot.slane %v2656_v13, %v14503_v33  ;;  %v2609_v60 = vcombine.high %v14864_v4, %v1593_v26  ;;  %v2657_v11 = vcombine.high %v2600_v35, %v2616_v19  ;;  %v14958_v26 = vpop.trf.xlu0 }
 0x1ed   : > { %v2632_v3 = vrot.slane %v2624_v27, %v14503_v33  ;;  %v16552_v4 = vcombine.low %v14775_v61, %v14778_v63  ;;  %v2639_v43 = vrot.slane %v2625_v5, %v14503_v33  ;;  %v16554_v61 = vcombine.low %v14786_v1, %v14781_v29 }
 0x1ee   : > { %v2671_v46 = vrot.slane %v2657_v11, %v14503_v33  ;;  %v16555_v63 = vcombine.low %v14851_v25, %v14854_v30  ;;  %v5533_v14 = vpop.trf.xlu1 }
 0x1ef   : > { %v2689_v0 = vcombine.high %v2632_v3, %v2664_v23  ;;  %v2688_v15 = vcombine.low %v2632_v3, %v2664_v23  ;;  %v14023_v3 = vld [vmem:[%s14408_s16] sm:$0xff]  ;;  %v5678_v5 = vcombine.high %v5405_v40, %v5533_v14 }
 0x1f0   : > { %3368 = vxpose.xlu1.b32.start [1/2] (short) (narrow) %v2285_v10, 8  ;;  %3336 = vxpose.xlu0.b32.start [1/2] (short) (narrow) %v2284_v58, 8  ;;  %v2593_v10 = vcombine.high %v14846_v9, %v1529_v7  ;;  %v2623_v58 = vrot.slane %v2609_v60, %v14488_v20  ;;  %v2691_v21 = vcombine.high %v2639_v43, %v2671_v46  ;;  %v14961_v28 = vpop.trf.xlu0 }
 0x1f1   : > { %v2690_v7 = vcombine.low %v2639_v43, %v2671_v46 }
 0x1f2   : > { %v2607_v8 = vrot.slane %v2593_v10, %v14488_v20 }
 0x1f4   : > { %3369 = vxpose.xlu1.b32.end [2/2] (short) (narrow) %v2421_v41, 8  ;;  %3337 = vxpose.xlu0.b32.end [2/2] (short) (narrow) %v2420_v59, 8  ;;  %v2672_v9 = vcombine.low %v2607_v8, %v2623_v58  ;;  %v16553_v41 = vcombine.high %v14786_v1, %v14781_v29  ;;  %v2648_v59 = vrot.slane %v16555_v63, %v14503_v33  ;;  %v5469_v18 = vpop.trf.xlu0 }
 0x1f5   : > { %v2673_v39 = vcombine.high %v2607_v8, %v2623_v58  ;;  %v16557_v29 = vcombine.low %v14789_v37, %v14792_v32  ;;  %v16558_v1 = vcombine.high %v14851_v25, %v14854_v30  ;;  %v5661_v25 = vcombine.low %v14945_v22, %v14961_v28  ;;  %v14024_v58 = vld [vmem:[%s14408_s16 + $0x8] sm:$0xff] }
 0x1f6   : > { %v2680_v12 = vrot.slane %v2672_v9, %v14503_v33  ;;  %v5645_v30 = vcombine.low %v14963_v48, %v14958_v26 }
 0x1f7   : > { %v2687_v19 = vrot.slane %v2673_v39, %v14503_v33 }
 0x1f8   : > { %3432 = vxpose.xlu1.b32.start [1/2] (short) (narrow) %v2287_v45, 8  ;;  %3400 = vxpose.xlu0.b32.start [1/2] (short) (narrow) %v2286_v17, 8  ;;  %v2693_v24 = vcombine.high %v2648_v59, %v2680_v12  ;;  %v2692_v56 = vcombine.low %v2648_v59, %v2680_v12  ;;  %v16556_v45 = vcombine.high %v14789_v37, %v14792_v32  ;;  %v5597_v35 = vpop.trf.xlu0 }
 0x1f9   : > { %v2655_v17 = vrot.slane %v16558_v1, %v14503_v33  ;;  %v16559_v1 = vld [vmem:[#allocation10_spill] sm:$0xff] }
 0x1fb   : > { %v2695_v42 = vcombine.high %v2655_v17, %v2687_v19  ;;  %v2694_v53 = vcombine.low %v2655_v17, %v2687_v19 }
 0x1fc   : > { %3433 = vxpose.xlu1.b32.end [2/2] (short) (narrow) %v2423_v2, 8  ;;  %3401 = vxpose.xlu0.b32.end [2/2] (short) (narrow) %v2422_v16, 8  ;;  %v14022_v2 = vld [vmem:[%s14340_s30 + $0x8] sm:$0xff]  ;;  %v5677_v16 = vcombine.low %v5405_v40, %v5533_v14  ;;  %s13180_s30 = sshll.u32 %s16618_s17, 5 }
 0x200   : > { %3496 = vxpose.xlu1.b32.start [1/2] (short) (narrow) %v16549_v6, 8  ;;  %3464 = vxpose.xlu0.b32.start [1/2] (short) (narrow) %v16550_v31, 8  ;;  %v5653_v31 = vrot.slane %v5645_v30, %v14488_v20 }
 0x204   : > { %3497 = vxpose.xlu1.b32.end [2/2] (short) (narrow) %v2689_v0, 8  ;;  %3465 = vxpose.xlu0.b32.end [2/2] (short) (narrow) %v2688_v15, 8  ;;  %v5662_v0 = vcombine.high %v14945_v22, %v14961_v28  ;;  %v5646_v15 = vcombine.high %v14963_v48, %v14958_v26  ;;  %v5692_v26 = vrot.slane %v5678_v5, %v14488_v20 }
 0x206   : > { %v5676_v22 = vrot.slane %v5662_v0, %v14488_v20 }
 0x208   : > { %3560 = vxpose.xlu1.b32.start [1/2] (short) (narrow) %v16551_v36, 8  ;;  %3528 = vxpose.xlu0.b32.start [1/2] (short) (narrow) %v16552_v4, 8 }
 0x20c   : > { %3561 = vxpose.xlu1.b32.end [2/2] (short) (narrow) %v2691_v21, 8  ;;  %3529 = vxpose.xlu0.b32.end [2/2] (short) (narrow) %v2690_v7, 8  ;;  %v5660_v21 = vrot.slane %v5646_v15, %v14488_v20 }
 0x20e   : > { %v5725_v39 = vcombine.low %v5660_v21, %v5676_v22  ;;  %v5726_v19 = vcombine.high %v5660_v21, %v5676_v22 }
 0x210   : > { %3624 = vxpose.xlu1.b32.start [1/2] (short) (narrow) %v16553_v41, 8  ;;  %3592 = vxpose.xlu0.b32.start [1/2] (short) (narrow) %v16554_v61, 8 }
 0x214   : > { %3625 = vxpose.xlu1.b32.end [2/2] (short) (narrow) %v2693_v24, 8  ;;  %3593 = vxpose.xlu0.b32.end [2/2] (short) (narrow) %v2692_v56, 8 }
 0x218   : > { %3688 = vxpose.xlu1.b32.start [1/2] (short) (narrow) %v16556_v45, 8  ;;  %3656 = vxpose.xlu0.b32.start [1/2] (short) (narrow) %v16557_v29, 8  ;;  %v2744_v62 = vpop.trf.xlu0  ;;  %v2712_v13 = vpop.trf.xlu1  ;;  %v5733_v45 = vrot.slane %v5725_v39, %v14503_v33 }
 0x21c   : > { %3689 = vxpose.xlu1.b32.end [2/2] (short) (narrow) %v2695_v42, 8  ;;  %3657 = vxpose.xlu0.b32.end [2/2] (short) (narrow) %v2694_v53, 8  ;;  %v5740_v53 = vrot.slane %v5726_v19, %v14503_v33 }
 0x220   : > { %5293 = vxpose.xlu1.b32.start.end [1/1] (short) (narrow) %v14434_v50, 8  ;;  %5165 = vxpose.xlu0.b32.start.end [1/1] (short) (narrow) %v14022_v2, 8  ;;  %v2776_v37 = vpop.trf.xlu0  ;;  %v2808_v32 = vpop.trf.xlu1  ;;  %v5693_v50 = vcombine.low %v5469_v18, %v5597_v35 }
 0x221   : > { %v3720_v27 = vcombine.low %v2712_v13, %v2776_v37  ;;  %v3728_v23 = vcombine.low %v2744_v62, %v2808_v32 }
 0x222   : > { %v5701_v60 = vrot.slane %v5693_v50, %v14488_v20 }
 0x223   : > { %v15006_v11 = vrot.slane %v3728_v23, %v14488_v20 }
 0x224   : > { %5421 = vxpose.xlu1.b32.start.end [1/1] (short) (narrow) %v14427_v44, 8  ;;  %5229 = vxpose.xlu0.b32.start.end [1/1] (short) (narrow) %v14423_v34, 8  ;;  %v5669_v34 = vrot.slane %v5661_v25, %v14488_v20 }
 0x226   : > { %v5709_v10 = vcombine.low %v5653_v31, %v5669_v34  ;;  %v5710_v7 = vcombine.high %v5653_v31, %v5669_v34 }
 0x228   : > { %5549 = vxpose.xlu1.b32.start.end [1/1] (short) (narrow) %v14432_v49, 8  ;;  %5357 = vxpose.xlu0.b32.start.end [1/1] (short) (narrow) %v14425_v38, 8  ;;  %v2840_v44 = vpop.trf.xlu0  ;;  %v2872_v6 = vpop.trf.xlu1  ;;  %v5685_v49 = vrot.slane %v5677_v16, %v14488_v20  ;;  %v15003_v38 = vrot.slane %v3720_v27, %v14488_v20  ;;  %v5717_v12 = vrot.slane %v5709_v10, %v14503_v33 }
 0x229   : > { %v5724_v24 = vrot.slane %v5710_v7, %v14503_v33 }
 0x22a   : > { %v5741_v46 = vcombine.low %v5685_v49, %v5701_v60  ;;  %v3752_v9 = vcombine.low %v15003_v38, %v15006_v11  ;;  %v5742_v41 = vcombine.high %v5685_v49, %v5701_v60 }
 0x22c   : > { %8498 = vxpose.xlu1.b32.start [1/2] (short) (narrow) %v14023_v3, 8  ;;  %5485 = vxpose.xlu0.b32.start.end [1/1] (short) (narrow) %v14429_v47, 8  ;;  %v5694_v47 = vcombine.high %v5469_v18, %v5597_v35  ;;  %v5749_v61 = vrot.slane %v5741_v46, %v14503_v33  ;;  %v15031_v63 = vrot.slane %v3752_v9, %v14503_v33  ;;  %v16560_v35 = vld [vmem:[#allocation11_spill] sm:$0xff] }
 0x22d   : > { %v14026_v3 = vld [vmem:[%s14408_s16 + $0x18] sm:$0xff] }
 0x22e   : > { %v5708_v48 = vrot.slane %v5694_v47, %v14488_v20  ;;  %v5774_v14 = vcombine.high %v5717_v12, %v5749_v61  ;;  %v3753_v47 = vcombine.high %v15003_v38, %v15006_v11 }
 0x230   : > { %8499 = vxpose.xlu1.b32.end [2/2] (short) (narrow) %v14024_v58, 8  ;;  %5613 = vxpose.xlu0.b32.start.end [1/1] (short) (narrow) %v14438_v52, 8  ;;  %v2904_v8 = vpop.trf.xlu0  ;;  %v2936_v36 = vpop.trf.xlu1  ;;  %v5757_v18 = vcombine.low %v5692_v26, %v5708_v48  ;;  %v5758_v29 = vcombine.high %v5692_v26, %v5708_v48  ;;  %v16566_v48 = vld [vmem:[#allocation17_spill] sm:$0xff] }
 0x231   : > { %v3736_v4 = vcombine.low %v2840_v44, %v2904_v8  ;;  %v3744_v43 = vcombine.low %v2872_v6, %v2936_v36  ;;  %v14025_v44 = vld [vmem:[%s14408_s16 + $0x10] sm:$0xff]  ;;  %v16561_v8 = vld [vmem:[#allocation13_spill] sm:$0xff]  ;;  %v16562_v36 = vld [vmem:[#allocation12_spill] sm:$0xff]  ;;  %s501_s16 = scalar_lea.vmem %s16612_s13, %s13180_s30 }
 0x232   : > { %v5772_v13 = vrot.slane %v5758_v29, %v14503_v33 }
 0x233   : > { %v15021_v52 = vrot.slane %v3736_v4, %v14488_v20  ;;  %v15024_v28 = vrot.slane %v3744_v43, %v14488_v20  ;;  %v5131_v4 = vld [vmem:[%s16496_s4] sm:$0xff]  ;;  %v5132_v43 = vld [vmem:[%s16496_s4 + $0x8] sm:$0xff] }
 0x234   : > { %8626 = vxpose.xlu1.b32.start [1/2] (short) (narrow) %v14442_v54, 8  ;;  %8562 = vxpose.xlu0.b32.start [1/2] (short) (narrow) %v14436_v51, 8  ;;  %v5773_v51 = vcombine.low %v5717_v12, %v5749_v61  ;;  %v5756_v54 = vrot.slane %v5742_v41, %v14503_v33  ;;  %v5779_v37 = vcombine.low %v5740_v53, %v5772_v13 }
 0x235   : > { %v3768_v59 = vcombine.low %v15021_v52, %v15024_v28  ;;  %v5780_v31 = vcombine.high %v5740_v53, %v5772_v13  ;;  %v3769_v46 = vcombine.high %v15021_v52, %v15024_v28  ;;  %v13638_v38 = vpack.c.bf16 %v5132_v43, %v5131_v4  ;;  %v16565_v28 = vld [vmem:[#allocation16_spill] sm:$0xff] }
 0x236   : > { %v5775_v17 = vcombine.low %v5724_v24, %v5756_v54  ;;  %v5776_v2 = vcombine.high %v5724_v24, %v5756_v54  ;;  %v3767_v12 = vrot.slane %v3753_v47, %v14503_v33 }
 0x237   : > { %v15037_v56 = vrot.slane %v3768_v59, %v14503_v33  ;;  %13640 = vmatprep.subr.msk.bf16.mxu0 %vm15072_vm3, %v13638_v38  ;;  %v3783_v52 = vrot.slane %v3769_v46, %v14503_v33 }
 0x238   : > { %8627 = vxpose.xlu1.b32.end [2/2] (short) (narrow) %v14448_v57, 8  ;;  %8563 = vxpose.xlu0.b32.end [2/2] (short) (narrow) %v14444_v55, 8  ;;  %v5765_v57 = vrot.slane %v5757_v18, %v14503_v33  ;;  %v2968_v42 = vpop.trf.xlu0  ;;  %v3000_v55 = vpop.trf.xlu1  ;;  %v16567_v18 = vld [vmem:[#allocation15_spill] sm:$0xff] }
 0x239   : > { %v3784_v40 = vcombine.low %v15031_v63, %v15037_v56  ;;  %v3785_v41 = vcombine.high %v15031_v63, %v15037_v56  ;;  %v16568_v63 = vld [vmem:[#allocation14_spill] sm:$0xff]  ;;  %v3787_v56 = vcombine.high %v3767_v12, %v3783_v52 }
 0x23a   : > { %v5777_v62 = vcombine.low %v5733_v45, %v5765_v57  ;;  %v5778_v16 = vcombine.high %v5733_v45, %v5765_v57 }
 0x23b   : > { %13366 = vmatprep.mubr.msk.f32.mxu0 %vm3992_vm0, %v3784_v40 }
 0x23c   : > { %8690 = vxpose.xlu0.b32.start [1/2] (short) (narrow) %v16559_v1, 8  ;;  %5917 = vxpose.xlu1.b32.start.end [1/1] (short) (narrow) %v5773_v51, 8  ;;  %v3786_v51 = vcombine.low %v3767_v12, %v3783_v52 }
 0x240   : > { %8691 = vxpose.xlu0.b32.end [2/2] (short) (narrow) %v16560_v35, 8  ;;  %5981 = vxpose.xlu1.b32.start.end [1/1] (short) (narrow) %v5775_v17, 8  ;;  %v3032_v32 = vpop.trf.xlu0  ;;  %v3064_v25 = vpop.trf.xlu1 }
 0x241   : > { %v3788_v30 = vcombine.low %v2968_v42, %v3032_v32  ;;  %v3796_v50 = vcombine.low %v3000_v55, %v3064_v25 }
 0x243   : > { %v3795_v6 = vrot.slane %v3788_v30, %v14488_v20  ;;  %v3803_v34 = vrot.slane %v3796_v50, %v14488_v20 }
 0x244   : > { %5949 = vxpose.xlu0.b32.start.end [1/1] (short) (narrow) %v5774_v14, 8  ;;  %6045 = vxpose.xlu1.b32.start.end [1/1] (short) (narrow) %v5777_v62, 8 }
 0x245   : > { %v3820_v0 = vcombine.low %v3795_v6, %v3803_v34  ;;  %v3821_v21 = vcombine.high %v3795_v6, %v3803_v34 }
 0x247   : > { %v3828_v9 = vrot.slane %v3820_v0, %v14503_v33  ;;  %v3835_v59 = vrot.slane %v3821_v21, %v14503_v33 }
 0x248   : > { %6013 = vxpose.xlu0.b32.start.end [1/1] (short) (narrow) %v5776_v2, 8  ;;  %6109 = vxpose.xlu1.b32.start.end [1/1] (short) (narrow) %v5779_v37, 8  ;;  %v3096_v27 = vpop.trf.xlu0  ;;  %v3128_v23 = vpop.trf.xlu1 }
 0x24c   : > { %6077 = vxpose.xlu0.b32.start.end [1/1] (short) (narrow) %v5778_v16, 8  ;;  %8530 = vxpose.xlu1.b32.start [1/2] (short) (narrow) %v14025_v44, 8 }
 0x250   : > { %6141 = vxpose.xlu0.b32.start.end [1/1] (short) (narrow) %v5780_v31, 8  ;;  %8531 = vxpose.xlu1.b32.end [2/2] (short) (narrow) %v14026_v3, 8  ;;  %v3160_v60 = vpop.trf.xlu0  ;;  %v3192_v49 = vpop.trf.xlu1 }
 0x251   : > { %v3804_v15 = vcombine.low %v3096_v27, %v3160_v60  ;;  %v3812_v5 = vcombine.low %v3128_v23, %v3192_v49 }
 0x253   : > { %v3811_v10 = vrot.slane %v3804_v15, %v14488_v20  ;;  %v3819_v58 = vrot.slane %v3812_v5, %v14488_v20 }
 0x254   : > { %8594 = vxpose.xlu0.b32.start [1/2] (short) (narrow) %v16561_v8, 8  ;;  %8658 = vxpose.xlu1.b32.start [1/2] (short) (narrow) %v16562_v36, 8 }
 0x255   : > { %v3836_v22 = vcombine.low %v3811_v10, %v3819_v58  ;;  %v3837_v26 = vcombine.high %v3811_v10, %v3819_v58 }
 0x257   : > { %v3844_v7 = vrot.slane %v3836_v22, %v14503_v33  ;;  %v3851_v39 = vrot.slane %v3837_v26, %v14503_v33 }
 0x258   : > { %8595 = vxpose.xlu0.b32.end [2/2] (short) (narrow) %v16565_v28, 8  ;;  %8659 = vxpose.xlu1.b32.end [2/2] (short) (narrow) %v16566_v48, 8 }
 0x259   : > { %v3852_v61 = vcombine.low %v3828_v9, %v3844_v7  ;;  %v3853_v24 = vcombine.high %v3828_v9, %v3844_v7  ;;  %v3854_v54 = vcombine.low %v3835_v59, %v3851_v39  ;;  %v3855_v40 = vcombine.high %v3835_v59, %v3851_v39 }
 0x25b   : > { %13367 = vmatmul.mubr.msk.f32.vlgmr.msra.gmra.mrb[0].mxu0 %vm3992_vm0, %v3852_v61 }
 0x25c   : > { %8722 = vxpose.xlu0.b32.start [1/2] (short) (narrow) %v16567_v18, 8  ;;  %13369 = vmatprep.mubr.msk.f32.mxu0 %vm3992_vm0, %v3785_v41 }
 0x25d   : > { %13643 = vmatpush3.bf16.xpose.msk.msra.mxu0 %vm15072_vm3, %v13638_v38 }
 0x25f   : > { %13370 = vmatmul.mubr.msk.f32.gmra.mrb[2].mxu0 %vm3992_vm0, %v3853_v24 }
 0x260   : > { %8723 = vxpose.xlu0.b32.end [2/2] (short) (narrow) %v16568_v63, 8  ;;  %13372 = vmatprep.mubr.msk.f32.mxu0 %vm3992_vm0, %v3786_v51  ;;  %v3224_v19 = vpop.trf.xlu0  ;;  %v3256_v45 = vpop.trf.xlu1 }
 0x263   : > { %13373 = vmatmul.mubr.msk.f32.gmra.mrb[4].mxu0 %vm3992_vm0, %v3854_v54 }
 0x264   : > { %13375 = vmatprep.mubr.msk.f32.mxu0 %vm3992_vm0, %v3787_v56 }
 0x267   : > { %13376 = vmatmul.mubr.msk.f32.gmra.mrb[6].mxu0 %vm3992_vm0, %v3855_v40 }
 0x268   : > { %v3288_v29 = vpop.trf.xlu0  ;;  %v3320_v1 = vpop.trf.xlu1 }
 0x269   : > { %v3856_v17 = vcombine.low %v3224_v19, %v3288_v29  ;;  %v3864_v57 = vcombine.low %v3256_v45, %v3320_v1 }
 0x26b   : > { %v3863_v53 = vrot.slane %v3856_v17, %v14488_v20  ;;  %v3871_v35 = vrot.slane %v3864_v57, %v14488_v20 }
 0x26d   : > { %v3888_v13 = vcombine.low %v3863_v53, %v3871_v35  ;;  %v3889_v43 = vcombine.high %v3863_v53, %v3871_v35 }
 0x26f   : > { %v3896_v30 = vrot.slane %v3888_v13, %v14503_v33  ;;  %v3903_v12 = vrot.slane %v3889_v43, %v14503_v33 }
 0x270   : > { %v3352_v42 = vpop.trf.xlu0  ;;  %v3384_v55 = vpop.trf.xlu1 }
 0x278   : > { %v3416_v14 = vpop.trf.xlu0  ;;  %v3448_v62 = vpop.trf.xlu1 }
 0x279   : > { %v3872_v2 = vcombine.low %v3352_v42, %v3416_v14  ;;  %v3880_v37 = vcombine.low %v3384_v55, %v3448_v62 }
 0x27b   : > { %v3879_v32 = vrot.slane %v3872_v2, %v14488_v20  ;;  %v3887_v25 = vrot.slane %v3880_v37, %v14488_v20 }
 0x27d   : > { %v3904_v50 = vcombine.low %v3879_v32, %v3887_v25  ;;  %v3905_v9 = vcombine.high %v3879_v32, %v3887_v25 }
 0x27f   : > { %v3912_v16 = vrot.slane %v3904_v50, %v14503_v33  ;;  %v3919_v52 = vrot.slane %v3905_v9, %v14503_v33 }
 0x280   : > { %v3480_v23 = vpop.trf.xlu0  ;;  %v3512_v44 = vpop.trf.xlu1 }
 0x281   : > { %v3920_v27 = vcombine.low %v3896_v30, %v3912_v16  ;;  %v3921_v48 = vcombine.high %v3896_v30, %v3912_v16  ;;  %v3922_v24 = vcombine.low %v3903_v12, %v3919_v52  ;;  %v3923_v56 = vcombine.high %v3903_v12, %v3919_v52 }
 0x283   : > { %13378 = vmatprep.mubr.msk.f32.mxu0 %vm3992_vm0, %v3920_v27 }
 0x288   : > { %v3544_v6 = vpop.trf.xlu0  ;;  %v3576_v34 = vpop.trf.xlu1 }
 0x289   : > { %v3924_v60 = vcombine.low %v3480_v23, %v3544_v6  ;;  %v3932_v49 = vcombine.low %v3512_v44, %v3576_v34 }
 0x28b   : > { %v3931_v0 = vrot.slane %v3924_v60, %v14488_v20  ;;  %v3939_v15 = vrot.slane %v3932_v49, %v14488_v20 }
 0x28d   : > { %v3956_v46 = vcombine.low %v3931_v0, %v3939_v15  ;;  %v3957_v41 = vcombine.high %v3931_v0, %v3939_v15 }
 0x28f   : > { %v3964_v22 = vrot.slane %v3956_v46, %v14503_v33  ;;  %v3971_v51 = vrot.slane %v3957_v41, %v14503_v33 }
 0x290   : > { %v3608_v31 = vpop.trf.xlu0  ;;  %v3640_v3 = vpop.trf.xlu1 }
 0x298   : > { %v3672_v5 = vpop.trf.xlu0  ;;  %v3704_v10 = vpop.trf.xlu1 }
 0x299   : > { %v3940_v58 = vcombine.low %v3608_v31, %v3672_v5  ;;  %v3948_v47 = vcombine.low %v3640_v3, %v3704_v10 }
 0x29b   : > { %v3947_v8 = vrot.slane %v3940_v58, %v14488_v20  ;;  %v3955_v36 = vrot.slane %v3948_v47, %v14488_v20 }
 0x29d   : > { %v3972_v4 = vcombine.low %v3947_v8, %v3955_v36  ;;  %v3973_v26 = vcombine.high %v3947_v8, %v3955_v36 }
 0x29f   : > { %v3980_v38 = vrot.slane %v3972_v4, %v14503_v33  ;;  %v3987_v59 = vrot.slane %v3973_v26, %v14503_v33 }
 0x2a0   : > { %v5181_v21 = vpop.trf.xlu0  ;;  %v5309_v28 = vpop.trf.xlu1 }
 0x2a1   : > { %v3988_v7 = vcombine.low %v3964_v22, %v3980_v38  ;;  %v3989_v39 = vcombine.high %v3964_v22, %v3980_v38  ;;  %v3990_v63 = vcombine.low %v3971_v51, %v3987_v59  ;;  %v5781_v29 = vcombine.low %v5181_v21, %v5309_v28 }
 0x2a2   : > { %v3991_v1 = vcombine.high %v3971_v51, %v3987_v59  ;;  %v5782_v25 = vcombine.high %v5181_v21, %v5309_v28 }
 0x2a3   : > { %13379 = vmatmul.mubr.msk.f32.gmra.mrb[8].mxu0 %vm3992_vm0, %v3988_v7  ;;  %v5789_v53 = vrot.slane %v5781_v29, %v14488_v20 }
 0x2a4   : > { %v5245_v61 = vpop.trf.xlu0  ;;  %13381 = vmatprep.mubr.msk.f32.mxu0 %vm3992_vm0, %v3921_v48  ;;  %v5437_v18 = vpop.trf.xlu1  ;;  %v5796_v60 = vrot.slane %v5782_v25, %v14488_v20 }
 0x2a7   : > { %13382 = vmatmul.mubr.msk.f32.gmra.mrb[10].mxu0 %vm3992_vm0, %v3989_v39 }
 0x2a8   : > { %v5373_v54 = vpop.trf.xlu0  ;;  %13384 = vmatprep.mubr.msk.f32.mxu0 %vm3992_vm0, %v3922_v24  ;;  %v5565_v45 = vpop.trf.xlu1 }
 0x2a9   : > { %v5797_v40 = vcombine.low %v5245_v61, %v5373_v54  ;;  %v5813_v57 = vcombine.low %v5437_v18, %v5565_v45  ;;  %v5814_v62 = vcombine.high %v5437_v18, %v5565_v45  ;;  %v5798_v13 = vcombine.high %v5245_v61, %v5373_v54 }
 0x2ab   : > { %13385 = vmatmul.mubr.msk.f32.gmra.mrb[12].mxu0 %vm3992_vm0, %v3990_v63  ;;  %v5805_v17 = vrot.slane %v5797_v40, %v14488_v20  ;;  %v5821_v37 = vrot.slane %v5813_v57, %v14488_v20  ;;  %v5828_v27 = vrot.slane %v5814_v62, %v14488_v20  ;;  %v5812_v6 = vrot.slane %v5798_v13, %v14488_v20  ;;  %v8496_v63 = vld [vmem:[%s16499_s7] sm:$0xff] }
 0x2ac   : > { %v5501_v19 = vpop.trf.xlu0  ;;  %13387 = vmatprep.mubr.msk.f32.mxu0 %vm3992_vm0, %v3923_v56  ;;  %v8514_v55 = vpop.trf.xlu1  ;;  %v8497_v56 = vld [vmem:[%s16499_s7 + $0x8] sm:$0xff] }
 0x2ad   : > { %v5845_v2 = vcombine.low %v5789_v53, %v5805_v17  ;;  %v5846_v34 = vcombine.high %v5789_v53, %v5805_v17  ;;  %v5861_v58 = vcombine.low %v5796_v60, %v5812_v6  ;;  %v5862_v21 = vcombine.high %v5796_v60, %v5812_v6 }
 0x2ae   : > { %v13650_v40 = vpack.c.bf16 %v8497_v56, %v8496_v63  ;;  %v14144_v17 = vmov 0.0  }
 0x2af   : > { %13388 = vmatmul.mubr.msk.f32.gmra.mrb[14].mxu0 %vm3992_vm0, %v3991_v1  ;;  %v5853_v31 = vrot.slane %v5845_v2, %v14503_v33  ;;  %v5860_v47 = vrot.slane %v5846_v34, %v14503_v33  ;;  %v5869_v7 = vrot.slane %v5861_v58, %v14503_v33  ;;  %v5876_v61 = vrot.slane %v5862_v21, %v14503_v33 }
 0x2b0   : > { %v5629_v42 = vpop.trf.xlu0  ;;  %13652 = vmatprep.subr.msk.bf16.mxu0 %vm15149_vm5, %v13650_v40 }
 0x2b1   : > { %v5829_v35 = vcombine.low %v5501_v19, %v5629_v42  ;;  %v5830_v14 = vcombine.high %v5501_v19, %v5629_v42 }
 0x2b3   : > { %v5837_v32 = vrot.slane %v5829_v35, %v14488_v20  ;;  %v5844_v30 = vrot.slane %v5830_v14, %v14488_v20 }
 0x2b4   : > { %v8578_v23 = vpop.trf.xlu0  ;;  %v8642_v44 = vpop.trf.xlu1 }
 0x2b5   : > { %v5877_v50 = vcombine.low %v5821_v37, %v5837_v32  ;;  %v5878_v16 = vcombine.high %v5821_v37, %v5837_v32  ;;  %v5893_v49 = vcombine.low %v5828_v27, %v5844_v30  ;;  %v8754_v5 = vcombine.low %v8514_v55, %v8642_v44 }
 0x2b6   : > { %v5894_v46 = vcombine.high %v5828_v27, %v5844_v30 }
 0x2b7   : > { %v5885_v3 = vrot.slane %v5877_v50, %v14503_v33  ;;  %v5892_v10 = vrot.slane %v5878_v16, %v14503_v33  ;;  %v5901_v36 = vrot.slane %v5893_v49, %v14503_v33  ;;  %v8761_v9 = vrot.slane %v8754_v5, %v14488_v20 }
 0x2b8   : > { %v5908_v41 = vrot.slane %v5894_v46, %v14503_v33 }
 0x2b9   : > { %v5910_v0 = vcombine.high %v5853_v31, %v5885_v3  ;;  %v5909_v15 = vcombine.low %v5853_v31, %v5885_v3  ;;  %v5912_v22 = vcombine.high %v5860_v47, %v5892_v10  ;;  %v5911_v38 = vcombine.low %v5860_v47, %v5892_v10 }
 0x2ba   : > { %v5914_v28 = vcombine.high %v5869_v7, %v5901_v36  ;;  %v5913_v48 = vcombine.low %v5869_v7, %v5901_v36  ;;  %v5916_v24 = vcombine.high %v5876_v61, %v5908_v41  ;;  %v5915_v18 = vcombine.low %v5876_v61, %v5908_v41 }
 0x2bb   : > { %6205 = vxpose.xlu0.b32.start.end [1/1] (short) (narrow) %v5910_v0, 8  ;;  %6173 = vxpose.xlu1.b32.start.end [1/1] (short) (narrow) %v5909_v15, 8 }
 0x2bc   : > { %v8706_v8 = vpop.trf.xlu0  ;;  %v5933_v4 = vpop.trf.xlu1 }
 0x2bd   : > { %v8762_v43 = vcombine.low %v8578_v23, %v8706_v8 }
 0x2bf   : > { %v8769_v26 = vrot.slane %v8762_v43, %v14488_v20  ;;  %6269 = vxpose.xlu0.b32.start.end [1/1] (short) (narrow) %v5912_v22, 8  ;;  %6237 = vxpose.xlu1.b32.start.end [1/1] (short) (narrow) %v5911_v38, 8 }
 0x2c0   : > { %v5997_v12 = vpop.trf.xlu1 }
 0x2c1   : > { %v8770_v52 = vcombine.low %v8761_v9, %v8769_v26  ;;  %v8771_v54 = vcombine.high %v8761_v9, %v8769_v26  ;;  %v6429_v29 = vcombine.low %v5933_v4, %v5997_v12  ;;  %v6430_v53 = vcombine.high %v5933_v4, %v5997_v12 }
 0x2c3   : > { %6333 = vxpose.xlu0.b32.start.end [1/1] (short) (narrow) %v5914_v28, 8  ;;  %6301 = vxpose.xlu1.b32.start.end [1/1] (short) (narrow) %v5913_v48, 8  ;;  %v8778_v51 = vrot.slane %v8770_v52, %v14503_v33  ;;  %v8785_v55 = vrot.slane %v8771_v54, %v14503_v33  ;;  %v6437_v62 = vrot.slane %v6429_v29, %v14488_v20 }
 0x2c4   : > { %v5965_v59 = vpop.trf.xlu0  ;;  %v6061_v39 = vpop.trf.xlu1  ;;  %v6444_v25 = vrot.slane %v6430_v53, %v14488_v20 }
 0x2c5   : > { %v8786_v57 = vcombine.high %v8778_v51, %v14144_v17  ;;  %v8787_v32 = vcombine.high %v8785_v55, %v14144_v17 }
 0x2c7   : > { %6397 = vxpose.xlu0.b32.start.end [1/1] (short) (narrow) %v5916_v24, 8  ;;  %6365 = vxpose.xlu1.b32.start.end [1/1] (short) (narrow) %v5915_v18, 8 }
 0x2c8   : > { %v6029_v45 = vpop.trf.xlu0  ;;  %v6125_v42 = vpop.trf.xlu1 }
 0x2c9   : > { %v6445_v1 = vcombine.low %v5965_v59, %v6029_v45  ;;  %v6446_v35 = vcombine.high %v5965_v59, %v6029_v45  ;;  %v6461_v2 = vcombine.low %v6061_v39, %v6125_v42  ;;  %v6462_v37 = vcombine.high %v6061_v39, %v6125_v42 }
 0x2cb   : > { %8822 = vxpose.xlu1.b32.start.end [1/1] (short) (narrow) %v8778_v51, 16  ;;  %8854 = vxpose.xlu0.b32.start.end [1/1] (short) (narrow) %v8786_v57, 16  ;;  %v6453_v14 = vrot.slane %v6445_v1, %v14488_v20  ;;  %v6460_v50 = vrot.slane %v6446_v35, %v14488_v20  ;;  %v6469_v23 = vrot.slane %v6461_v2, %v14488_v20 }
 0x2cc   : > { %v6093_v13 = vpop.trf.xlu0  ;;  %v8546_v30 = vpop.trf.xlu1  ;;  %v6476_v31 = vrot.slane %v6462_v37, %v14488_v20 }
 0x2cd   : > { %v6493_v16 = vcombine.low %v6437_v62, %v6453_v14  ;;  %v6494_v44 = vcombine.high %v6437_v62, %v6453_v14  ;;  %v6509_v0 = vcombine.low %v6444_v25, %v6460_v50  ;;  %v6510_v4 = vcombine.high %v6444_v25, %v6460_v50  ;;  %v4192_v25 = vld [vmem:[#allocation3] sm:$0xff] }
 0x2cf   : > { %v6501_v49 = vrot.slane %v6493_v16, %v14503_v33  ;;  %v6508_v15 = vrot.slane %v6494_v44, %v14503_v33  ;;  %v6517_v43 = vrot.slane %v6509_v0, %v14503_v33  ;;  %v6524_v12 = vrot.slane %v6510_v4, %v14503_v33 }
 0x2d0   : > { %v6157_v27 = vpop.trf.xlu0  ;;  %8886 = vxpose.xlu1.b32.start.end [1/1] (short) (narrow) %v8785_v55, 16  ;;  %8918 = vxpose.xlu0.b32.start.end [1/1] (short) (narrow) %v8787_v32, 16 }
 0x2d1   : > { %v6477_v6 = vcombine.low %v6093_v13, %v6157_v27  ;;  %v6478_v34 = vcombine.high %v6093_v13, %v6157_v27 }
 0x2d3   : > { %v6485_v3 = vrot.slane %v6477_v6, %v14488_v20  ;;  %v6492_v60 = vrot.slane %v6478_v34, %v14488_v20 }
 0x2d4   : > { %v8674_v47 = vpop.trf.xlu1  ;;  %v8610_v46 = vpop.trf.xlu0 }
 0x2d5   : > { %v6525_v5 = vcombine.low %v6469_v23, %v6485_v3  ;;  %v6526_v10 = vcombine.high %v6469_v23, %v6485_v3  ;;  %v6541_v58 = vcombine.low %v6476_v31, %v6492_v60  ;;  %v6542_v9 = vcombine.high %v6476_v31, %v6492_v60 }
 0x2d6   : > { %v8788_v22 = vcombine.low %v8546_v30, %v8674_v47  ;;  %v4193_v30 = vld [vmem:[#allocation3 + $0x8] sm:$0xff] }
 0x2d7   : > { %v6533_v8 = vrot.slane %v6525_v5, %v14503_v33  ;;  %v6540_v36 = vrot.slane %v6526_v10, %v14503_v33  ;;  %v6549_v38 = vrot.slane %v6541_v58, %v14503_v33  ;;  %v6556_v52 = vrot.slane %v6542_v9, %v14503_v33 }
 0x2d8   : > { %v8795_v61 = vrot.slane %v8788_v22, %v14488_v20  ;;  %v13632_v27 = vpack.c.bf16 %v4193_v30, %v4192_v25 }
 0x2d9   : > { %v6558_v21 = vcombine.high %v6501_v49, %v6533_v8  ;;  %v6557_v26 = vcombine.low %v6501_v49, %v6533_v8  ;;  %v6559_v7 = vcombine.low %v6508_v15, %v6540_v36  ;;  %v6560_v48 = vcombine.high %v6508_v15, %v6540_v36 }
 0x2da   : > { %v6561_v59 = vcombine.low %v6517_v43, %v6549_v38  ;;  %v6562_v24 = vcombine.high %v6517_v43, %v6549_v38  ;;  %v6563_v54 = vcombine.low %v6524_v12, %v6556_v52  ;;  %v6564_v56 = vcombine.high %v6524_v12, %v6556_v52  ;;  %13634 = vmatprep.subr.msk.bf16.mxu1 %vm14878_vm1, %v13632_v27 }
 0x2db   : > { %13422 = vmatprep.mubr.msk.f32.mxu0 %vm6701_vm2, %v6557_v26  ;;  %13637 = vmatpush3.bf16.xpose.msk.msra.mxu1 %vm14878_vm1, %v13632_v27  ;;  %vm12716_vm1 = vcmask 244736  }
 0x2dc   : > { %v8738_v28 = vpop.trf.xlu0  ;;  %13423 = vmatmul.mubr.msk.f32.vlgmr.msra.gmra.mrb[16].mxu0 %vm6701_vm2, %v6558_v21 }
 0x2dd   : > { %v8796_v41 = vcombine.low %v8610_v46, %v8738_v28  ;;  %13425 = vmatprep.mubr.msk.f32.mxu0 %vm6701_vm2, %v6559_v7  ;;  %13655 = vmatpush3.bf16.xpose.msk.msra.mxu0 %vm15149_vm5, %v13650_v40 }
 0x2df   : > { %v8803_v39 = vrot.slane %v8796_v41, %v14488_v20 }
 0x2e0   : > { %13426 = vmatmul.mubr.msk.f32.gmra.mrb[18].mxu0 %vm6701_vm2, %v6560_v48 }
 0x2e1   : > { %v8804_v18 = vcombine.low %v8795_v61, %v8803_v39  ;;  %v8805_v51 = vcombine.high %v8795_v61, %v8803_v39  ;;  %13428 = vmatprep.mubr.msk.f32.mxu0 %vm6701_vm2, %v6561_v59 }
 0x2e3   : > { %v8812_v63 = vrot.slane %v8804_v18, %v14503_v33  ;;  %v8819_v45 = vrot.slane %v8805_v51, %v14503_v33 }
 0x2e4   : > { %13429 = vmatmul.mubr.msk.f32.gmra.mrb[20].mxu0 %vm6701_vm2, %v6562_v24 }
 0x2e5   : > { %13431 = vmatprep.mubr.msk.f32.mxu0 %vm6701_vm2, %v6563_v54  ;;  %8950 = vxpose.xlu1.b32.start.end [1/1] (short) (narrow) %v8812_v63, 16  ;;  %v8820_v40 = vcombine.high %v8812_v63, %v14144_v17  ;;  %v8821_v29 = vcombine.high %v8819_v45, %v14144_v17 }
 0x2e7   : > { %8982 = vxpose.xlu0.b32.start.end [1/1] (short) (narrow) %v8820_v40, 16 }
 0x2e8   : > { %13432 = vmatmul.mubr.msk.f32.gmra.mrb[22].mxu0 %vm6701_vm2, %v6564_v56 }
 0x2ea   : > { %9014 = vxpose.xlu1.b32.start.end [1/1] (short) (narrow) %v8819_v45, 16 }
 0x2ec   : > { %9046 = vxpose.xlu0.b32.start.end [1/1] (short) (narrow) %v8821_v29, 16 }
 0x32e   : > { %v13368_v1 = vpop.f32.mrb[0].mxu0 }
 0x32f   : > { %v4113_v57 = vpop.f32.mrb[1].mxu0 }
 0x330   : > { %4194 = vxpose.xlu1.b32.start [1/2] (short) (narrow) %v4113_v57, 16 }
 0x332   : > { %v13371_v42 = vpop.f32.mrb[2].mxu0 }
 0x333   : > { %v4123_v55 = vpop.f32.mrb[3].mxu0 }
 0x334   : > { %4226 = vxpose.xlu0.b32.start [1/2] (short) (narrow) %v4123_v55, 16  ;;  %4195 = vxpose.xlu1.b32.end [2/2] (short) (narrow) %v13368_v1, 16 }
 0x336   : > { %v13374_v53 = vpop.f32.mrb[4].mxu0 }
 0x337   : > { %v4133_v35 = vpop.f32.mrb[5].mxu0 }
 0x338   : > { %4227 = vxpose.xlu0.b32.end [2/2] (short) (narrow) %v13371_v42, 16  ;;  %4258 = vxpose.xlu1.b32.start [1/2] (short) (narrow) %v4133_v35, 16 }
 0x33a   : > { %v13377_v14 = vpop.f32.mrb[6].mxu0 }
 0x33b   : > { %v6221_v62 = vpop.trf.xlu0  ;;  %v6189_v13 = vpop.trf.xlu1 }
 0x33c   : > { %v4143_v2 = vpop.f32.mrb[7].mxu0  ;;  %4259 = vxpose.xlu1.b32.end [2/2] (short) (narrow) %v13374_v53, 16 }
 0x33d   : > { %4290 = vxpose.xlu0.b32.start [1/2] (short) (narrow) %v4143_v2, 16 }
 0x33f   : > { %v6285_v37 = vpop.trf.xlu0  ;;  %v6253_v32 = vpop.trf.xlu1 }
 0x340   : > { %v6581_v50 = vcombine.low %v6221_v62, %v6285_v37  ;;  %v6565_v16 = vcombine.low %v6189_v13, %v6253_v32  ;;  %v6582_v3 = vcombine.high %v6221_v62, %v6285_v37  ;;  %v6566_v60 = vcombine.high %v6189_v13, %v6253_v32 }
 0x341   : > { %4291 = vxpose.xlu0.b32.end [2/2] (short) (narrow) %v13377_v14, 16 }
 0x342   : > { %v6589_v34 = vrot.slane %v6581_v50, %v14488_v20  ;;  %v6573_v31 = vrot.slane %v6565_v16, %v14488_v20  ;;  %v6596_v43 = vrot.slane %v6582_v3, %v14488_v20  ;;  %v6580_v9 = vrot.slane %v6566_v60, %v14488_v20 }
 0x343   : > { %v6349_v23 = vpop.trf.xlu0  ;;  %v6317_v44 = vpop.trf.xlu1 }
 0x344   : > { %v6629_v47 = vcombine.low %v6573_v31, %v6589_v34  ;;  %v6630_v21 = vcombine.high %v6573_v31, %v6589_v34  ;;  %v6645_v41 = vcombine.low %v6580_v9, %v6596_v43  ;;  %v6646_v56 = vcombine.high %v6580_v9, %v6596_v43 }
 0x346   : > { %v6637_v52 = vrot.slane %v6629_v47, %v14503_v33  ;;  %v6644_v39 = vrot.slane %v6630_v21, %v14503_v33  ;;  %v6653_v45 = vrot.slane %v6645_v41, %v14503_v33  ;;  %v6660_v32 = vrot.slane %v6646_v56, %v14503_v33 }
 0x347   : > { %v6413_v49 = vpop.trf.xlu0  ;;  %v6381_v0 = vpop.trf.xlu1 }
 0x348   : > { %v6613_v15 = vcombine.low %v6349_v23, %v6413_v49  ;;  %v6614_v5 = vcombine.high %v6349_v23, %v6413_v49  ;;  %v6597_v10 = vcombine.low %v6317_v44, %v6381_v0  ;;  %v6598_v58 = vcombine.high %v6317_v44, %v6381_v0 }
 0x34a   : > { %v6621_v46 = vrot.slane %v6613_v15, %v14488_v20  ;;  %v6628_v8 = vrot.slane %v6614_v5, %v14488_v20  ;;  %v6605_v36 = vrot.slane %v6597_v10, %v14488_v20  ;;  %v6612_v4 = vrot.slane %v6598_v58, %v14488_v20 }
 0x34b   : > { %v8870_v22 = vpop.trf.xlu0  ;;  %v8838_v38 = vpop.trf.xlu1 }
 0x34c   : > { %v6661_v26 = vcombine.low %v6605_v36, %v6621_v46  ;;  %v6662_v7 = vcombine.high %v6605_v36, %v6621_v46  ;;  %v6677_v12 = vcombine.low %v6612_v4, %v6628_v8  ;;  %v6678_v51 = vcombine.high %v6612_v4, %v6628_v8 }
 0x34e   : > { %v6669_v28 = vrot.slane %v6661_v26, %v14503_v33  ;;  %v6676_v48 = vrot.slane %v6662_v7, %v14503_v33  ;;  %v6685_v54 = vrot.slane %v6677_v12, %v14503_v33  ;;  %v6692_v53 = vrot.slane %v6678_v51, %v14503_v33 }
 0x34f   : > { %v8871_v61 = vpop.trf.xlu0  ;;  %v8839_v59 = vpop.trf.xlu1 }
 0x350   : > { %v6693_v24 = vcombine.low %v6637_v52, %v6669_v28  ;;  %v6694_v18 = vcombine.high %v6637_v52, %v6669_v28  ;;  %v6695_v63 = vcombine.low %v6644_v39, %v6676_v48  ;;  %v6696_v35 = vcombine.high %v6644_v39, %v6676_v48 }
 0x351   : > { %v6697_v14 = vcombine.low %v6653_v45, %v6685_v54  ;;  %v6698_v50 = vcombine.high %v6653_v45, %v6685_v54  ;;  %v6699_v49 = vcombine.low %v6660_v32, %v6692_v53  ;;  %v6700_v46 = vcombine.high %v6660_v32, %v6692_v53 }
 0x352   : > { %13434 = vmatprep.mubr.msk.f32.mxu0 %vm6701_vm2, %v6693_v24 }
 0x353   : > { %v8934_v40 = vpop.trf.xlu0  ;;  %13435 = vmatmul.mubr.msk.f32.gmra.mrb[24].mxu0 %vm6701_vm2, %v6694_v18  ;;  %v8902_v29 = vpop.trf.xlu1 }
 0x354   : > { %v9094_v1 = vcombine.low %v8870_v22, %v8934_v40  ;;  %v9095_v57 = vcombine.high %v8870_v22, %v8934_v40  ;;  %v9078_v42 = vcombine.low %v8838_v38, %v8902_v29  ;;  %v9079_v55 = vcombine.high %v8838_v38, %v8902_v29  ;;  %13437 = vmatprep.mubr.msk.f32.mxu0 %vm6701_vm2, %v6695_v63 }
 0x356   : > { %v9102_v62 = vrot.slane %v9094_v1, %v14488_v20  ;;  %v9109_v13 = vrot.slane %v9095_v57, %v14488_v20  ;;  %v9086_v2 = vrot.slane %v9078_v42, %v14488_v20  ;;  %v9093_v37 = vrot.slane %v9079_v55, %v14488_v20 }
 0x357   : > { %v8935_v25 = vpop.trf.xlu0  ;;  %13438 = vmatmul.mubr.msk.f32.gmra.mrb[26].mxu0 %vm6701_vm2, %v6696_v35  ;;  %v8903_v30 = vpop.trf.xlu1 }
 0x358   : > { %v9110_v16 = vcombine.low %v9086_v2, %v9102_v62  ;;  %v9111_v27 = vcombine.high %v9086_v2, %v9102_v62  ;;  %v9126_v23 = vcombine.low %v9093_v37, %v9109_v13  ;;  %v9127_v44 = vcombine.high %v9093_v37, %v9109_v13  ;;  %13440 = vmatprep.mubr.msk.f32.mxu0 %vm6701_vm2, %v6697_v14 }
 0x359   : > { %v9162_v6 = vcombine.low %v8871_v61, %v8935_v25  ;;  %v9163_v34 = vcombine.high %v8871_v61, %v8935_v25  ;;  %v9146_v31 = vcombine.low %v8839_v59, %v8903_v30  ;;  %v9147_v3 = vcombine.high %v8839_v59, %v8903_v30 }
 0x35a   : > { %v9125_v60 = vrot.slane %v9111_v27, %v14503_v33  ;;  %v9118_v0 = vrot.slane %v9110_v16, %v14503_v33  ;;  %v9134_v15 = vrot.slane %v9126_v23, %v14503_v33  ;;  %v9141_v9 = vrot.slane %v9127_v44, %v14503_v33 }
 0x35b   : > { %v9170_v5 = vrot.slane %v9162_v6, %v14488_v20  ;;  %v9177_v10 = vrot.slane %v9163_v34, %v14488_v20  ;;  %v9154_v58 = vrot.slane %v9146_v31, %v14488_v20  ;;  %v9161_v47 = vrot.slane %v9147_v3, %v14488_v20  ;;  %13441 = vmatmul.mubr.msk.f32.gmra.mrb[28].mxu0 %vm6701_vm2, %v6698_v50 }
 0x35c   : > { %13443 = vmatprep.mubr.msk.f32.mxu0 %vm6701_vm2, %v6699_v49  ;;  %v9142_v8 = vcombine.high %v9118_v0, %v14144_v17  ;;  %v9143_v36 = vcombine.high %v9125_v60, %v14144_v17  ;;  %v9144_v21 = vcombine.high %v9134_v15, %v14144_v17  ;;  %v9145_v28 = vcombine.high %v9141_v9, %v14144_v17 }
 0x35d   : > { %v9178_v4 = vcombine.low %v9154_v58, %v9170_v5  ;;  %v9179_v43 = vcombine.high %v9154_v58, %v9170_v5  ;;  %v9194_v22 = vcombine.low %v9161_v47, %v9177_v10  ;;  %v9195_v52 = vcombine.high %v9161_v47, %v9177_v10 }
 0x35e   : > { %v9382_v38 = vcombine.low %v9118_v0, %v9142_v8  ;;  %v9383_v7 = vcombine.low %v9125_v60, %v9143_v36  ;;  %v9384_v41 = vcombine.low %v9134_v15, %v9144_v21  ;;  %v9385_v39 = vcombine.low %v9141_v9, %v9145_v28 }
 0x35f   : > { %v9186_v26 = vrot.slane %v9178_v4, %v14503_v33  ;;  %13444 = vmatmul.mubr.msk.f32.gmra.mrb[30].mxu0 %vm6701_vm2, %v6700_v46  ;;  %v9193_v12 = vrot.slane %v9179_v43, %v14503_v33  ;;  %v9202_v48 = vrot.slane %v9194_v22, %v14503_v33  ;;  %v9209_v59 = vrot.slane %v9195_v52, %v14503_v33 }
 0x360   : > { %13502 = vmatprep.mubr.msk.f32.mxu0 %vm9398_vm4, %v9382_v38 }
 0x361   : > { %v9210_v61 = vcombine.high %v9186_v26, %v14144_v17  ;;  %v9211_v18 = vcombine.high %v9193_v12, %v14144_v17  ;;  %v9212_v54 = vcombine.high %v9202_v48, %v14144_v17  ;;  %v9213_v40 = vcombine.high %v9209_v59, %v14144_v17 }
 0x363   : > { %13503 = vmatmul.mubr.msk.f32.vlgmr.msra.gmra.mrb[32].mxu0 %vm9398_vm4, %v9383_v7  ;;  %v9386_v51 = vcombine.low %v9186_v26, %v9210_v61  ;;  %v9387_v56 = vcombine.low %v9193_v12, %v9211_v18  ;;  %v9388_v29 = vcombine.low %v9202_v48, %v9212_v54  ;;  %v9389_v57 = vcombine.low %v9209_v59, %v9213_v40 }
 0x364   : > { %13505 = vmatprep.mubr.msk.f32.mxu0 %vm9398_vm4, %v9384_v41 }
 0x365   : > { %v8966_v24 = vpop.trf.xlu1 }
 0x367   : > { %v8998_v63 = vpop.trf.xlu0  ;;  %13506 = vmatmul.mubr.msk.f32.gmra.mrb[34].mxu0 %vm9398_vm4, %v9385_v39 }
 0x368   : > { %13508 = vmatprep.mubr.msk.f32.mxu0 %vm9398_vm4, %v9386_v51 }
 0x369   : > { %v8967_v45 = vpop.trf.xlu1 }
 0x36b   : > { %v8999_v1 = vpop.trf.xlu0  ;;  %13509 = vmatmul.mubr.msk.f32.gmra.mrb[36].mxu0 %vm9398_vm4, %v9387_v56 }
 0x36c   : > { %13511 = vmatprep.mubr.msk.f32.mxu0 %vm9398_vm4, %v9388_v29 }
 0x36d   : > { %v9030_v42 = vpop.trf.xlu1 }
 0x36e   : > { %v9214_v55 = vcombine.low %v8966_v24, %v9030_v42  ;;  %v9215_v53 = vcombine.high %v8966_v24, %v9030_v42 }
 0x36f   : > { %v9062_v35 = vpop.trf.xlu0  ;;  %13512 = vmatmul.mubr.msk.f32.gmra.mrb[38].mxu0 %vm9398_vm4, %v9389_v57 }
 0x370   : > { %v9230_v14 = vcombine.low %v8998_v63, %v9062_v35  ;;  %v9231_v62 = vcombine.high %v8998_v63, %v9062_v35  ;;  %v9222_v13 = vrot.slane %v9214_v55, %v14488_v20  ;;  %v9229_v2 = vrot.slane %v9215_v53, %v14488_v20  ;;  %v6901_v55 = vld [vmem:[%s16497_s5] sm:$0xff]  ;;  %v6902_v53 = vld [vmem:[%s16497_s5 + $0x8] sm:$0xff] }
 0x371   : > { %v9031_v37 = vpop.trf.xlu1 }
 0x372   : > { %v9238_v32 = vrot.slane %v9230_v14, %v14488_v20  ;;  %v9245_v25 = vrot.slane %v9231_v62, %v14488_v20  ;;  %v9282_v30 = vcombine.low %v8967_v45, %v9031_v37  ;;  %v9283_v50 = vcombine.high %v8967_v45, %v9031_v37 }
 0x373   : > { %v9063_v16 = vpop.trf.xlu0  ;;  %v13644_v14 = vpack.c.bf16 %v6902_v53, %v6901_v55 }
 0x374   : > { %v9246_v27 = vcombine.low %v9222_v13, %v9238_v32  ;;  %v9247_v23 = vcombine.high %v9222_v13, %v9238_v32  ;;  %v9262_v44 = vcombine.low %v9229_v2, %v9245_v25  ;;  %v9263_v6 = vcombine.high %v9229_v2, %v9245_v25 }
 0x375   : > { %v9298_v34 = vcombine.low %v8999_v1, %v9063_v16  ;;  %v9299_v31 = vcombine.high %v8999_v1, %v9063_v16  ;;  %v9290_v3 = vrot.slane %v9282_v30, %v14488_v20  ;;  %v9297_v60 = vrot.slane %v9283_v50, %v14488_v20  ;;  %13646 = vmatprep.subr.msk.bf16.mxu1 %vm15072_vm3, %v13644_v14 }
 0x376   : > { %v13380_v49 = vpop.f32.mrb[8].mxu0  ;;  %v9254_v0 = vrot.slane %v9246_v27, %v14503_v33  ;;  %v9261_v15 = vrot.slane %v9247_v23, %v14503_v33  ;;  %v9270_v5 = vrot.slane %v9262_v44, %v14503_v33  ;;  %v9277_v10 = vrot.slane %v9263_v6, %v14503_v33 }
 0x377   : > { %v4153_v58 = vpop.f32.mrb[9].mxu0  ;;  %v9306_v47 = vrot.slane %v9298_v34, %v14488_v20  ;;  %v9313_v46 = vrot.slane %v9299_v31, %v14488_v20 }
 0x378   : > { %4322 = vxpose.xlu1.b32.start [1/2] (short) (narrow) %v4153_v58, 16  ;;  %v9278_v8 = vcombine.high %v9254_v0, %v14144_v17  ;;  %v9279_v36 = vcombine.high %v9261_v15, %v14144_v17  ;;  %v9280_v4 = vcombine.high %v9270_v5, %v14144_v17  ;;  %v9281_v12 = vcombine.high %v9277_v10, %v14144_v17 }
 0x379   : > { %v9314_v43 = vcombine.low %v9290_v3, %v9306_v47  ;;  %v9315_v9 = vcombine.high %v9290_v3, %v9306_v47  ;;  %v9330_v22 = vcombine.low %v9297_v60, %v9313_v46  ;;  %v9331_v38 = vcombine.high %v9297_v60, %v9313_v46 }
 0x37a   : > { %v13383_v21 = vpop.f32.mrb[10].mxu0  ;;  %v9390_v26 = vcombine.low %v9254_v0, %v9278_v8  ;;  %v9391_v7 = vcombine.low %v9261_v15, %v9279_v36  ;;  %v9392_v61 = vcombine.low %v9270_v5, %v9280_v4  ;;  %v9393_v18 = vcombine.low %v9277_v10, %v9281_v12  ;;  %v9631_v12 = vld [vmem:[%s16500_s8 + $0x8] sm:$0xff] }
 0x37b   : > { %v9322_v52 = vrot.slane %v9314_v43, %v14503_v33  ;;  %v9329_v28 = vrot.slane %v9315_v9, %v14503_v33  ;;  %v9338_v48 = vrot.slane %v9330_v22, %v14503_v33  ;;  %v4163_v41 = vpop.f32.mrb[11].mxu0  ;;  %v9345_v39 = vrot.slane %v9331_v38, %v14503_v33 }
 0x37c   : > { %4323 = vxpose.xlu1.b32.end [2/2] (short) (narrow) %v13380_v49, 16  ;;  %4354 = vxpose.xlu0.b32.start [1/2] (short) (narrow) %v4163_v41, 16 }
 0x37d   : > { %13514 = vmatprep.mubr.msk.f32.mxu0 %vm9398_vm4, %v9390_v26  ;;  %v9346_v59 = vcombine.high %v9322_v52, %v14144_v17  ;;  %v9347_v51 = vcombine.high %v9329_v28, %v14144_v17  ;;  %v9348_v56 = vcombine.high %v9338_v48, %v14144_v17  ;;  %v9349_v29 = vcombine.high %v9345_v39, %v14144_v17 }
 0x37e   : > { %13515 = vmatmul.mubr.msk.f32.gmra.mrb[40].mxu0 %vm9398_vm4, %v9391_v7  ;;  %v13386_v24 = vpop.f32.mrb[12].mxu0  ;;  %v9630_v7 = vld [vmem:[%s16500_s8] sm:$0xff] }
 0x37f   : > { %v4173_v54 = vpop.f32.mrb[13].mxu0  ;;  %13517 = vmatprep.mubr.msk.f32.mxu0 %vm9398_vm4, %v9392_v61  ;;  %v9394_v63 = vcombine.low %v9322_v52, %v9346_v59  ;;  %v9395_v40 = vcombine.low %v9329_v28, %v9347_v51  ;;  %v9396_v57 = vcombine.low %v9338_v48, %v9348_v56  ;;  %v9397_v42 = vcombine.low %v9345_v39, %v9349_v29 }
 0x380   : > { %4386 = vxpose.xlu1.b32.start [1/2] (short) (narrow) %v4173_v54, 16  ;;  %4355 = vxpose.xlu0.b32.end [2/2] (short) (narrow) %v13383_v21, 16  ;;  %v13656_v28 = vpack.c.bf16 %v9631_v12, %v9630_v7 }
 0x382   : > { %13518 = vmatmul.mubr.msk.f32.gmra.mrb[42].mxu0 %vm9398_vm4, %v9393_v18  ;;  %v13389_v45 = vpop.f32.mrb[14].mxu0  ;;  %13658 = vmatprep.subr.msk.bf16.mxu0 %vm15149_vm5, %v13656_v28 }
 0x383   : > { %v4183_v1 = vpop.f32.mrb[15].mxu0  ;;  %13520 = vmatprep.mubr.msk.f32.mxu0 %vm9398_vm4, %v9394_v63  ;;  %13661 = vmatpush3.bf16.xpose.msk.msra.mxu0 %vm15149_vm5, %v13656_v28 }
 0x384   : > { %4387 = vxpose.xlu1.b32.end [2/2] (short) (narrow) %v13386_v24, 16  ;;  %4418 = vxpose.xlu0.b32.start [1/2] (short) (narrow) %v4183_v1, 16 }
 0x386   : > { %13521 = vmatmul.mubr.msk.f32.gmra.mrb[44].mxu0 %vm9398_vm4, %v9395_v40 }
 0x387   : > { %13523 = vmatprep.mubr.msk.f32.mxu0 %vm9398_vm4, %v9396_v57 }
 0x388   : > { %4419 = vxpose.xlu0.b32.end [2/2] (short) (narrow) %v13389_v45, 16 }
 0x38a   : > { %13524 = vmatmul.mubr.msk.f32.gmra.mrb[46].mxu0 %vm9398_vm4, %v9397_v42 }
 0x3af   : > { %v13424_v35 = vpop.f32.mrb[16].mxu0 }
 0x3b0   : > { %v6822_v62 = vpop.f32.mrb[17].mxu0  ;;  %6935 = vxpose.xlu0.b32.start.end [1/1] (short) (narrow) %v13424_v35, 16  ;;  %v4210_v13 = vpop.trf.xlu1 }
 0x3b1   : > { %6903 = vxpose.xlu1.b32.start.end [1/1] (short) (narrow) %v6822_v62, 16  ;;  %13394 = vmatprep.mubr.msk.f32.mxu1 %vm3992_vm0, %v4210_v13 }
 0x3b3   : > { %v13427_v2 = vpop.f32.mrb[18].mxu0 }
 0x3b4   : > { %v6832_v37 = vpop.f32.mrb[19].mxu0  ;;  %v4242_v32 = vpop.trf.xlu0 }
 0x3b5   : > { %6999 = vxpose.xlu0.b32.start.end [1/1] (short) (narrow) %v13427_v2, 16  ;;  %v4211_v25 = vpop.trf.xlu1 }
 0x3b6   : > { %6967 = vxpose.xlu1.b32.start.end [1/1] (short) (narrow) %v6832_v37, 16  ;;  %13395 = vmatmul.mubr.msk.f32.vlgmr.msra.gmra.mrb[0].mxu1 %vm3992_vm0, %v4211_v25 }
 0x3b7   : > { %v13430_v30 = vpop.f32.mrb[20].mxu0  ;;  %13397 = vmatprep.mubr.msk.f32.mxu1 %vm3992_vm0, %v4242_v32  ;;  %13649 = vmatpush3.bf16.xpose.msk.msra.mxu1 %vm15072_vm3, %v13644_v14 }
 0x3b8   : > { %v6842_v50 = vpop.f32.mrb[21].mxu0  ;;  %v4243_v16 = vpop.trf.xlu0  ;;  %13662 = vmatprep.subr.msk.bf16.mxu1 %vm15149_vm5, %v13656_v28 }
 0x3b9   : > { %v4274_v27 = vpop.trf.xlu1 }
 0x3ba   : > { %7063 = vxpose.xlu0.b32.start.end [1/1] (short) (narrow) %v13430_v30, 16  ;;  %13398 = vmatmul.mubr.msk.f32.gmra.mrb[2].mxu1 %vm3992_vm0, %v4243_v16 }
 0x3bb   : > { %v13433_v23 = vpop.f32.mrb[22].mxu0  ;;  %7031 = vxpose.xlu1.b32.start.end [1/1] (short) (narrow) %v6842_v50, 16  ;;  %13400 = vmatprep.mubr.msk.f32.mxu1 %vm3992_vm0, %v4274_v27 }
 0x3bc   : > { %v6852_v44 = vpop.f32.mrb[23].mxu0 }
 0x3bd   : > { %v4306_v6 = vpop.trf.xlu0  ;;  %v4275_v34 = vpop.trf.xlu1 }
 0x3be   : > { %13401 = vmatmul.mubr.msk.f32.gmra.mrb[4].mxu1 %vm3992_vm0, %v4275_v34 }
 0x3bf   : > { %7127 = vxpose.xlu0.b32.start.end [1/1] (short) (narrow) %v13433_v23, 16  ;;  %13403 = vmatprep.mubr.msk.f32.mxu1 %vm3992_vm0, %v4306_v6 }
 0x3c0   : > { %7095 = vxpose.xlu1.b32.start.end [1/1] (short) (narrow) %v6852_v44, 16 }
 0x3c1   : > { %v4307_v11 = vpop.trf.xlu0 }
 0x3c2   : > { %13404 = vmatmul.mubr.msk.f32.gmra.mrb[6].mxu1 %vm3992_vm0, %v4307_v11 }
 0x3f8   : > { %v4338_v31 = vpop.trf.xlu1 }
 0x3f9   : > { %13406 = vmatprep.mubr.msk.f32.mxu1 %vm3992_vm0, %v4338_v31 }
 0x3fc   : > { %v4370_v3 = vpop.trf.xlu0  ;;  %v4339_v60 = vpop.trf.xlu1 }
 0x3fd   : > { %13407 = vmatmul.mubr.msk.f32.gmra.mrb[8].mxu1 %vm3992_vm0, %v4339_v60 }
 0x3fe   : > { %13409 = vmatprep.mubr.msk.f32.mxu1 %vm3992_vm0, %v4370_v3 }
 0x400   : > { %v4371_v49 = vpop.trf.xlu0  ;;  %v4402_v0 = vpop.trf.xlu1 }
 0x401   : > { %13410 = vmatmul.mubr.msk.f32.gmra.mrb[10].mxu1 %vm3992_vm0, %v4371_v49 }
 0x402   : > { %13412 = vmatprep.mubr.msk.f32.mxu1 %vm3992_vm0, %v4402_v0 }
 0x404   : > { %v4434_v15 = vpop.trf.xlu0  ;;  %v4403_v5 = vpop.trf.xlu1 }
 0x405   : > { %13413 = vmatmul.mubr.msk.f32.gmra.mrb[12].mxu1 %vm3992_vm0, %v4403_v5 }
 0x406   : > { %13415 = vmatprep.mubr.msk.f32.mxu1 %vm3992_vm0, %v4434_v15 }
 0x408   : > { %v4435_v10 = vpop.trf.xlu0 }
 0x409   : > { %13416 = vmatmul.mubr.msk.f32.gmra.mrb[14].mxu1 %vm3992_vm0, %v4435_v10 }
 0x426   : > { %v13436_v58 = vpop.f32.mrb[24].mxu0 }
 0x427   : > { %7191 = vxpose.xlu0.b32.start.end [1/1] (short) (narrow) %v13436_v58, 16  ;;  %v6862_v47 = vpop.f32.mrb[25].mxu0 }
 0x428   : > { %7159 = vxpose.xlu1.b32.start.end [1/1] (short) (narrow) %v6862_v47, 16 }
 0x42a   : > { %v13439_v46 = vpop.f32.mrb[26].mxu0 }
 0x42b   : > { %v6872_v8 = vpop.f32.mrb[27].mxu0 }
 0x42c   : > { %7255 = vxpose.xlu0.b32.start.end [1/1] (short) (narrow) %v13439_v46, 16 }
 0x42d   : > { %7223 = vxpose.xlu1.b32.start.end [1/1] (short) (narrow) %v6872_v8, 16 }
 0x42e   : > { %v13442_v36 = vpop.f32.mrb[28].mxu0 }
 0x42f   : > { %v6882_v4 = vpop.f32.mrb[29].mxu0 }
 0x430   : > { %v6951_v43 = vpop.trf.xlu0 }
 0x431   : > { %7287 = vxpose.xlu0.b32.start.end [1/1] (short) (narrow) %v6882_v4, 16  ;;  %v6919_v9 = vpop.trf.xlu1 }
 0x432   : > { %v13445_v22 = vpop.f32.mrb[30].mxu0  ;;  %13450 = vmatprep.mubr.msk.f32.mxu1 %vm6701_vm2, %v6919_v9 }
 0x433   : > { %v6892_v38 = vpop.f32.mrb[31].mxu0 }
 0x434   : > { %v6952_v21 = vpop.trf.xlu0 }
 0x435   : > { %v6920_v26 = vpop.trf.xlu1 }
 0x436   : > { %7319 = vxpose.xlu0.b32.start.end [1/1] (short) (narrow) %v13442_v36, 16  ;;  %13451 = vmatmul.mubr.msk.f32.vlgmr.msra.gmra.mrb[16].mxu1 %vm6701_vm2, %v6920_v26  ;;  %v13504_v52 = vpop.f32.mrb[32].mxu0 }
 0x437   : > { %v9503_v48 = vpop.f32.mrb[33].mxu0  ;;  %13453 = vmatprep.mubr.msk.f32.mxu1 %vm6701_vm2, %v6951_v43  ;;  %13663 = vmatpush3.bf16.xpose.msk.msra.mxu1 %vm15149_vm5, %v13656_v28  ;;  %v9599_v1 = vcombine.high %v13504_v52, %v13504_v52 }
 0x438   : > { %9632 = vxpose.xlu1.b32.start.end [1/1] (short) (narrow) %v9503_v48, 16  ;;  %v7015_v41 = vpop.trf.xlu0  ;;  %v9598_v39 = vcombine.high %v9503_v48, %v9503_v48 }
 0x439   : > { %v6983_v61 = vpop.trf.xlu1 }
 0x43a   : > { %13454 = vmatmul.mubr.msk.f32.gmra.mrb[18].mxu1 %vm6701_vm2, %v6952_v21  ;;  %v13507_v59 = vpop.f32.mrb[34].mxu0 }
 0x43b   : > { %7351 = vxpose.xlu0.b32.start.end [1/1] (short) (narrow) %v6892_v38, 16  ;;  %v9513_v24 = vpop.f32.mrb[35].mxu0  ;;  %13456 = vmatprep.mubr.msk.f32.mxu1 %vm6701_vm2, %v6983_v61  ;;  %v9601_v25 = vcombine.high %v13507_v59, %v13507_v59 }
 0x43c   : > { %v7016_v18 = vpop.trf.xlu0  ;;  %v9600_v35 = vcombine.high %v9513_v24, %v9513_v24 }
 0x43d   : > { %9664 = vxpose.xlu1.b32.start.end [1/1] (short) (narrow) %v9598_v39, 16  ;;  %v6984_v51 = vpop.trf.xlu1 }
 0x43e   : > { %13457 = vmatmul.mubr.msk.f32.gmra.mrb[20].mxu1 %vm6701_vm2, %v6984_v51  ;;  %v13510_v54 = vpop.f32.mrb[36].mxu0 }
 0x43f   : > { %v9523_v63 = vpop.f32.mrb[37].mxu0  ;;  %13459 = vmatprep.mubr.msk.f32.mxu1 %vm6701_vm2, %v7015_v41  ;;  %v9603_v34 = vcombine.high %v13510_v54, %v13510_v54 }
 0x440   : > { %7383 = vxpose.xlu0.b32.start.end [1/1] (short) (narrow) %v13445_v22, 16  ;;  %v7079_v56 = vpop.trf.xlu0  ;;  %v9602_v44 = vcombine.high %v9523_v63, %v9523_v63 }
 0x441   : > { %v7047_v45 = vpop.trf.xlu1 }
 0x442   : > { %9696 = vxpose.xlu1.b32.start.end [1/1] (short) (narrow) %v13504_v52, 16  ;;  %13460 = vmatmul.mubr.msk.f32.gmra.mrb[22].mxu1 %vm6701_vm2, %v7016_v18  ;;  %v13513_v40 = vpop.f32.mrb[38].mxu0 }
 0x443   : > { %v9533_v29 = vpop.f32.mrb[39].mxu0  ;;  %13462 = vmatprep.mubr.msk.f32.mxu1 %vm6701_vm2, %v7047_v45  ;;  %v9605_v60 = vcombine.high %v13513_v40, %v13513_v40 }
 0x444   : > { %v7080_v19 = vpop.trf.xlu0  ;;  %v9604_v31 = vcombine.high %v9533_v29, %v9533_v29 }
 0x445   : > { %v7048_v57 = vpop.trf.xlu1 }
 0x446   : > { %13463 = vmatmul.mubr.msk.f32.gmra.mrb[24].mxu1 %vm6701_vm2, %v7048_v57 }
 0x447   : > { %9728 = vxpose.xlu1.b32.start.end [1/1] (short) (narrow) %v9599_v1, 16  ;;  %13465 = vmatprep.mubr.msk.f32.mxu1 %vm6701_vm2, %v7079_v56 }
 0x448   : > { %v7143_v55 = vpop.trf.xlu0 }
 0x449   : > { %v7111_v42 = vpop.trf.xlu1 }
 0x44a   : > { %13466 = vmatmul.mubr.msk.f32.gmra.mrb[26].mxu1 %vm6701_vm2, %v7080_v19 }
 0x44b   : > { %13468 = vmatprep.mubr.msk.f32.mxu1 %vm6701_vm2, %v7111_v42 }
 0x44c   : > { %9760 = vxpose.xlu1.b32.start.end [1/1] (short) (narrow) %v9513_v24, 16  ;;  %v7144_v14 = vpop.trf.xlu0 }
 0x44d   : > { %v7112_v53 = vpop.trf.xlu1 }
 0x44e   : > { %13469 = vmatmul.mubr.msk.f32.gmra.mrb[28].mxu1 %vm6701_vm2, %v7112_v53 }
 0x44f   : > { %13471 = vmatprep.mubr.msk.f32.mxu1 %vm6701_vm2, %v7143_v55 }
 0x451   : > { %v13516_v62 = vpop.f32.mrb[40].mxu0  ;;  %9792 = vxpose.xlu1.b32.start.end [1/1] (short) (narrow) %v9600_v35, 16 }
 0x452   : > { %10208 = vxpose.xlu0.b32.start.end [1/1] (short) (narrow) %v13516_v62, 16  ;;  %13472 = vmatmul.mubr.msk.f32.gmra.mrb[30].mxu1 %vm6701_vm2, %v7144_v14  ;;  %v9543_v13 = vpop.f32.mrb[41].mxu0  ;;  %v9607_v2 = vcombine.high %v13516_v62, %v13516_v62 }
 0x453   : > { %v9606_v5 = vcombine.high %v9543_v13, %v9543_v13 }
 0x455   : > { %v13519_v37 = vpop.f32.mrb[42].mxu0 }
 0x456   : > { %9824 = vxpose.xlu1.b32.start.end [1/1] (short) (narrow) %v13507_v59, 16  ;;  %v9553_v32 = vpop.f32.mrb[43].mxu0  ;;  %v9609_v6 = vcombine.high %v13519_v37, %v13519_v37 }
 0x457   : > { %10240 = vxpose.xlu0.b32.start.end [1/1] (short) (narrow) %v9607_v2, 16  ;;  %v9608_v23 = vcombine.high %v9553_v32, %v9553_v32 }
 0x459   : > { %v13522_v30 = vpop.f32.mrb[44].mxu0 }
 0x45a   : > { %v9563_v50 = vpop.f32.mrb[45].mxu0  ;;  %v9611_v3 = vcombine.high %v13522_v30, %v13522_v30 }
 0x45b   : > { %9856 = vxpose.xlu1.b32.start.end [1/1] (short) (narrow) %v9601_v25, 16  ;;  %v9610_v11 = vcombine.high %v9563_v50, %v9563_v50 }
 0x45c   : > { %10272 = vxpose.xlu0.b32.start.end [1/1] (short) (narrow) %v9553_v32, 16 }
 0x45d   : > { %v13525_v16 = vpop.f32.mrb[46].mxu0 }
 0x45e   : > { %v9573_v27 = vpop.f32.mrb[47].mxu0  ;;  %v9613_v47 = vcombine.high %v13525_v16, %v13525_v16 }
 0x45f   : > { %v9612_v49 = vcombine.high %v9573_v27, %v9573_v27 }
 0x460   : > { %9888 = vxpose.xlu1.b32.start.end [1/1] (short) (narrow) %v9523_v63, 16 }
 0x461   : > { %10304 = vxpose.xlu0.b32.start.end [1/1] (short) (narrow) %v9608_v23, 16 }
 0x465   : > { %9920 = vxpose.xlu1.b32.start.end [1/1] (short) (narrow) %v9602_v44, 16 }
 0x466   : > { %10336 = vxpose.xlu0.b32.start.end [1/1] (short) (narrow) %v13519_v37, 16 }
 0x46a   : > { %9952 = vxpose.xlu1.b32.start.end [1/1] (short) (narrow) %v13510_v54, 16 }
 0x46b   : > { %10368 = vxpose.xlu0.b32.start.end [1/1] (short) (narrow) %v9609_v6, 16 }
 0x46f   : > { %9984 = vxpose.xlu1.b32.start.end [1/1] (short) (narrow) %v9603_v34, 16 }
 0x470   : > { %10400 = vxpose.xlu0.b32.start.end [1/1] (short) (narrow) %v9563_v50, 16 }
 0x474   : > { %10016 = vxpose.xlu1.b32.start.end [1/1] (short) (narrow) %v9533_v29, 16 }
 0x475   : > { %10432 = vxpose.xlu0.b32.start.end [1/1] (short) (narrow) %v9610_v11, 16 }
 0x479   : > { %10048 = vxpose.xlu1.b32.start.end [1/1] (short) (narrow) %v9604_v31, 16 }
 0x47a   : > { %10464 = vxpose.xlu0.b32.start.end [1/1] (short) (narrow) %v13522_v30, 16 }
 0x47e   : > { %10080 = vxpose.xlu1.b32.start.end [1/1] (short) (narrow) %v13513_v40, 16 }
 0x47f   : > { %10496 = vxpose.xlu0.b32.start.end [1/1] (short) (narrow) %v9611_v3, 16 }
 0x483   : > { %10112 = vxpose.xlu1.b32.start.end [1/1] (short) (narrow) %v9605_v60, 16 }
 0x484   : > { %10528 = vxpose.xlu0.b32.start.end [1/1] (short) (narrow) %v9573_v27, 16 }
 0x488   : > { %10144 = vxpose.xlu1.b32.start.end [1/1] (short) (narrow) %v9543_v13, 16 }
 0x489   : > { %10560 = vxpose.xlu0.b32.start.end [1/1] (short) (narrow) %v9612_v49, 16  ;;  %v13396_v0 = vpop.f32.mrb[0].mxu1 }
 0x48a   : > { %v4570_v15 = vpop.f32.mrb[1].mxu1 }
 0x48d   : > { %10176 = vxpose.xlu1.b32.start.end [1/1] (short) (narrow) %v9606_v5, 16  ;;  %v13399_v10 = vpop.f32.mrb[2].mxu1 }
 0x48e   : > { %10592 = vxpose.xlu0.b32.start.end [1/1] (short) (narrow) %v13525_v16, 16  ;;  %v4580_v58 = vpop.f32.mrb[3].mxu1 }
 0x491   : > { %v13402_v46 = vpop.f32.mrb[4].mxu1 }
 0x492   : > { %v4717_v8 = vcombine.low %v13396_v0, %v13402_v46  ;;  %v4718_v36 = vcombine.high %v13396_v0, %v13402_v46  ;;  %v4590_v4 = vpop.f32.mrb[5].mxu1 }
 0x493   : > { %10624 = vxpose.xlu0.b32.start.end [1/1] (short) (narrow) %v9613_v47, 16  ;;  %v4649_v43 = vcombine.low %v4570_v15, %v4590_v4  ;;  %v4650_v9 = vcombine.high %v4570_v15, %v4590_v4 }
 0x494   : > { %v4725_v38 = vrot.slane %v4717_v8, %v14488_v20  ;;  %v4732_v21 = vrot.slane %v4718_v36, %v14488_v20 }
 0x495   : > { %v13405_v22 = vpop.f32.mrb[6].mxu1  ;;  %v4657_v52 = vrot.slane %v4649_v43, %v14488_v20  ;;  %v4664_v28 = vrot.slane %v4650_v9, %v14488_v20 }
 0x496   : > { %v4733_v26 = vcombine.low %v13399_v10, %v13405_v22  ;;  %v4734_v7 = vcombine.high %v13399_v10, %v13405_v22  ;;  %v4600_v12 = vpop.f32.mrb[7].mxu1 }
 0x497   : > { %v4665_v48 = vcombine.low %v4580_v58, %v4600_v12  ;;  %v4666_v41 = vcombine.high %v4580_v58, %v4600_v12 }
 0x498   : > { %v4741_v61 = vrot.slane %v4733_v26, %v14488_v20  ;;  %v4748_v59 = vrot.slane %v4734_v7, %v14488_v20 }
 0x499   : > { %v4673_v39 = vrot.slane %v4665_v48, %v14488_v20  ;;  %v4680_v24 = vrot.slane %v4666_v41, %v14488_v20 }
 0x49a   : > { %v4749_v18 = vcombine.low %v4725_v38, %v4741_v61  ;;  %v4750_v51 = vcombine.high %v4725_v38, %v4741_v61  ;;  %v4765_v54 = vcombine.low %v4732_v21, %v4748_v59  ;;  %v4766_v63 = vcombine.high %v4732_v21, %v4748_v59 }
 0x49b   : > { %v4681_v56 = vcombine.low %v4657_v52, %v4673_v39  ;;  %v4682_v45 = vcombine.high %v4657_v52, %v4673_v39  ;;  %v4697_v40 = vcombine.low %v4664_v28, %v4680_v24  ;;  %v4698_v29 = vcombine.high %v4664_v28, %v4680_v24 }
 0x49c   : > { %v4764_v19 = vrot.slane %v4750_v51, %v14503_v33  ;;  %v4773_v1 = vrot.slane %v4765_v54, %v14503_v33  ;;  %v4780_v57 = vrot.slane %v4766_v63, %v14503_v33  ;;  %v15360_v34 = vrot.slane %v4749_v18, %v14503_v33 }
 0x49d   : > { %v4696_v42 = vrot.slane %v4682_v45, %v14503_v33  ;;  %v4705_v55 = vrot.slane %v4697_v40, %v14503_v33  ;;  %v4712_v53 = vrot.slane %v4698_v29, %v14503_v33  ;;  %v15363_v11 = vrot.slane %v4681_v56, %v14503_v33 }
 0x49e   : > { %v4782_v35 = vcombine.high %v4764_v19, %v14144_v17  ;;  %v4783_v14 = vcombine.high %v4773_v1, %v14144_v17  ;;  %v4784_v62 = vcombine.high %v4780_v57, %v14144_v17  ;;  %v4781_v49 = vcombine.high %v15360_v34, %v14144_v17 }
 0x49f   : > { %v13733_v13 = vpack.i.bf16 %v4764_v19, %v4696_v42  ;;  %v13738_v2 = vpack.i.bf16 %v4773_v1, %v4705_v55  ;;  %v13743_v37 = vpack.i.bf16 %v4780_v57, %v4712_v53  ;;  %v4714_v32 = vcombine.high %v4696_v42, %v14144_v17 }
 0x4a0   : > { %v4715_v25 = vcombine.high %v4705_v55, %v14144_v17  ;;  %v4716_v30 = vcombine.high %v4712_v53, %v14144_v17  ;;  %v4713_v60 = vcombine.high %v15363_v11, %v14144_v17 }
 0x4a1   : > { %v13753_v50 = vpack.i.bf16 %v4782_v35, %v4714_v32 }
 0x4a2   : > { %v13758_v16 = vpack.i.bf16 %v4783_v14, %v4715_v25  ;;  %v13763_v27 = vpack.i.bf16 %v4784_v62, %v4716_v30  ;;  %v13748_v5 = vpack.i.bf16 %v4781_v49, %v4713_v60 }
 0x4a7   : > { %v7207_v23 = vpop.trf.xlu0 }
 0x4a8   : > { %v7175_v44 = vpop.trf.xlu1 }
 0x4a9   : > { %13474 = vmatprep.mubr.msk.f32.mxu1 %vm6701_vm2, %v7175_v44 }
 0x4ab   : > { %v7208_v6 = vpop.trf.xlu0 }
 0x4ac   : > { %v7176_v31 = vpop.trf.xlu1 }
 0x4ad   : > { %13475 = vmatmul.mubr.msk.f32.gmra.mrb[32].mxu1 %vm6701_vm2, %v7176_v31 }
 0x4ae   : > { %13477 = vmatprep.mubr.msk.f32.mxu1 %vm6701_vm2, %v7207_v23 }
 0x4af   : > { %v7271_v3 = vpop.trf.xlu0  ;;  %13734 = vrot.lane.b32.xlu1 %v13733_v13, %s14133_s9 }
 0x4b0   : > { %v7239_v0 = vpop.trf.xlu1 }
 0x4b1   : > { %13478 = vmatmul.mubr.msk.f32.gmra.mrb[34].mxu1 %vm6701_vm2, %v7208_v6 }
 0x4b2   : > { %13480 = vmatprep.mubr.msk.f32.mxu1 %vm6701_vm2, %v7239_v0 }
 0x4b3   : > { %v7272_v15 = vpop.trf.xlu0  ;;  %13739 = vrot.lane.b32.xlu1 %v13738_v2, %s14131_s24 }
 0x4b4   : > { %v7240_v10 = vpop.trf.xlu1 }
 0x4b5   : > { %13481 = vmatmul.mubr.msk.f32.gmra.mrb[36].mxu1 %vm6701_vm2, %v7240_v10 }
 0x4b6   : > { %13483 = vmatprep.mubr.msk.f32.mxu1 %vm6701_vm2, %v7271_v3 }
 0x4b7   : > { %v7303_v58 = vpop.trf.xlu0  ;;  %13749 = vrot.lane.b32.xlu1 %v13748_v5, %s14135_s29 }
 0x4b8   : > { %v9648_v47 = vpop.trf.xlu1 }
 0x4b9   : > { %13484 = vmatmul.mubr.msk.f32.gmra.mrb[38].mxu1 %vm6701_vm2, %v7272_v15  ;;  %13530 = vmatprep.mubr.msk.f32.mxu0 %vm9398_vm4, %v9648_v47 }
 0x4ba   : > { %13486 = vmatprep.mubr.msk.f32.mxu1 %vm6701_vm2, %v7303_v58 }
 0x4bb   : > { %v7304_v46 = vpop.trf.xlu0  ;;  %13754 = vrot.lane.b32.xlu1 %v13753_v50, %s14134_s14 }
 0x4bc   : > { %v9649_v8 = vpop.trf.xlu1 }
 0x4bd   : > { %13531 = vmatmul.mubr.msk.f32.vlgmr.msra.gmra.mrb[48].mxu0 %vm9398_vm4, %v9649_v8  ;;  %13487 = vmatmul.mubr.msk.f32.gmra.mrb[40].mxu1 %vm6701_vm2, %v7304_v46 }
 0x4bf   : > { %v7335_v36 = vpop.trf.xlu0  ;;  %13764 = vrot.lane.b32.xlu1 %v13763_v27, %s14130_s27 }
 0x4c0   : > { %v9680_v4 = vpop.trf.xlu1  ;;  %13489 = vmatprep.mubr.msk.f32.mxu1 %vm6701_vm2, %v7335_v36  ;;  %13744 = vrot.lane.b32.xlu0 %v13743_v37, %s16572_s20 }
 0x4c1   : > { %13533 = vmatprep.mubr.msk.f32.mxu0 %vm9398_vm4, %v9680_v4 }
 0x4c3   : > { %v7336_v43 = vpop.trf.xlu0 }
 0x4c4   : > { %v9681_v9 = vpop.trf.xlu1  ;;  %13490 = vmatmul.mubr.msk.f32.gmra.mrb[42].mxu1 %vm6701_vm2, %v7336_v43  ;;  %13759 = vrot.lane.b32.xlu0 %v13758_v16, %s14129_s18 }
 0x4c5   : > { %13534 = vmatmul.mubr.msk.f32.gmra.mrb[50].mxu0 %vm9398_vm4, %v9681_v9 }
 0x4c7   : > { %v7367_v22 = vpop.trf.xlu0 }
 0x4c8   : > { %v9712_v38 = vpop.trf.xlu1  ;;  %13492 = vmatprep.mubr.msk.f32.mxu1 %vm6701_vm2, %v7367_v22 }
 0x4c9   : > { %13536 = vmatprep.mubr.msk.f32.mxu0 %vm9398_vm4, %v9712_v38 }
 0x4cb   : > { %v7368_v21 = vpop.trf.xlu0 }
 0x4cc   : > { %13493 = vmatmul.mubr.msk.f32.gmra.mrb[44].mxu1 %vm6701_vm2, %v7368_v21  ;;  %v9713_v26 = vpop.trf.xlu1 }
 0x4cd   : > { %13537 = vmatmul.mubr.msk.f32.gmra.mrb[52].mxu0 %vm9398_vm4, %v9713_v26 }
 0x4cf   : > { %v7399_v7 = vpop.trf.xlu0 }
 0x4d0   : > { %v9744_v12 = vpop.trf.xlu1  ;;  %13495 = vmatprep.mubr.msk.f32.mxu1 %vm6701_vm2, %v7399_v7  ;;  %v13408_v52 = vpop.f32.mrb[8].mxu1 }
 0x4d1   : > { %13539 = vmatprep.mubr.msk.f32.mxu0 %vm9398_vm4, %v9744_v12  ;;  %v4610_v28 = vpop.f32.mrb[9].mxu1 }
 0x4d3   : > { %v7400_v48 = vpop.trf.xlu0 }
 0x4d4   : > { %13496 = vmatmul.mubr.msk.f32.gmra.mrb[46].mxu1 %vm6701_vm2, %v7400_v48  ;;  %v9745_v41 = vpop.trf.xlu1  ;;  %v13411_v61 = vpop.f32.mrb[10].mxu1 }
 0x4d5   : > { %13540 = vmatmul.mubr.msk.f32.gmra.mrb[54].mxu0 %vm9398_vm4, %v9745_v41  ;;  %v4620_v59 = vpop.f32.mrb[11].mxu1 }
 0x4d7   : > { %v10224_v39 = vpop.trf.xlu0 }
 0x4d8   : > { %v9776_v24 = vpop.trf.xlu1  ;;  %v13414_v18 = vpop.f32.mrb[12].mxu1  ;;  %13584 = vmatprep.mubr.msk.f32.mxu1 %vm9398_vm4, %v10224_v39 }
 0x4d9   : > { %13542 = vmatprep.mubr.msk.f32.mxu0 %vm9398_vm4, %v9776_v24  ;;  %v4853_v51 = vcombine.low %v13408_v52, %v13414_v18  ;;  %v4854_v54 = vcombine.high %v13408_v52, %v13414_v18  ;;  %v4630_v63 = vpop.f32.mrb[13].mxu1 }
 0x4da   : > { %v4785_v56 = vcombine.low %v4610_v28, %v4630_v63  ;;  %v4786_v45 = vcombine.high %v4610_v28, %v4630_v63 }
 0x4db   : > { %v10225_v40 = vpop.trf.xlu0  ;;  %v4861_v1 = vrot.slane %v4853_v51, %v14488_v20  ;;  %v4868_v57 = vrot.slane %v4854_v54, %v14488_v20 }
 0x4dc   : > { %v9777_v29 = vpop.trf.xlu1  ;;  %v13417_v19 = vpop.f32.mrb[14].mxu1  ;;  %13585 = vmatmul.mubr.msk.f32.vlgmr.msra.gmra.mrb[48].mxu1 %vm9398_vm4, %v10225_v40  ;;  %v4793_v35 = vrot.slane %v4785_v56, %v14488_v20  ;;  %v4800_v14 = vrot.slane %v4786_v45, %v14488_v20 }
 0x4dd   : > { %13543 = vmatmul.mubr.msk.f32.gmra.mrb[56].mxu0 %vm9398_vm4, %v9777_v29  ;;  %v4869_v42 = vcombine.low %v13411_v61, %v13417_v19  ;;  %v4870_v55 = vcombine.high %v13411_v61, %v13417_v19  ;;  %v4640_v53 = vpop.f32.mrb[15].mxu1 }
 0x4de   : > { %v4801_v62 = vcombine.low %v4620_v59, %v4640_v53  ;;  %v4802_v13 = vcombine.high %v4620_v59, %v4640_v53 }
 0x4df   : > { %v4877_v2 = vrot.slane %v4869_v42, %v14488_v20  ;;  %v4884_v37 = vrot.slane %v4870_v55, %v14488_v20  ;;  %v10256_v32 = vpop.trf.xlu0 }
 0x4e0   : > { %v4809_v25 = vrot.slane %v4801_v62, %v14488_v20  ;;  %v4816_v30 = vrot.slane %v4802_v13, %v14488_v20  ;;  %v9808_v50 = vpop.trf.xlu1  ;;  %13587 = vmatprep.mubr.msk.f32.mxu1 %vm9398_vm4, %v10256_v32 }
 0x4e1   : > { %v4885_v16 = vcombine.low %v4861_v1, %v4877_v2  ;;  %v4886_v27 = vcombine.high %v4861_v1, %v4877_v2  ;;  %v4901_v23 = vcombine.low %v4868_v57, %v4884_v37  ;;  %v4902_v44 = vcombine.high %v4868_v57, %v4884_v37  ;;  %13545 = vmatprep.mubr.msk.f32.mxu0 %vm9398_vm4, %v9808_v50 }
 0x4e2   : > { %v4817_v6 = vcombine.low %v4793_v35, %v4809_v25  ;;  %v4818_v31 = vcombine.high %v4793_v35, %v4809_v25  ;;  %v4833_v3 = vcombine.low %v4800_v14, %v4816_v30  ;;  %v4834_v60 = vcombine.high %v4800_v14, %v4816_v30 }
 0x4e3   : > { %v4900_v49 = vrot.slane %v4886_v27, %v14503_v33  ;;  %v4909_v0 = vrot.slane %v4901_v23, %v14503_v33  ;;  %v4916_v15 = vrot.slane %v4902_v44, %v14503_v33  ;;  %v10257_v5 = vpop.trf.xlu0  ;;  %v15426_v26 = vrot.slane %v4885_v16, %v14503_v33 }
 0x4e4   : > { %v4832_v10 = vrot.slane %v4818_v31, %v14503_v33  ;;  %v4841_v58 = vrot.slane %v4833_v3, %v14503_v33  ;;  %v4848_v47 = vrot.slane %v4834_v60, %v14503_v33  ;;  %v9809_v46 = vpop.trf.xlu1  ;;  %13588 = vmatmul.mubr.msk.f32.gmra.mrb[50].mxu1 %vm9398_vm4, %v10257_v5  ;;  %v15429_v7 = vrot.slane %v4817_v6, %v14503_v33 }
 0x4e5   : > { %13546 = vmatmul.mubr.msk.f32.gmra.mrb[58].mxu0 %vm9398_vm4, %v9809_v46  ;;  %v4918_v8 = vcombine.high %v4900_v49, %v14144_v17  ;;  %v4919_v36 = vcombine.high %v4909_v0, %v14144_v17  ;;  %v4917_v59 = vcombine.high %v15426_v26, %v14144_v17  ;;  %v15446_v24 = vcombine.high %v4916_v15, %v14144_v17 }
 0x4e6   : > { %v13768_v4 = vpack.i.bf16 %v4900_v49, %v4832_v10  ;;  %v13773_v43 = vpack.i.bf16 %v4909_v0, %v4841_v58  ;;  %v13778_v9 = vpack.i.bf16 %v4916_v15, %v4848_v47  ;;  %v4850_v38 = vcombine.high %v4832_v10, %v14144_v17 }
 0x4e7   : > { %v10288_v22 = vpop.trf.xlu0  ;;  %v4851_v21 = vcombine.high %v4841_v58, %v14144_v17  ;;  %v4849_v61 = vcombine.high %v15429_v7, %v14144_v17  ;;  %v15443_v39 = vcombine.high %v4848_v47, %v14144_v17 }
 0x4e8   : > { %v9840_v12 = vpop.trf.xlu1  ;;  %13769 = vrot.lane.b32.xlu1 %v13768_v4, %s14133_s9  ;;  %13590 = vmatprep.mubr.msk.f32.mxu1 %vm9398_vm4, %v10288_v22  ;;  %v13788_v52 = vpack.i.bf16 %v4918_v8, %v4850_v38 }
 0x4e9   : > { %13548 = vmatprep.mubr.msk.f32.mxu0 %vm9398_vm4, %v9840_v12  ;;  %v13793_v28 = vpack.i.bf16 %v4919_v36, %v4851_v21  ;;  %v13783_v54 = vpack.i.bf16 %v4917_v59, %v4849_v61 }
 0x4eb   : > { %v10289_v48 = vpop.trf.xlu0  ;;  %13794 = vrot.lane.b32.xlu0 %v13793_v28, %s14129_s18 }
 0x4ec   : > { %v9841_v41 = vpop.trf.xlu1  ;;  %13774 = vrot.lane.b32.xlu1 %v13773_v43, %s14131_s24  ;;  %13591 = vmatmul.mubr.msk.f32.gmra.mrb[52].mxu1 %vm9398_vm4, %v10289_v48 }
 0x4ed   : > { %13549 = vmatmul.mubr.msk.f32.gmra.mrb[60].mxu0 %vm9398_vm4, %v9841_v41 }
 0x4ef   : > { %v10320_v18 = vpop.trf.xlu0 }
 0x4f0   : > { %v9872_v51 = vpop.trf.xlu1  ;;  %13779 = vrot.lane.b32.xlu1 %v13778_v9, %s16572_s20  ;;  %13593 = vmatprep.mubr.msk.f32.mxu1 %vm9398_vm4, %v10320_v18 }
 0x4f1   : > { %13551 = vmatprep.mubr.msk.f32.mxu0 %vm9398_vm4, %v9872_v51 }
 0x4f3   : > { %v10321_v56 = vpop.trf.xlu0 }
 0x4f4   : > { %v9873_v45 = vpop.trf.xlu1  ;;  %13784 = vrot.lane.b32.xlu1 %v13783_v54, %s14135_s29  ;;  %13594 = vmatmul.mubr.msk.f32.gmra.mrb[54].mxu1 %vm9398_vm4, %v10321_v56 }
 0x4f5   : > { %13552 = vmatmul.mubr.msk.f32.gmra.mrb[62].mxu0 %vm9398_vm4, %v9873_v45 }
 0x4f7   : > { %v10352_v17 = vpop.trf.xlu0 }
 0x4f8   : > { %v9904_v40 = vpop.trf.xlu1  ;;  %13789 = vrot.lane.b32.xlu1 %v13788_v52, %s14134_s14  ;;  %13596 = vmatprep.mubr.msk.f32.mxu1 %vm9398_vm4, %v10352_v17 }
 0x4f9   : > { %13554 = vmatprep.mubr.msk.f32.mxu0 %vm9398_vm4, %v9904_v40 }
 0x4fb   : > { %v10353_v29 = vpop.trf.xlu0 }
 0x4fc   : > { %13597 = vmatmul.mubr.msk.f32.gmra.mrb[56].mxu1 %vm9398_vm4, %v10353_v29  ;;  %v9905_v19 = vpop.trf.xlu1 }
 0x4fd   : > { %13555 = vmatmul.mubr.msk.f32.gmra.mrb[64].mxu0 %vm9398_vm4, %v9905_v19 }
 0x4ff   : > { %v10384_v1 = vpop.trf.xlu0 }
 0x500   : > { %v9936_v57 = vpop.trf.xlu1  ;;  %13599 = vmatprep.mubr.msk.f32.mxu1 %vm9398_vm4, %v10384_v1 }
 0x501   : > { %13557 = vmatprep.mubr.msk.f32.mxu0 %vm9398_vm4, %v9936_v57 }
 0x503   : > { %v10385_v42 = vpop.trf.xlu0 }
 0x504   : > { %13600 = vmatmul.mubr.msk.f32.gmra.mrb[58].mxu1 %vm9398_vm4, %v10385_v42  ;;  %v9937_v55 = vpop.trf.xlu1 }
 0x505   : > { %13558 = vmatmul.mubr.msk.f32.gmra.mrb[66].mxu0 %vm9398_vm4, %v9937_v55 }
 0x507   : > { %v10416_v53 = vpop.trf.xlu0 }
 0x508   : > { %v9968_v35 = vpop.trf.xlu1  ;;  %13602 = vmatprep.mubr.msk.f32.mxu1 %vm9398_vm4, %v10416_v53 }
 0x509   : > { %13560 = vmatprep.mubr.msk.f32.mxu0 %vm9398_vm4, %v9968_v35  ;;  %v13452_v14 = vpop.f32.mrb[16].mxu1 }
 0x50a   : > { %v7583_v62 = vpop.f32.mrb[17].mxu1 }
 0x50b   : > { %v10417_v13 = vpop.trf.xlu0 }
 0x50c   : > { %v9969_v2 = vpop.trf.xlu1  ;;  %13603 = vmatmul.mubr.msk.f32.gmra.mrb[60].mxu1 %vm9398_vm4, %v10417_v13 }
 0x50d   : > { %13561 = vmatmul.mubr.msk.f32.gmra.mrb[68].mxu0 %vm9398_vm4, %v9969_v2  ;;  %v13455_v37 = vpop.f32.mrb[18].mxu1 }
 0x50e   : > { %v7593_v32 = vpop.f32.mrb[19].mxu1 }
 0x50f   : > { %v10448_v25 = vpop.trf.xlu0 }
 0x510   : > { %v10000_v30 = vpop.trf.xlu1  ;;  %13605 = vmatprep.mubr.msk.f32.mxu1 %vm9398_vm4, %v10448_v25 }
 0x511   : > { %13563 = vmatprep.mubr.msk.f32.mxu0 %vm9398_vm4, %v10000_v30  ;;  %v13458_v50 = vpop.f32.mrb[20].mxu1 }
 0x512   : > { %v7878_v16 = vcombine.low %v13452_v14, %v13458_v50  ;;  %v7879_v27 = vcombine.high %v13452_v14, %v13458_v50  ;;  %v7603_v23 = vpop.f32.mrb[21].mxu1 }
 0x513   : > { %v10449_v44 = vpop.trf.xlu0  ;;  %v7742_v6 = vcombine.low %v7583_v62, %v7603_v23  ;;  %v7743_v31 = vcombine.high %v7583_v62, %v7603_v23 }
 0x514   : > { %v10001_v3 = vpop.trf.xlu1  ;;  %13606 = vmatmul.mubr.msk.f32.gmra.mrb[62].mxu1 %vm9398_vm4, %v10449_v44  ;;  %v7886_v49 = vrot.slane %v7878_v16, %v14488_v20  ;;  %v7893_v0 = vrot.slane %v7879_v27, %v14488_v20 }
 0x515   : > { %13564 = vmatmul.mubr.msk.f32.gmra.mrb[70].mxu0 %vm9398_vm4, %v10001_v3  ;;  %v13461_v60 = vpop.f32.mrb[22].mxu1  ;;  %v7750_v47 = vrot.slane %v7742_v6, %v14488_v20  ;;  %v15477_v46 = vrot.slane %v7743_v31, %v14488_v20 }
 0x516   : > { %v7894_v15 = vcombine.low %v13455_v37, %v13461_v60  ;;  %v7895_v5 = vcombine.high %v13455_v37, %v13461_v60  ;;  %v7613_v10 = vpop.f32.mrb[23].mxu1 }
 0x517   : > { %v10480_v58 = vpop.trf.xlu0  ;;  %v7758_v8 = vcombine.low %v7593_v32, %v7613_v10  ;;  %v7759_v36 = vcombine.high %v7593_v32, %v7613_v10 }
 0x518   : > { %v10032_v4 = vpop.trf.xlu1  ;;  %13608 = vmatprep.mubr.msk.f32.mxu1 %vm9398_vm4, %v10480_v58  ;;  %v7902_v43 = vrot.slane %v7894_v15, %v14488_v20  ;;  %v7909_v9 = vrot.slane %v7895_v5, %v14488_v20 }
 0x519   : > { %13566 = vmatprep.mubr.msk.f32.mxu0 %vm9398_vm4, %v10032_v4  ;;  %v7766_v22 = vrot.slane %v7758_v8, %v14488_v20  ;;  %v7773_v38 = vrot.slane %v7759_v36, %v14488_v20  ;;  %v13464_v21 = vpop.f32.mrb[24].mxu1 }
 0x51a   : > { %v7942_v12 = vcombine.low %v7886_v49, %v7902_v43  ;;  %v7943_v52 = vcombine.high %v7886_v49, %v7902_v43  ;;  %v7958_v28 = vcombine.low %v7893_v0, %v7909_v9  ;;  %v7959_v48 = vcombine.high %v7893_v0, %v7909_v9  ;;  %v7623_v41 = vpop.f32.mrb[25].mxu1 }
 0x51b   : > { %v10481_v61 = vpop.trf.xlu0  ;;  %v7806_v59 = vcombine.low %v7750_v47, %v7766_v22  ;;  %v7807_v18 = vcombine.high %v7750_v47, %v7766_v22  ;;  %v7822_v51 = vcombine.low %v15477_v46, %v7773_v38  ;;  %v7823_v54 = vcombine.high %v15477_v46, %v7773_v38 }
 0x51c   : > { %13609 = vmatmul.mubr.msk.f32.gmra.mrb[64].mxu1 %vm9398_vm4, %v10481_v61  ;;  %v10033_v56 = vpop.trf.xlu1  ;;  %v15493_v62 = vrot.slane %v7942_v12, %v14503_v33  ;;  %v15496_v13 = vrot.slane %v7943_v52, %v14503_v33  ;;  %v15499_v2 = vrot.slane %v7958_v28, %v14503_v33  ;;  %v15502_v37 = vrot.slane %v7959_v48, %v14503_v33 }
 0x51d   : > { %13567 = vmatmul.mubr.msk.f32.gmra.mrb[72].mxu0 %vm9398_vm4, %v10033_v56  ;;  %v13467_v45 = vpop.f32.mrb[26].mxu1  ;;  %v15510_v60 = vrot.slane %v7806_v59, %v14503_v33  ;;  %v7821_v49 = vrot.slane %v7807_v18, %v14503_v33  ;;  %v7830_v10 = vrot.slane %v7822_v51, %v14503_v33  ;;  %v7837_v58 = vrot.slane %v7823_v54, %v14503_v33 }
 0x51e   : > { %v7633_v17 = vpop.f32.mrb[27].mxu1 }
 0x51f   : > { %v10512_v40 = vpop.trf.xlu0 }
 0x520   : > { %v10064_v29 = vpop.trf.xlu1  ;;  %13611 = vmatprep.mubr.msk.f32.mxu1 %vm9398_vm4, %v10512_v40 }
 0x521   : > { %13569 = vmatprep.mubr.msk.f32.mxu0 %vm9398_vm4, %v10064_v29  ;;  %v13470_v19 = vpop.f32.mrb[28].mxu1 }
 0x522   : > { %v7910_v1 = vcombine.low %v13464_v21, %v13470_v19  ;;  %v7911_v57 = vcombine.high %v13464_v21, %v13470_v19  ;;  %v7643_v42 = vpop.f32.mrb[29].mxu1 }
 0x523   : > { %v10513_v55 = vpop.trf.xlu0  ;;  %v7774_v53 = vcombine.low %v7623_v41, %v7643_v42  ;;  %v7775_v35 = vcombine.high %v7623_v41, %v7643_v42 }
 0x524   : > { %13612 = vmatmul.mubr.msk.f32.gmra.mrb[66].mxu1 %vm9398_vm4, %v10513_v55  ;;  %v10065_v14 = vpop.trf.xlu1  ;;  %v7918_v25 = vrot.slane %v7910_v1, %v14488_v20  ;;  %v7925_v30 = vrot.slane %v7911_v57, %v14488_v20 }
 0x525   : > { %v13473_v32 = vpop.f32.mrb[30].mxu1  ;;  %13570 = vmatmul.mubr.msk.f32.gmra.mrb[74].mxu0 %vm9398_vm4, %v10065_v14  ;;  %v7782_v23 = vrot.slane %v7774_v53, %v14488_v20  ;;  %v7789_v44 = vrot.slane %v7775_v35, %v14488_v20 }
 0x526   : > { %v7926_v50 = vcombine.low %v13467_v45, %v13473_v32  ;;  %v7927_v16 = vcombine.high %v13467_v45, %v13473_v32  ;;  %v7653_v27 = vpop.f32.mrb[31].mxu1 }
 0x527   : > { %v7790_v6 = vcombine.low %v7633_v17, %v7653_v27  ;;  %v7791_v31 = vcombine.high %v7633_v17, %v7653_v27  ;;  %v10544_v3 = vpop.trf.xlu0 }
 0x528   : > { %v7934_v0 = vrot.slane %v7926_v50, %v14488_v20  ;;  %v7941_v15 = vrot.slane %v7927_v16, %v14488_v20  ;;  %v10096_v5 = vpop.trf.xlu1  ;;  %13614 = vmatprep.mubr.msk.f32.mxu1 %vm9398_vm4, %v10544_v3 }
 0x529   : > { %v7798_v47 = vrot.slane %v7790_v6, %v14488_v20  ;;  %v7805_v46 = vrot.slane %v7791_v31, %v14488_v20  ;;  %13572 = vmatprep.mubr.msk.f32.mxu0 %vm9398_vm4, %v10096_v5 }
 0x52a   : > { %v7974_v8 = vcombine.low %v7918_v25, %v7934_v0  ;;  %v7975_v36 = vcombine.high %v7918_v25, %v7934_v0  ;;  %v7990_v4 = vcombine.low %v7925_v30, %v7941_v15  ;;  %v7991_v43 = vcombine.high %v7925_v30, %v7941_v15 }
 0x52b   : > { %v7838_v9 = vcombine.low %v7782_v23, %v7798_v47  ;;  %v7839_v22 = vcombine.high %v7782_v23, %v7798_v47  ;;  %v7854_v38 = vcombine.low %v7789_v44, %v7805_v46  ;;  %v7855_v21 = vcombine.high %v7789_v44, %v7805_v46  ;;  %v10545_v12 = vpop.trf.xlu0 }
 0x52c   : > { %v15522_v52 = vrot.slane %v7974_v8, %v14503_v33  ;;  %v7989_v28 = vrot.slane %v7975_v36, %v14503_v33  ;;  %v7998_v48 = vrot.slane %v7990_v4, %v14503_v33  ;;  %v8005_v41 = vrot.slane %v7991_v43, %v14503_v33  ;;  %v10097_v61 = vpop.trf.xlu1  ;;  %13615 = vmatmul.mubr.msk.f32.gmra.mrb[68].mxu1 %vm9398_vm4, %v10545_v12 }
 0x52d   : > { %v15529_v59 = vrot.slane %v7838_v9, %v14503_v33  ;;  %v7853_v18 = vrot.slane %v7839_v22, %v14503_v33  ;;  %v7862_v51 = vrot.slane %v7854_v38, %v14503_v33  ;;  %v7869_v54 = vrot.slane %v7855_v21, %v14503_v33  ;;  %13573 = vmatmul.mubr.msk.f32.gmra.mrb[76].mxu0 %vm9398_vm4, %v10097_v61 }
 0x52e   : > { %v8006_v56 = vcombine.low %v15493_v62, %v15522_v52  ;;  %v8008_v45 = vcombine.low %v15496_v13, %v7989_v28  ;;  %v8007_v17 = vcombine.high %v15493_v62, %v15522_v52  ;;  %v8011_v40 = vcombine.high %v15499_v2, %v7998_v48 }
 0x52f   : > { %v7870_v29 = vcombine.low %v15510_v60, %v15529_v59  ;;  %v10576_v19 = vpop.trf.xlu0  ;;  %v7872_v1 = vcombine.low %v7821_v49, %v7853_v18  ;;  %v7871_v57 = vcombine.high %v15510_v60, %v15529_v59  ;;  %v7875_v42 = vcombine.high %v7830_v10, %v7862_v51 }
 0x530   : > { %v10128_v55 = vpop.trf.xlu1  ;;  %v7873_v53 = vcombine.high %v7821_v49, %v7853_v18  ;;  %v8009_v35 = vcombine.high %v15496_v13, %v7989_v28  ;;  %13617 = vmatprep.mubr.msk.f32.mxu1 %vm9398_vm4, %v10576_v19  ;;  %v7876_v14 = vcombine.low %v7837_v58, %v7869_v54  ;;  %v8012_v32 = vcombine.low %v15502_v37, %v8005_v41 }
 0x531   : > { %13575 = vmatprep.mubr.msk.f32.mxu0 %vm9398_vm4, %v10128_v55  ;;  %v13803_v25 = vpack.i.bf16 %v8008_v45, %v7872_v1  ;;  %v13798_v30 = vpack.i.bf16 %v8007_v17, %v7871_v57  ;;  %v13818_v50 = vpack.i.bf16 %v8011_v40, %v7875_v42  ;;  %v7874_v16 = vcombine.low %v7830_v10, %v7862_v51 }
 0x532   : > { %v13808_v27 = vpack.i.bf16 %v8009_v35, %v7873_v53  ;;  %v13823_v23 = vpack.i.bf16 %v8012_v32, %v7876_v14  ;;  %v8010_v44 = vcombine.low %v15499_v2, %v7998_v48  ;;  %v7877_v6 = vcombine.high %v7837_v58, %v7869_v54 }
 0x533   : > { %v10577_v31 = vpop.trf.xlu0  ;;  %13804 = vrot.lane.b32.xlu0 %v13803_v25, %s14133_s9  ;;  %13799 = vrot.lane.b32.xlu1 %v13798_v30, %s14135_s29  ;;  %v8013_v13 = vcombine.high %v15502_v37, %v8005_v41 }
 0x534   : > { %v10129_v3 = vpop.trf.xlu1  ;;  %13618 = vmatmul.mubr.msk.f32.gmra.mrb[70].mxu1 %vm9398_vm4, %v10577_v31  ;;  %v13813_v49 = vpack.i.bf16 %v8010_v44, %v7874_v16 }
 0x535   : > { %13576 = vmatmul.mubr.msk.f32.gmra.mrb[78].mxu0 %vm9398_vm4, %v10129_v3  ;;  %v13828_v0 = vpack.i.bf16 %v8013_v13, %v7877_v6 }
 0x537   : > { %v10608_v15 = vpop.trf.xlu0  ;;  %13819 = vrot.lane.b32.xlu0 %v13818_v50, %s14129_s18  ;;  %13809 = vrot.lane.b32.xlu1 %v13808_v27, %s14134_s14 }
 0x538   : > { %v10160_v2 = vpop.trf.xlu1  ;;  %13620 = vmatprep.mubr.msk.f32.mxu1 %vm9398_vm4, %v10608_v15 }
 0x539   : > { %13578 = vmatprep.mubr.msk.f32.mxu0 %vm9398_vm4, %v10160_v2 }
 0x53b   : > { %v10609_v5 = vpop.trf.xlu0  ;;  %13824 = vrot.lane.b32.xlu0 %v13823_v23, %s16572_s20  ;;  %13814 = vrot.lane.b32.xlu1 %v13813_v49, %s14131_s24 }
 0x53c   : > { %13621 = vmatmul.mubr.msk.f32.gmra.mrb[72].mxu1 %vm9398_vm4, %v10609_v5  ;;  %v10161_v37 = vpop.trf.xlu1 }
 0x53d   : > { %13579 = vmatmul.mubr.msk.f32.gmra.mrb[80].mxu0 %vm9398_vm4, %v10161_v37 }
 0x53f   : > { %v10640_v10 = vpop.trf.xlu0  ;;  %13829 = vrot.lane.b32.xlu0 %v13828_v0, %s14130_s27 }
 0x540   : > { %v10192_v58 = vpop.trf.xlu1  ;;  %13623 = vmatprep.mubr.msk.f32.mxu1 %vm9398_vm4, %v10640_v10 }
 0x541   : > { %13581 = vmatprep.mubr.msk.f32.mxu0 %vm9398_vm4, %v10192_v58 }
 0x543   : > { %v10641_v47 = vpop.trf.xlu0 }
 0x544   : > { %13624 = vmatmul.mubr.msk.f32.gmra.mrb[74].mxu1 %vm9398_vm4, %v10641_v47  ;;  %v10193_v46 = vpop.trf.xlu1 }
 0x545   : > { %13582 = vmatmul.mubr.msk.f32.gmra.mrb[82].mxu0 %vm9398_vm4, %v10193_v46 }
 0x547   : > { %v13745_v4 = vpop.permute.xlu0 %13744 }
 0x548   : > { %v13735_v8 = vpop.permute.xlu1 %13734  ;;  %v13747_v40 = vunpack.i.h.bf16 %v13745_v4  ;;  %v13746_v19 = vunpack.i.l.bf16 %v13745_v4 }
 0x549   : > { %v13737_v38 = vunpack.i.h.bf16 %v13735_v8  ;;  %v13736_v21 = vunpack.i.l.bf16 %v13735_v8 }
 0x54b   : > { %v13760_v12 = vpop.permute.xlu0 %13759 }
 0x54c   : > { %v13740_v36 = vpop.permute.xlu1 %13739  ;;  %v13762_v45 = vunpack.i.h.bf16 %v13760_v12  ;;  %v13761_v17 = vunpack.i.l.bf16 %v13760_v12 }
 0x54d   : > { %v13742_v41 = vunpack.i.h.bf16 %v13740_v36  ;;  %v13741_v61 = vunpack.i.l.bf16 %v13740_v36 }
 0x550   : > { %v13750_v43 = vpop.permute.xlu1 %13749 }
 0x551   : > { %v13752_v9 = vunpack.i.h.bf16 %v13750_v43  ;;  %v13751_v22 = vunpack.i.l.bf16 %v13750_v43 }
 0x553   : > { %v5053_v28 = vsel %vm3992_vm0, %v15360_v34, %v13752_v9  ;;  %v5033_v48 = vsel %vm3992_vm0, %v15363_v11, %v13751_v22 }
 0x554   : > { %v13755_v18 = vpop.permute.xlu1 %13754  ;;  %v5036_v1 = vsel %vm5035_vm6, %v5033_v48, %v13736_v21  ;;  %v5055_v34 = vsel %vm5035_vm6, %v5053_v28, %v13737_v38 }
 0x555   : > { %v13757_v51 = vunpack.i.h.bf16 %v13755_v18  ;;  %v13756_v54 = vunpack.i.l.bf16 %v13755_v18 }
 0x557   : > { %v5039_v57 = vsel %vm5038_vm7, %v5036_v1, %v13756_v54  ;;  %v5057_v11 = vsel %vm5038_vm7, %v5055_v34, %v13757_v51 }
 0x558   : > { %v5042_v42 = vsel %vm5041_vm8, %v5039_v57, %v13741_v61  ;;  %v5059_v55 = vsel %vm5041_vm8, %v5057_v11, %v13742_v41  ;;  %v13765_v53 = vpop.permute.xlu1 %13764 }
 0x559   : > { %v5045_v35 = vsel %vm5044_vm9, %v5042_v42, %v13761_v17  ;;  %v5061_v14 = vsel %vm5044_vm9, %v5059_v55, %v13762_v45  ;;  %v13767_v32 = vunpack.i.h.bf16 %v13765_v53  ;;  %v13766_v25 = vunpack.i.l.bf16 %v13765_v53 }
 0x55a   : > { %v5048_v30 = vsel %vm5047_vm10, %v5045_v35, %v13746_v19  ;;  %v5063_v50 = vsel %vm5047_vm10, %v5061_v14, %v13747_v40 }
 0x55b   : > { %v5051_v16 = vsel %vm5050_vm11, %v5048_v30, %v13766_v25  ;;  %v5065_v27 = vsel %vm5050_vm11, %v5063_v50, %v13767_v32 }
 0x55c   : > { %v13181_v23 = vpack.c.bf16 %v5065_v27, %v5051_v16  ;;  %v13770_v44 = vpop.permute.xlu1 %13769 }
 0x55d   : > { %v13772_v13 = vunpack.i.h.bf16 %v13770_v44  ;;  %v13771_v3 = vunpack.i.l.bf16 %v13770_v44  ;;  %v13795_v2 = vpop.permute.xlu0 %13794 }
 0x55e   : > { %5083 = vst [vmem:[#allocation2] sm:$0x33] %v13181_v23  ;;  %v13797_v43 = vunpack.i.h.bf16 %v13795_v2  ;;  %v13796_v9 = vunpack.i.l.bf16 %v13795_v2 }
 0x560   : > { %v13775_v6 = vpop.permute.xlu1 %13774 }
 0x561   : > { %v13777_v10 = vunpack.i.h.bf16 %v13775_v6  ;;  %v13776_v58 = vunpack.i.l.bf16 %v13775_v6 }
 0x564   : > { %v13780_v31 = vpop.permute.xlu1 %13779 }
 0x565   : > { %v13782_v22 = vunpack.i.h.bf16 %v13780_v31  ;;  %v13781_v38 = vunpack.i.l.bf16 %v13780_v31 }
 0x568   : > { %v13785_v49 = vpop.permute.xlu1 %13784 }
 0x569   : > { %v13787_v0 = vunpack.i.h.bf16 %v13785_v49  ;;  %v13786_v15 = vunpack.i.l.bf16 %v13785_v49 }
 0x56b   : > { %v5054_v5 = vsel %vm3992_vm0, %v15426_v26, %v13787_v0  ;;  %v5034_v37 = vsel %vm3992_vm0, %v15429_v7, %v13786_v15 }
 0x56c   : > { %v13790_v47 = vpop.permute.xlu1 %13789  ;;  %v5037_v46 = vsel %vm5035_vm6, %v5034_v37, %v13771_v3  ;;  %v5056_v8 = vsel %vm5035_vm6, %v5054_v5, %v13772_v13 }
 0x56d   : > { %v13792_v36 = vunpack.i.h.bf16 %v13790_v47  ;;  %v13791_v4 = vunpack.i.l.bf16 %v13790_v47 }
 0x56f   : > { %v5040_v21 = vsel %vm5038_vm7, %v5037_v46, %v13791_v4  ;;  %v5058_v26 = vsel %vm5038_vm7, %v5056_v8, %v13792_v36 }
 0x570   : > { %v5043_v12 = vsel %vm5041_vm8, %v5040_v21, %v13776_v58  ;;  %v5060_v7 = vsel %vm5041_vm8, %v5058_v26, %v13777_v10 }
 0x571   : > { %v5046_v28 = vsel %vm5044_vm9, %v5043_v12, %v13796_v9  ;;  %v5062_v48 = vsel %vm5044_vm9, %v5060_v7, %v13797_v43 }
 0x572   : > { %v15597_v41 = vsel %vm5047_vm10, %v5046_v28, %v13781_v38  ;;  %v15600_v61 = vsel %vm5047_vm10, %v5062_v48, %v13782_v22 }
 0x573   : > { %16573 = vst [vmem:[#allocation10_spill] sm:$0xff] %v15597_v41  ;;  %16574 = vst [vmem:[#allocation11_spill] sm:$0xff] %v15600_v61 }
 0x580   : > { %v13476_v18 = vpop.f32.mrb[32].mxu1 }
 0x581   : > { %v7663_v51 = vpop.f32.mrb[33].mxu1 }
 0x584   : > { %v13479_v54 = vpop.f32.mrb[34].mxu1 }
 0x585   : > { %v7673_v45 = vpop.f32.mrb[35].mxu1 }
 0x588   : > { %v13482_v17 = vpop.f32.mrb[36].mxu1 }
 0x589   : > { %v8150_v40 = vcombine.low %v13476_v18, %v13482_v17  ;;  %v8151_v19 = vcombine.high %v13476_v18, %v13482_v17  ;;  %v7683_v1 = vpop.f32.mrb[37].mxu1 }
 0x58a   : > { %v8014_v34 = vcombine.low %v7663_v51, %v7683_v1  ;;  %v8015_v57 = vcombine.high %v7663_v51, %v7683_v1 }
 0x58b   : > { %v8158_v32 = vrot.slane %v8150_v40, %v14488_v20  ;;  %v8165_v25 = vrot.slane %v8151_v19, %v14488_v20 }
 0x58c   : > { %v13485_v11 = vpop.f32.mrb[38].mxu1  ;;  %v8022_v16 = vrot.slane %v8014_v34, %v14488_v20  ;;  %v8029_v27 = vrot.slane %v8015_v57, %v14488_v20 }
 0x58d   : > { %v8166_v42 = vcombine.low %v13479_v54, %v13485_v11  ;;  %v8167_v55 = vcombine.high %v13479_v54, %v13485_v11  ;;  %v7693_v53 = vpop.f32.mrb[39].mxu1 }
 0x58e   : > { %v8030_v35 = vcombine.low %v7673_v45, %v7693_v53  ;;  %v8031_v14 = vcombine.high %v7673_v45, %v7693_v53 }
 0x58f   : > { %v8174_v30 = vrot.slane %v8166_v42, %v14488_v20  ;;  %v8181_v50 = vrot.slane %v8167_v55, %v14488_v20 }
 0x590   : > { %v8038_v23 = vrot.slane %v8030_v35, %v14488_v20  ;;  %v8045_v44 = vrot.slane %v8031_v14, %v14488_v20  ;;  %v13532_v6 = vpop.f32.mrb[48].mxu0  ;;  %v13488_v31 = vpop.f32.mrb[40].mxu1 }
 0x591   : > { %v8214_v13 = vcombine.low %v8158_v32, %v8174_v30  ;;  %v8215_v3 = vcombine.high %v8158_v32, %v8174_v30  ;;  %v8230_v49 = vcombine.low %v8165_v25, %v8181_v50  ;;  %v8231_v0 = vcombine.high %v8165_v25, %v8181_v50  ;;  %v15610_v15 = vpop.f32.mrb[49].mxu0  ;;  %v7703_v2 = vpop.f32.mrb[41].mxu1 }
 0x592   : > { %v8078_v5 = vcombine.low %v8022_v16, %v8038_v23  ;;  %v8079_v37 = vcombine.high %v8022_v16, %v8038_v23  ;;  %v8094_v10 = vcombine.low %v8029_v27, %v8045_v44  ;;  %v8095_v58 = vcombine.high %v8029_v27, %v8045_v44 }
 0x593   : > { %v15617_v51 = vrot.slane %v8214_v13, %v14503_v33  ;;  %v15620_v54 = vrot.slane %v8215_v3, %v14503_v33  ;;  %v15623_v45 = vrot.slane %v8230_v49, %v14503_v33  ;;  %v15626_v17 = vrot.slane %v8231_v0, %v14503_v33 }
 0x594   : > { %v15631_v19 = vrot.slane %v8078_v5, %v14503_v33  ;;  %v15634_v1 = vrot.slane %v8079_v37, %v14503_v33  ;;  %v15637_v34 = vrot.slane %v8094_v10, %v14503_v33  ;;  %v15640_v57 = vrot.slane %v8095_v58, %v14503_v33 }
 0x595   : > { %16575 = vst [vmem:[#allocation13_spill] sm:$0xff] %v15617_v51 }
 0x596   : > { %16576 = vst [vmem:[#allocation12_spill] sm:$0xff] %v15631_v19 }
 0x597   : > { %v13491_v47 = vpop.f32.mrb[42].mxu1 }
 0x598   : > { %v13535_v46 = vpop.f32.mrb[50].mxu0  ;;  %v7713_v8 = vpop.f32.mrb[43].mxu1 }
 0x599   : > { %v15612_v36 = vpop.f32.mrb[51].mxu0 }
 0x59f   : > { %v13494_v4 = vpop.f32.mrb[44].mxu1 }
 0x5a0   : > { %v8182_v43 = vcombine.low %v13488_v31, %v13494_v4  ;;  %v8183_v9 = vcombine.high %v13488_v31, %v13494_v4  ;;  %v7723_v22 = vpop.f32.mrb[45].mxu1  ;;  %v13538_v38 = vpop.f32.mrb[52].mxu0 }
 0x5a1   : > { %v8046_v21 = vcombine.low %v7703_v2, %v7723_v22  ;;  %v8047_v26 = vcombine.high %v7703_v2, %v7723_v22  ;;  %v11511_v12 = vcombine.low %v13532_v6, %v13538_v38  ;;  %v11512_v7 = vcombine.high %v13532_v6, %v13538_v38  ;;  %v10940_v28 = vpop.f32.mrb[53].mxu0 }
 0x5a2   : > { %v11239_v48 = vcombine.low %v15610_v15, %v10940_v28  ;;  %v11240_v18 = vcombine.high %v15610_v15, %v10940_v28  ;;  %v8190_v11 = vrot.slane %v8182_v43, %v14488_v20  ;;  %v15644_v42 = vrot.slane %v8183_v9, %v14488_v20 }
 0x5a3   : > { %v15647_v55 = vrot.slane %v8046_v21, %v14488_v20  ;;  %v15650_v53 = vrot.slane %v8047_v26, %v14488_v20  ;;  %v15653_v32 = vrot.slane %v11511_v12, %v14488_v20  ;;  %v15656_v25 = vrot.slane %v11512_v7, %v14488_v20 }
 0x5a4   : > { %v15677_v26 = vrot.slane %v11239_v48, %v14488_v20  ;;  %v15680_v12 = vrot.slane %v11240_v18, %v14488_v20 }
 0x5a5   : > { %v15628_v40 = vpop.permute.xlu0 %13804  ;;  %v13800_v35 = vpop.permute.xlu1 %13799 }
 0x5a6   : > { %v13802_v49 = vunpack.i.h.bf16 %v13800_v35  ;;  %v13801_v0 = vunpack.i.l.bf16 %v13800_v35  ;;  %v13807_v7 = vunpack.i.h.bf16 %v15628_v40 }
 0x5a7   : > { %v13497_v14 = vpop.f32.mrb[46].mxu1 }
 0x5a8   : > { %v8198_v30 = vcombine.low %v13491_v47, %v13497_v14  ;;  %v8199_v50 = vcombine.high %v13491_v47, %v13497_v14  ;;  %v7733_v16 = vpop.f32.mrb[47].mxu1  ;;  %v13541_v27 = vpop.f32.mrb[54].mxu0  ;;  %v8398_v48 = vsel %vm3992_vm0, %v7870_v29, %v13801_v0 }
 0x5a9   : > { %v8062_v23 = vcombine.low %v7713_v8, %v7733_v16  ;;  %v8063_v44 = vcombine.high %v7713_v8, %v7733_v16  ;;  %v11527_v6 = vcombine.low %v13535_v46, %v13541_v27  ;;  %v11528_v31 = vcombine.high %v13535_v46, %v13541_v27  ;;  %v15658_v13 = vpop.permute.xlu0 %13819  ;;  %v10950_v3 = vpop.f32.mrb[55].mxu0 }
 0x5aa   : > { %v8206_v15 = vrot.slane %v8198_v30, %v14488_v20  ;;  %v8213_v2 = vrot.slane %v8199_v50, %v14488_v20  ;;  %v13810_v21 = vpop.permute.xlu1 %13809  ;;  %v11255_v14 = vcombine.low %v15612_v36, %v10950_v3  ;;  %v11256_v30 = vcombine.high %v15612_v36, %v10950_v3 }
 0x5ab   : > { %v8070_v5 = vrot.slane %v8062_v23, %v14488_v20  ;;  %v8077_v37 = vrot.slane %v8063_v44, %v14488_v20  ;;  %v15665_v10 = vrot.slane %v11527_v6, %v14488_v20  ;;  %v15668_v58 = vrot.slane %v11528_v31, %v14488_v20 }
 0x5ac   : > { %v8246_v47 = vcombine.low %v8190_v11, %v8206_v15  ;;  %v8247_v46 = vcombine.high %v8190_v11, %v8206_v15  ;;  %v8262_v8 = vcombine.low %v15644_v42, %v8213_v2  ;;  %v8263_v4 = vcombine.high %v15644_v42, %v8213_v2 }
 0x5ad   : > { %v8110_v43 = vcombine.low %v15647_v55, %v8070_v5  ;;  %v8111_v9 = vcombine.high %v15647_v55, %v8070_v5  ;;  %v8126_v22 = vcombine.low %v15650_v53, %v8077_v37  ;;  %v8127_v38 = vcombine.high %v15650_v53, %v8077_v37  ;;  %v13825_v55 = vpop.permute.xlu0 %13824 }
 0x5ae   : > { %v15684_v28 = vrot.slane %v8246_v47, %v14503_v33  ;;  %v13806_v11 = vunpack.i.l.bf16 %v15628_v40  ;;  %v8412_v42 = vsel %vm3992_vm0, %v8006_v56, %v13802_v49  ;;  %v11575_v40 = vcombine.low %v15653_v32, %v15665_v10  ;;  %v13815_v15 = vpop.permute.xlu1 %13814 }
 0x5af   : > { %v15696_v18 = vrot.slane %v8110_v43, %v14503_v33  ;;  %v15698_v53 = vpop.f32.mrb[48].mxu1  ;;  %v11576_v62 = vcombine.high %v15653_v32, %v15665_v10  ;;  %v11592_v29 = vcombine.high %v15656_v25, %v15668_v58  ;;  %v8261_v16 = vrot.slane %v8247_v46, %v14503_v33 }
 0x5b0   : > { %16577 = vst [vmem:[#allocation16_spill] sm:$0xff] %v15684_v28  ;;  %v15708_v52 = vpop.f32.mrb[56].mxu0  ;;  %v15710_v59 = vpop.f32.mrb[49].mxu1  ;;  %v8270_v27 = vrot.slane %v8262_v8, %v14503_v33  ;;  %v13822_v23 = vunpack.i.h.bf16 %v15658_v13  ;;  %v13821_v44 = vunpack.i.l.bf16 %v15658_v13  ;;  %v15725_v6 = vrot.slane %v11255_v14, %v14488_v20 }
 0x5b1   : > { %16578 = vst [vmem:[#allocation17_spill] sm:$0xff] %v15696_v18  ;;  %v15718_v50 = vpop.f32.mrb[57].mxu0  ;;  %v15728_v31 = vrot.slane %v11256_v30, %v14488_v20  ;;  %v13812_v49 = vunpack.i.h.bf16 %v13810_v21  ;;  %v13811_v0 = vunpack.i.l.bf16 %v13810_v21  ;;  %v8277_v36 = vrot.slane %v8263_v4, %v14503_v33  ;;  %v13830_v8 = vpop.permute.xlu0 %13829 }
 0x5b2   : > { %v8125_v3 = vrot.slane %v8111_v9, %v14503_v33  ;;  %v8400_v2 = vsel %vm5035_vm6, %v8398_v48, %v13806_v11  ;;  %v8414_v5 = vsel %vm5035_vm6, %v8412_v42, %v13807_v7  ;;  %v11303_v13 = vcombine.low %v15677_v26, %v15725_v6 }
 0x5b3   : > { %v11304_v37 = vcombine.high %v15677_v26, %v15725_v6  ;;  %v11319_v47 = vcombine.low %v15680_v12, %v15728_v31  ;;  %v11320_v46 = vcombine.high %v15680_v12, %v15728_v31  ;;  %v13827_v4 = vunpack.i.h.bf16 %v13825_v55 }
 0x5b4   : > { %v13826_v43 = vunpack.i.l.bf16 %v13825_v55  ;;  %v13817_v9 = vunpack.i.h.bf16 %v13815_v15  ;;  %v13816_v21 = vunpack.i.l.bf16 %v13815_v15  ;;  %v8134_v11 = vrot.slane %v8126_v22, %v14503_v33 }
 0x5b5   : > { %v8141_v7 = vrot.slane %v8127_v38, %v14503_v33  ;;  %v8402_v42 = vsel %vm5038_vm7, %v8400_v2, %v13811_v0  ;;  %v8416_v48 = vsel %vm5038_vm7, %v8414_v5, %v13812_v49  ;;  %v13832_v35 = vunpack.i.h.bf16 %v13830_v8 }
 0x5b6   : > { %v8404_v30 = vsel %vm5041_vm8, %v8402_v42, %v13816_v21  ;;  %v8418_v56 = vsel %vm5041_vm8, %v8416_v48, %v13817_v9  ;;  %v13831_v63 = vunpack.i.l.bf16 %v13830_v8  ;;  %v8143_v0 = vcombine.high %v15631_v19, %v15696_v18 }
 0x5b7   : > { %v15746_v14 = vpop.f32.mrb[50].mxu1  ;;  %v8406_v15 = vsel %vm5044_vm9, %v8404_v30, %v13821_v44  ;;  %v8420_v22 = vsel %vm5044_vm9, %v8418_v56, %v13822_v23  ;;  %v8279_v49 = vcombine.high %v15617_v51, %v15684_v28  ;;  %v8145_v8 = vcombine.high %v15634_v1, %v8125_v3 }
 0x5b8   : > { %v13547_v60 = vpop.f32.mrb[58].mxu0  ;;  %v15750_v55 = vpop.f32.mrb[51].mxu1  ;;  %v8408_v2 = vsel %vm5047_vm10, %v8406_v15, %v13826_v43  ;;  %v8422_v5 = vsel %vm5047_vm10, %v8420_v22, %v13827_v4  ;;  %v8281_v9 = vcombine.high %v15620_v54, %v8261_v16  ;;  %v8144_v23 = vcombine.low %v15634_v1, %v8125_v3 }
 0x5b9   : > { %v10970_v38 = vpop.f32.mrb[59].mxu0  ;;  %v8410_v21 = vsel %vm5050_vm11, %v8408_v2, %v13831_v63  ;;  %v8424_v44 = vsel %vm5050_vm11, %v8422_v5, %v13832_v35  ;;  %v15764_v56 = vpack.i.bf16 %v8279_v49, %v8143_v0  ;;  %v8280_v30 = vcombine.low %v15620_v54, %v8261_v16 }
 0x5ba   : > { %v13183_v42 = vpack.c.bf16 %v8424_v44, %v8410_v21  ;;  %v15767_v48 = vpack.i.bf16 %v8281_v9, %v8145_v8  ;;  %v8147_v43 = vcombine.high %v15637_v34, %v8134_v11  ;;  %v8283_v4 = vcombine.high %v15623_v45, %v8270_v27 }
 0x5bb   : > { %v8146_v15 = vcombine.low %v15637_v34, %v8134_v11  ;;  %v8282_v22 = vcombine.low %v15623_v45, %v8270_v27  ;;  %v8148_v63 = vcombine.low %v15640_v57, %v8141_v7  ;;  %v15775_v0 = vpack.i.bf16 %v8280_v30, %v8144_v23 }
 0x5bc   : > { %v8440_v35 = vrot.slane %v13183_v42, 6  ;;  %v8284_v1 = vcombine.low %v15626_v17, %v8277_v36  ;;  %v8149_v3 = vcombine.high %v15640_v57, %v8141_v7  ;;  %v15781_v54 = vpack.i.bf16 %v8283_v4, %v8147_v43 }
 0x5bd   : > { %v15783_v16 = vpack.i.bf16 %v8282_v22, %v8146_v15  ;;  %v8285_v2 = vcombine.high %v15626_v17, %v8277_v36  ;;  %v15804_v23 = vrot.slane %v11575_v40, %v14503_v33  ;;  %v15816_v43 = vrot.slane %v11303_v13, %v14503_v33 }
 0x5be   : > { %v8441_v34 = vrot.slane %v8440_v35, 4  ;;  %8448 = vst [vmem:[#allocation2] sm:$0xcc] %v8440_v35  ;;  %v15788_v11 = vpack.i.bf16 %v8284_v1, %v8148_v63  ;;  %v11318_v40 = vrot.slane %v11304_v37, %v14503_v33 }
 0x5bf   : > { %v15779_v49 = vpop.f32.mrb[52].mxu1  ;;  %v15792_v7 = vpack.i.bf16 %v8285_v2, %v8149_v3 }
 0x5c0   : > { %v13550_v45 = vpop.f32.mrb[60].mxu0  ;;  %v15786_v27 = vpop.f32.mrb[53].mxu1  ;;  %8449 = vst [vmem:[#allocation2 + $0x8] sm:$0x33] %v8441_v34 }
 0x5c1   : > { %v11543_v5 = vcombine.low %v15708_v52, %v13550_v45  ;;  %v11544_v8 = vcombine.high %v15708_v52, %v13550_v45  ;;  %v10980_v57 = vpop.f32.mrb[61].mxu0  ;;  %v15810_v52 = vrot.slane %v11576_v62, %v14503_v33 }
 0x5c2   : > { %v11271_v9 = vcombine.low %v15718_v50, %v10980_v57  ;;  %v11272_v21 = vcombine.high %v15718_v50, %v10980_v57 }
 0x5c3   : > { %v11551_v32 = vrot.slane %v11543_v5, %v14488_v20  ;;  %v11558_v10 = vrot.slane %v11544_v8, %v14488_v20 }
 0x5c4   : > { %v11279_v22 = vrot.slane %v11271_v9, %v14488_v20  ;;  %v11286_v13 = vrot.slane %v11272_v21, %v14488_v20 }
 0x5c7   : > { %v15796_v17 = vpop.f32.mrb[54].mxu1 }
 0x5c8   : > { %v13553_v36 = vpop.f32.mrb[62].mxu0  ;;  %v15798_v44 = vpop.f32.mrb[55].mxu1 }
 0x5c9   : > { %v11559_v42 = vcombine.low %v13547_v60, %v13553_v36  ;;  %v11560_v30 = vcombine.high %v13547_v60, %v13553_v36  ;;  %v10990_v50 = vpop.f32.mrb[63].mxu0 }
 0x5ca   : > { %v11287_v4 = vcombine.low %v10970_v38, %v10990_v50  ;;  %v11288_v15 = vcombine.high %v10970_v38, %v10990_v50 }
 0x5cb   : > { %v11567_v62 = vrot.slane %v11559_v42, %v14488_v20  ;;  %v11574_v60 = vrot.slane %v11560_v30, %v14488_v20 }
 0x5cc   : > { %v11295_v63 = vrot.slane %v11287_v4, %v14488_v20  ;;  %v11302_v35 = vrot.slane %v11288_v15, %v14488_v20 }
 0x5cd   : > { %v11607_v26 = vcombine.low %v11551_v32, %v11567_v62  ;;  %v11608_v6 = vcombine.high %v11551_v32, %v11567_v62  ;;  %v11623_v37 = vcombine.low %v11558_v10, %v11574_v60  ;;  %v11624_v38 = vcombine.high %v11558_v10, %v11574_v60 }
 0x5ce   : > { %v11335_v1 = vcombine.low %v11279_v22, %v11295_v63  ;;  %v11336_v3 = vcombine.high %v11279_v22, %v11295_v63  ;;  %v11351_v2 = vcombine.low %v11286_v13, %v11302_v35  ;;  %v11352_v34 = vcombine.high %v11286_v13, %v11302_v35 }
 0x5cf   : > { %v15831_v45 = vrot.slane %v11607_v26, %v14503_v33  ;;  %v11622_v5 = vrot.slane %v11608_v6, %v14503_v33  ;;  %v11631_v8 = vrot.slane %v11623_v37, %v14503_v33  ;;  %v11638_v57 = vrot.slane %v11624_v38, %v14503_v33  ;;  %v13598_v9 = vpop.f32.mrb[56].mxu1 }
 0x5d0   : > { %v15837_v21 = vrot.slane %v11335_v1, %v14503_v33  ;;  %v11350_v36 = vrot.slane %v11336_v3, %v14503_v33  ;;  %v11359_v42 = vrot.slane %v11351_v2, %v14503_v33  ;;  %v11366_v30 = vrot.slane %v11352_v34, %v14503_v33  ;;  %v15842_v50 = vpop.f32.mrb[64].mxu0  ;;  %v11140_v4 = vpop.f32.mrb[57].mxu1 }
 0x5d1   : > { %v12087_v32 = vcombine.low %v15779_v49, %v13598_v9  ;;  %v12088_v10 = vcombine.high %v15779_v49, %v13598_v9  ;;  %v11815_v62 = vcombine.low %v15786_v27, %v11140_v4  ;;  %v15849_v60 = vpop.f32.mrb[65].mxu0  ;;  %v11816_v13 = vcombine.high %v15786_v27, %v11140_v4 }
 0x5d2   : > { %16579 = vst [vmem:[#allocation15_spill] sm:$0xff] %v15837_v21  ;;  %v11369_v63 = vcombine.low %v11318_v40, %v11350_v36  ;;  %v11641_v35 = vcombine.low %v15810_v52, %v11622_v5  ;;  %v11606_v26 = vrot.slane %v11592_v29, %v14503_v33  ;;  %v11327_v49 = vrot.slane %v11319_v47, %v14503_v33 }
 0x5d3   : > { %v11334_v6 = vrot.slane %v11320_v46, %v14503_v33  ;;  %v11368_v27 = vcombine.high %v15816_v43, %v15837_v21  ;;  %v16580_v37 = vcombine.low %v15656_v25, %v15668_v58  ;;  %v11640_v29 = vcombine.high %v15804_v23, %v15831_v45 }
 0x5d4   : > { %v13838_v1 = vpack.i.bf16 %v11641_v35, %v11369_v63  ;;  %v11370_v3 = vcombine.high %v11318_v40, %v11350_v36  ;;  %v11642_v47 = vcombine.high %v15810_v52, %v11622_v5  ;;  %v11645_v34 = vcombine.low %v11606_v26, %v11638_v57 }
 0x5d5   : > { %v11599_v38 = vrot.slane %v16580_v37, %v14503_v33  ;;  %v11373_v2 = vcombine.low %v11334_v6, %v11366_v30  ;;  %v11371_v9 = vcombine.low %v11327_v49, %v11359_v42  ;;  %v13833_v12 = vpack.i.bf16 %v11640_v29, %v11368_v27 }
 0x5d6   : > { %13839 = vrot.lane.b32.xlu0 %v13838_v1, %s14133_s9  ;;  %v11374_v46 = vcombine.high %v11334_v6, %v11366_v30  ;;  %v11646_v4 = vcombine.high %v11606_v26, %v11638_v57  ;;  %v13843_v15 = vpack.i.bf16 %v11642_v47, %v11370_v3  ;;  %v11372_v58 = vcombine.high %v11327_v49, %v11359_v42 }
 0x5d7   : > { %v11643_v31 = vcombine.low %v11599_v38, %v11631_v8  ;;  %v13601_v22 = vpop.f32.mrb[58].mxu1  ;;  %v13858_v25 = vpack.i.bf16 %v11645_v34, %v11373_v2  ;;  %v11644_v63 = vcombine.high %v11599_v38, %v11631_v8  ;;  %13834 = vrot.lane.b32.xlu1 %v13833_v12, %s14135_s29  ;;  %v15883_v6 = vrot.slane %v12087_v32, %v14488_v20 }
 0x5d8   : > { %v12103_v40 = vcombine.low %v15796_v17, %v13601_v22  ;;  %v12104_v52 = vcombine.high %v15796_v17, %v13601_v22  ;;  %v13559_v5 = vpop.f32.mrb[66].mxu0  ;;  %v11150_v36 = vpop.f32.mrb[59].mxu1  ;;  %v13863_v37 = vpack.i.bf16 %v11646_v4, %v11374_v46  ;;  %v15886_v8 = vrot.slane %v12088_v10, %v14488_v20 }
 0x5d9   : > { %v13848_v35 = vpack.i.bf16 %v11643_v31, %v11371_v9  ;;  %v11831_v27 = vcombine.low %v15798_v44, %v11150_v36  ;;  %v11832_v30 = vcombine.high %v15798_v44, %v11150_v36  ;;  %v11010_v57 = vpop.f32.mrb[67].mxu0  ;;  %v13853_v26 = vpack.i.bf16 %v11644_v63, %v11372_v58 }
 0x5da   : > { %v15889_v42 = vrot.slane %v12103_v40, %v14488_v20  ;;  %v15892_v17 = vrot.slane %v12104_v52, %v14488_v20  ;;  %13844 = vrot.lane.b32.xlu0 %v13843_v15, %s14134_s14  ;;  %v15896_v22 = vrot.slane %v11815_v62, %v14488_v20  ;;  %v15899_v44 = vrot.slane %v11816_v13, %v14488_v20 }
 0x5db   : > { %v15902_v32 = vrot.slane %v11831_v27, %v14488_v20  ;;  %v15905_v10 = vrot.slane %v11832_v30, %v14488_v20  ;;  %13859 = vrot.lane.b32.xlu1 %v13858_v25, %s16572_s20 }
 0x5dc   : > { %v12151_v49 = vcombine.low %v15883_v6, %v15889_v42  ;;  %v12152_v38 = vcombine.high %v15883_v6, %v15889_v42  ;;  %v12167_v15 = vcombine.low %v15886_v8, %v15892_v17 }
 0x5dd   : > { %v16583_v6 = vcombine.high %v15896_v22, %v15902_v32 }
 0x5de   : > { %13849 = vrot.lane.b32.xlu0 %v13848_v35, %s14131_s24 }
 0x5df   : > { %v13604_v47 = vpop.f32.mrb[60].mxu1  ;;  %13864 = vrot.lane.b32.xlu1 %v13863_v37, %s14130_s27  ;;  %v16043_v42 = vrot.slane %v16583_v6, %v14503_v33 }
 0x5e0   : > { %v13562_v2 = vpop.f32.mrb[68].mxu0  ;;  %v11160_v34 = vpop.f32.mrb[61].mxu1 }
 0x5e1   : > { %v11647_v9 = vcombine.low %v15842_v50, %v13562_v2  ;;  %v11648_v12 = vcombine.high %v15842_v50, %v13562_v2  ;;  %v11020_v31 = vpop.f32.mrb[69].mxu0 }
 0x5e2   : > { %v11375_v46 = vcombine.low %v15849_v60, %v11020_v31  ;;  %v11376_v4 = vcombine.high %v15849_v60, %v11020_v31  ;;  %13854 = vrot.lane.b32.xlu0 %v13853_v26, %s14129_s18 }
 0x5e3   : > { %13869 = vrot.lane.b32.xlu1 %v15764_v56, %s14135_s29  ;;  %v15940_v60 = vrot.slane %v11647_v9, %v14488_v20  ;;  %v15943_v56 = vrot.slane %v11648_v12, %v14488_v20 }
 0x5e4   : > { %v15955_v37 = vrot.slane %v11376_v4, %v14488_v20 }
 0x5e6   : > { %13879 = vrot.lane.b32.xlu0 %v15767_v48, %s14134_s14 }
 0x5e7   : > { %v13607_v25 = vpop.f32.mrb[62].mxu1  ;;  %13874 = vrot.lane.b32.xlu1 %v15775_v0, %s14133_s9 }
 0x5e8   : > { %v13565_v58 = vpop.f32.mrb[70].mxu0  ;;  %v11170_v63 = vpop.f32.mrb[63].mxu1 }
 0x5e9   : > { %v11663_v50 = vcombine.low %v13559_v5, %v13565_v58  ;;  %v11664_v40 = vcombine.high %v13559_v5, %v13565_v58  ;;  %v11030_v52 = vpop.f32.mrb[71].mxu0  ;;  %v15952_v5 = vrot.slane %v11375_v46, %v14488_v20 }
 0x5ea   : > { %v11391_v36 = vcombine.low %v11010_v57, %v11030_v52  ;;  %v11392_v35 = vcombine.high %v11010_v57, %v11030_v52  ;;  %13889 = vrot.lane.b32.xlu0 %v15781_v54, %s14129_s18 }
 0x5eb   : > { %v15946_v48 = vrot.slane %v11663_v50, %v14488_v20  ;;  %v15949_v0 = vrot.slane %v11664_v40, %v14488_v20  ;;  %13884 = vrot.lane.b32.xlu1 %v15783_v16, %s14131_s24 }
 0x5ec   : > { %v15958_v54 = vrot.slane %v11391_v36, %v14488_v20  ;;  %v15961_v27 = vrot.slane %v11392_v35, %v14488_v20 }
 0x5ed   : > { %v11711_v30 = vcombine.low %v15940_v60, %v15946_v48  ;;  %v11712_v57 = vcombine.high %v15940_v60, %v15946_v48  ;;  %v11727_v26 = vcombine.low %v15943_v56, %v15949_v0  ;;  %v11728_v2 = vcombine.high %v15943_v56, %v15949_v0 }
 0x5ee   : > { %v11439_v9 = vcombine.low %v15952_v5, %v15958_v54  ;;  %v11440_v12 = vcombine.high %v15952_v5, %v15958_v54  ;;  %v11455_v16 = vcombine.low %v15955_v37, %v15961_v27  ;;  %v11456_v31 = vcombine.high %v15955_v37, %v15961_v27  ;;  %13894 = vrot.lane.b32.xlu0 %v15788_v11, %s16572_s20 }
 0x5ef   : > { %v13610_v46 = vpop.f32.mrb[64].mxu1 }
 0x5f0   : > { %v15983_v4 = vpop.f32.mrb[72].mxu0  ;;  %v11180_v58 = vpop.f32.mrb[65].mxu1  ;;  %v12191_v50 = vcombine.low %v13604_v47, %v13610_v46  ;;  %v12192_v40 = vcombine.high %v13604_v47, %v13610_v46 }
 0x5f1   : > { %v11919_v52 = vcombine.low %v11160_v34, %v11180_v58  ;;  %v11920_v36 = vcombine.high %v11160_v34, %v11180_v58  ;;  %v15985_v35 = vpop.f32.mrb[73].mxu0 }
 0x5f2   : > { %13899 = vrot.lane.b32.xlu0 %v15792_v7, %s14130_s27  ;;  %v12199_v27 = vrot.slane %v12191_v50, %v14488_v20  ;;  %v12206_v47 = vrot.slane %v12192_v40, %v14488_v20 }
 0x5f3   : > { %v11927_v7 = vrot.slane %v11919_v52, %v14488_v20  ;;  %v11934_v58 = vrot.slane %v11920_v36, %v14488_v20 }
 0x5f7   : > { %v13613_v60 = vpop.f32.mrb[66].mxu1 }
 0x5f8   : > { %v12207_v56 = vcombine.low %v13607_v25, %v13613_v60  ;;  %v12208_v48 = vcombine.high %v13607_v25, %v13613_v60  ;;  %v15989_v0 = vpop.f32.mrb[74].mxu0  ;;  %v11190_v5 = vpop.f32.mrb[67].mxu1 }
 0x5f9   : > { %v11935_v11 = vcombine.low %v11170_v63, %v11190_v5  ;;  %v11936_v37 = vcombine.high %v11170_v63, %v11190_v5  ;;  %v15991_v54 = vpop.f32.mrb[75].mxu0 }
 0x5fa   : > { %v12215_v34 = vrot.slane %v12207_v56, %v14488_v20  ;;  %v12222_v46 = vrot.slane %v12208_v48, %v14488_v20 }
 0x5fb   : > { %v11943_v25 = vrot.slane %v11935_v11, %v14488_v20  ;;  %v11950_v60 = vrot.slane %v11936_v37, %v14488_v20 }
 0x5fc   : > { %v12255_v3 = vcombine.low %v12199_v27, %v12215_v34  ;;  %v12256_v63 = vcombine.high %v12199_v27, %v12215_v34  ;;  %v12271_v5 = vcombine.low %v12206_v47, %v12222_v46  ;;  %v12272_v29 = vcombine.high %v12206_v47, %v12222_v46 }
 0x5fd   : > { %v11983_v1 = vcombine.low %v11927_v7, %v11943_v25  ;;  %v11984_v50 = vcombine.high %v11927_v7, %v11943_v25  ;;  %v11999_v13 = vcombine.low %v11934_v58, %v11950_v60  ;;  %v12000_v40 = vcombine.high %v11934_v58, %v11950_v60 }
 0x5fe   : > { %v16013_v47 = vrot.slane %v12151_v49, %v14503_v33  ;;  %v16019_v34 = vrot.slane %v12152_v38, %v14503_v33  ;;  %v16582_v49 = vcombine.low %v15896_v22, %v15902_v32  ;;  %v16584_v38 = vcombine.low %v15899_v44, %v15905_v10 }
 0x5ff   : > { %v16001_v62 = vpop.f32.mrb[68].mxu1  ;;  %v16058_v58 = vrot.slane %v11711_v30, %v14503_v33  ;;  %v16061_v25 = vrot.slane %v11712_v57, %v14503_v33  ;;  %v16064_v22 = vrot.slane %v11727_v26, %v14503_v33  ;;  %v16067_v32 = vrot.slane %v11728_v2, %v14503_v33 }
 0x600   : > { %v13574_v56 = vpop.f32.mrb[76].mxu0  ;;  %v16003_v48 = vpop.f32.mrb[69].mxu1  ;;  %v16037_v7 = vrot.slane %v16582_v49, %v14503_v33  ;;  %v16070_v60 = vrot.slane %v11439_v9, %v14503_v33  ;;  %v16084_v57 = vrot.slane %v12255_v3, %v14503_v33  ;;  %v16087_v26 = vrot.slane %v12256_v63, %v14503_v33 }
 0x601   : > { %v11679_v52 = vcombine.low %v15983_v4, %v13574_v56  ;;  %v11680_v36 = vcombine.high %v15983_v4, %v13574_v56  ;;  %v11060_v11 = vpop.f32.mrb[77].mxu0  ;;  %v16025_v4 = vrot.slane %v12167_v15, %v14503_v33  ;;  %v16049_v15 = vrot.slane %v16584_v38, %v14503_v33  ;;  %16586 = vst [vmem:[#allocation14_spill] sm:$0xff] %v16058_v58 }
 0x602   : > { %v11407_v37 = vcombine.low %v15985_v35, %v11060_v11  ;;  %v11408_v27 = vcombine.high %v15985_v35, %v11060_v11  ;;  %v16581_v35 = vcombine.high %v15886_v8, %v15892_v17  ;;  %v16585_v8 = vcombine.high %v15899_v44, %v15905_v10  ;;  %16587 = vst [vmem:[#allocation18_spill] sm:$0xff] %v16070_v60 }
 0x603   : > { %v16073_v56 = vrot.slane %v11440_v12, %v14503_v33  ;;  %v16076_v44 = vrot.slane %v11455_v16, %v14503_v33  ;;  %v16079_v10 = vrot.slane %v11456_v31, %v14503_v33  ;;  %v16090_v2 = vrot.slane %v12271_v5, %v14503_v33 }
 0x604   : > { %v16031_v46 = vrot.slane %v16581_v35, %v14503_v33  ;;  %v16055_v17 = vrot.slane %v16585_v8, %v14503_v33  ;;  %v16093_v9 = vrot.slane %v12272_v29, %v14503_v33  ;;  %v16098_v31 = vrot.slane %v11983_v1, %v14503_v33 }
 0x605   : > { %v16101_v11 = vrot.slane %v11984_v50, %v14503_v33  ;;  %v16106_v5 = vrot.slane %v11999_v13, %v14503_v33  ;;  %v16109_v29 = vrot.slane %v12000_v40, %v14503_v33  ;;  %v11687_v1 = vrot.slane %v11679_v52, %v14488_v20 }
 0x606   : > { %v11694_v50 = vrot.slane %v11680_v36, %v14488_v20  ;;  %v11422_v13 = vrot.slane %v11408_v27, %v14488_v20 }
 0x607   : > { %v16081_v30 = vpop.f32.mrb[70].mxu1 }
 0x608   : > { %v13577_v12 = vpop.f32.mrb[78].mxu0  ;;  %v16095_v16 = vpop.f32.mrb[71].mxu1 }
 0x609   : > { %v11695_v3 = vcombine.low %v15989_v0, %v13577_v12  ;;  %v11696_v63 = vcombine.high %v15989_v0, %v13577_v12  ;;  %v11070_v35 = vpop.f32.mrb[79].mxu0  ;;  %v11415_v0 = vrot.slane %v11407_v37, %v14488_v20 }
 0x60a   : > { %v11423_v49 = vcombine.low %v15991_v54, %v11070_v35  ;;  %v11424_v6 = vcombine.high %v15991_v54, %v11070_v35 }
 0x60b   : > { %v11703_v38 = vrot.slane %v11695_v3, %v14488_v20  ;;  %v11710_v8 = vrot.slane %v11696_v63, %v14488_v20 }
 0x60c   : > { %v11431_v12 = vrot.slane %v11423_v49, %v14488_v20  ;;  %v11438_v40 = vrot.slane %v11424_v6, %v14488_v20 }
 0x60d   : > { %v11743_v41 = vcombine.low %v11687_v1, %v11703_v38  ;;  %v11744_v61 = vcombine.high %v11687_v1, %v11703_v38  ;;  %v11759_v18 = vcombine.low %v11694_v50, %v11710_v8  ;;  %v11760_v54 = vcombine.high %v11694_v50, %v11710_v8 }
 0x60e   : > { %v11471_v35 = vcombine.low %v11415_v0, %v11431_v12  ;;  %v11472_v52 = vcombine.high %v11415_v0, %v11431_v12  ;;  %v11487_v19 = vcombine.low %v11422_v13, %v11438_v40  ;;  %v11488_v36 = vcombine.high %v11422_v13, %v11438_v40 }
 0x60f   : > { %v16122_v3 = vrot.slane %v11743_v41, %v14503_v33  ;;  %v16125_v63 = vrot.slane %v11744_v61, %v14503_v33  ;;  %v11767_v37 = vrot.slane %v11759_v18, %v14503_v33  ;;  %v16129_v27 = vrot.slane %v11760_v54, %v14503_v33  ;;  %v13622_v49 = vpop.f32.mrb[72].mxu1 }
 0x610   : > { %v16132_v6 = vrot.slane %v11471_v35, %v14503_v33  ;;  %v16135_v1 = vrot.slane %v11472_v52, %v14503_v33  ;;  %v11495_v50 = vrot.slane %v11487_v19, %v14503_v33  ;;  %v16139_v41 = vrot.slane %v11488_v36, %v14503_v33  ;;  %v13580_v38 = vpop.f32.mrb[80].mxu0  ;;  %v11220_v61 = vpop.f32.mrb[73].mxu1 }
 0x611   : > { %16588 = vst [vmem:[#allocation19_spill] sm:$0xff] %v16122_v3  ;;  %v12223_v8 = vcombine.low %v16001_v62, %v13622_v49  ;;  %v12224_v0 = vcombine.high %v16001_v62, %v13622_v49  ;;  %v12055_v13 = vcombine.low %v13580_v38, %v15698_v53  ;;  %v11080_v12 = vpop.f32.mrb[81].mxu0  ;;  %v12056_v19 = vcombine.high %v13580_v38, %v15698_v53 }
 0x612   : > { %16589 = vst [vmem:[#allocation20_spill] sm:$0xff] %v16132_v6  ;;  %v11951_v54 = vcombine.low %v16003_v48, %v11220_v61  ;;  %v11952_v35 = vcombine.high %v16003_v48, %v11220_v61  ;;  %v11783_v62 = vcombine.low %v11080_v12, %v15710_v59  ;;  %v11784_v53 = vcombine.high %v11080_v12, %v15710_v59 }
 0x613   : > { %v12231_v52 = vrot.slane %v12223_v8, %v14488_v20  ;;  %v12238_v36 = vrot.slane %v12224_v0, %v14488_v20  ;;  %v12063_v18 = vrot.slane %v12055_v13, %v14488_v20  ;;  %v12070_v49 = vrot.slane %v12056_v19, %v14488_v20 }
 0x614   : > { %v16157_v28 = vrot.slane %v11951_v54, %v14488_v20  ;;  %v16160_v40 = vrot.slane %v11952_v35, %v14488_v20  ;;  %v16164_v48 = vrot.slane %v11783_v62, %v14488_v20  ;;  %v11507_v38 = vcombine.low %v16076_v44, %v11495_v50 }
 0x615   : > { %v11779_v61 = vcombine.low %v16064_v22, %v11767_v37  ;;  %v11504_v8 = vcombine.high %v16070_v60, %v16132_v6  ;;  %v16171_v0 = vrot.slane %v11784_v53, %v14488_v20  ;;  %v11776_v13 = vcombine.high %v16058_v58, %v16122_v3 }
 0x616   : > { %v11508_v19 = vcombine.high %v16076_v44, %v11495_v50  ;;  %v11780_v59 = vcombine.high %v16064_v22, %v11767_v37  ;;  %v11505_v35 = vcombine.low %v16073_v56, %v16135_v1  ;;  %v11777_v62 = vcombine.low %v16061_v25, %v16125_v63 }
 0x617   : > { %v13918_v12 = vpack.i.bf16 %v11779_v61, %v11507_v38  ;;  %v13625_v54 = vpop.f32.mrb[74].mxu1  ;;  %v13903_v53 = vpack.i.bf16 %v11776_v13, %v11504_v8 }
 0x618   : > { %v12239_v60 = vcombine.low %v16081_v30, %v13625_v54  ;;  %v12240_v3 = vcombine.high %v16081_v30, %v13625_v54  ;;  %v13583_v58 = vpop.f32.mrb[82].mxu0  ;;  %v11230_v44 = vpop.f32.mrb[75].mxu1  ;;  %v13923_v50 = vpack.i.bf16 %v11780_v59, %v11508_v19 }
 0x619   : > { %13919 = vrot.lane.b32.xlu0 %v13918_v12, %s14131_s24  ;;  %v12071_v22 = vcombine.low %v13583_v58, %v15746_v14  ;;  %v12072_v37 = vcombine.high %v13583_v58, %v15746_v14  ;;  %v11967_v38 = vcombine.low %v16095_v16, %v11230_v44  ;;  %v11968_v61 = vcombine.high %v16095_v16, %v11230_v44  ;;  %v11090_v51 = vpop.f32.mrb[83].mxu0 }
 0x61a   : > { %13904 = vrot.lane.b32.xlu1 %v13903_v53, %s14135_s29  ;;  %v12247_v8 = vrot.slane %v12239_v60, %v14488_v20  ;;  %v12254_v30 = vrot.slane %v12240_v3, %v14488_v20  ;;  %v11799_v13 = vcombine.low %v11090_v51, %v15750_v55  ;;  %v11800_v19 = vcombine.high %v11090_v51, %v15750_v55 }
 0x61b   : > { %v12079_v59 = vrot.slane %v12071_v22, %v14488_v20  ;;  %v12086_v12 = vrot.slane %v12072_v37, %v14488_v20  ;;  %v11975_v14 = vrot.slane %v11967_v38, %v14488_v20  ;;  %v11982_v58 = vrot.slane %v11968_v61, %v14488_v20 }
 0x61c   : > { %v12287_v16 = vcombine.low %v12231_v52, %v12247_v8  ;;  %v12288_v54 = vcombine.high %v12231_v52, %v12247_v8  ;;  %v12303_v44 = vcombine.low %v12238_v36, %v12254_v30  ;;  %v12304_v53 = vcombine.high %v12238_v36, %v12254_v30 }
 0x61d   : > { %v12119_v6 = vcombine.low %v12063_v18, %v12079_v59  ;;  %v12120_v60 = vcombine.high %v12063_v18, %v12079_v59  ;;  %v12135_v21 = vcombine.low %v12070_v49, %v12086_v12  ;;  %v12136_v3 = vcombine.high %v12070_v49, %v12086_v12  ;;  %13924 = vrot.lane.b32.xlu0 %v13923_v50, %s14129_s18 }
 0x61e   : > { %v16201_v51 = vrot.slane %v12287_v16, %v14503_v33  ;;  %v16204_v55 = vrot.slane %v12288_v54, %v14503_v33  ;;  %v16207_v22 = vrot.slane %v12303_v44, %v14503_v33  ;;  %v16210_v37 = vrot.slane %v12304_v53, %v14503_v33 }
 0x61f   : > { %v16213_v52 = vrot.slane %v12119_v6, %v14503_v33  ;;  %v12134_v18 = vrot.slane %v12120_v60, %v14503_v33  ;;  %v12143_v36 = vrot.slane %v12135_v21, %v14503_v33  ;;  %v16218_v49 = vrot.slane %v12136_v3, %v14503_v33 }
 0x620   : > { %v12319_v50 = vcombine.low %v16084_v57, %v16201_v51  ;;  %v12015_v38 = vcombine.low %v16157_v28, %v11975_v14  ;;  %v12016_v61 = vcombine.high %v16157_v28, %v11975_v14  ;;  %v12031_v8 = vcombine.low %v16160_v40, %v11982_v58 }
 0x621   : > { %v12183_v6 = vcombine.low %v16213_v52, %v16013_v47  ;;  %v12032_v30 = vcombine.high %v16160_v40, %v11982_v58  ;;  %v11807_v59 = vrot.slane %v11799_v13, %v14488_v20  ;;  %v11814_v21 = vrot.slane %v11800_v19, %v14488_v20 }
 0x622   : > { %v16231_v12 = vrot.slane %v12015_v38, %v14503_v33  ;;  %v16234_v16 = vrot.slane %v12016_v61, %v14503_v33  ;;  %v16237_v54 = vrot.slane %v12031_v8, %v14503_v33  ;;  %v13908_v28 = vpack.i.bf16 %v11777_v62, %v11505_v35 }
 0x623   : > { %v16240_v14 = vrot.slane %v12032_v30, %v14503_v33  ;;  %v11847_v44 = vcombine.low %v16164_v48, %v11807_v59  ;;  %v11848_v40 = vcombine.high %v16164_v48, %v11807_v59  ;;  %v11863_v13 = vcombine.low %v16171_v0, %v11814_v21 }
 0x624   : > { %v12047_v20 = vcombine.low %v16098_v31, %v16231_v12  ;;  %v11864_v19 = vcombine.high %v16171_v0, %v11814_v21  ;;  %13909 = vrot.lane.b32.xlu1 %v13908_v28, %s14133_s9  ;;  %v11781_v58 = vcombine.low %v16067_v32, %v16129_v27  ;;  %v11506_v35 = vcombine.high %v16073_v56, %v16135_v1 }
 0x625   : > { %v16254_v62 = vrot.slane %v11847_v44, %v14503_v33  ;;  %v11862_v48 = vrot.slane %v11848_v40, %v14503_v33  ;;  %v11871_v53 = vrot.slane %v11863_v13, %v14503_v33  ;;  %v11778_v60 = vcombine.high %v16061_v25, %v16125_v63 }
 0x626   : > { %v11878_v0 = vrot.slane %v11864_v19, %v14503_v33  ;;  %v16590_v3 = vcombine.low %v16079_v10, %v16139_v41  ;;  %v11510_v61 = vcombine.high %v16079_v10, %v16139_v41  ;;  %v11782_v56 = vcombine.high %v16067_v32, %v16129_v27 }
 0x627   : > { %v11911_v1 = vcombine.low %v16254_v62, %v16037_v7  ;;  %v11912_v8 = vcombine.high %v16254_v62, %v16037_v7  ;;  %v11913_v25 = vcombine.low %v11862_v48, %v16043_v42  ;;  %v11914_v33 = vcombine.high %v11862_v48, %v16043_v42 }
 0x628   : > { %v13928_v38 = vpack.i.bf16 %v11781_v58, %v16590_v3  ;;  %v11915_v63 = vcombine.low %v11871_v53, %v16049_v15  ;;  %v11916_v30 = vcombine.high %v11871_v53, %v16049_v15  ;;  %v11917_v59 = vcombine.low %v11878_v0, %v16055_v17 }
 0x629   : > { %v11918_v10 = vcombine.high %v11878_v0, %v16055_v17  ;;  %v13913_v32 = vpack.i.bf16 %v11778_v60, %v11506_v35  ;;  %v13933_v27 = vpack.i.bf16 %v11782_v56, %v11510_v61  ;;  %v12185_v41 = vcombine.low %v12134_v18, %v16019_v34 }
 0x62a   : > { %13929 = vrot.lane.b32.xlu0 %v13928_v38, %s16572_s20  ;;  %v12184_v21 = vcombine.high %v16213_v52, %v16013_v47  ;;  %v12186_v28 = vcombine.high %v12134_v18, %v16019_v34  ;;  %v12189_v42 = vcombine.low %v16218_v49, %v16031_v46  ;;  %v12187_v15 = vcombine.low %v12143_v36, %v16025_v4 }
 0x62b   : > { %v12048_v44 = vcombine.high %v16098_v31, %v16231_v12  ;;  %13914 = vrot.lane.b32.xlu1 %v13913_v32, %s14134_s14  ;;  %v13943_v17 = vpack.i.bf16 %v12185_v41, %v11913_v25  ;;  %v12320_v13 = vcombine.high %v16084_v57, %v16201_v51  ;;  %v12188_v19 = vcombine.high %v12143_v36, %v16025_v4 }
 0x62c   : > { %v13938_v40 = vpack.i.bf16 %v12184_v21, %v11912_v8  ;;  %v13948_v34 = vpack.i.bf16 %v12186_v28, %v11914_v33  ;;  %v13963_v18 = vpack.i.bf16 %v12189_v42, %v11917_v59  ;;  %v13953_v58 = vpack.i.bf16 %v12187_v15, %v11915_v63  ;;  %v16593_v42 = vld [vmem:[#allocation15_spill] sm:$0xff] }
 0x62d   : > { %v12049_v35 = vcombine.low %v16101_v11, %v16234_v16  ;;  %v13973_v48 = vpack.i.bf16 %v12320_v13, %v12048_v44  ;;  %v13958_v53 = vpack.i.bf16 %v12188_v19, %v11916_v30  ;;  %v12321_v60 = vcombine.low %v16087_v26, %v16204_v55 }
 0x62e   : > { %13934 = vrot.lane.b32.xlu0 %v13933_v27, %s14130_s27  ;;  %v12190_v0 = vcombine.high %v16218_v49, %v16031_v46  ;;  %v12050_v3 = vcombine.high %v16101_v11, %v16234_v16  ;;  %v12322_v4 = vcombine.high %v16087_v26, %v16204_v55  ;;  %v12051_v36 = vcombine.low %v16106_v5, %v16237_v54  ;;  %v13156_v26 = vld.sshfl [vmem:[%s16503_s11] sm:$0x33 pattern:$0x76325410] }
 0x62f   : > { %v12323_v38 = vcombine.low %v16090_v2, %v16207_v22  ;;  %13939 = vrot.lane.b32.xlu1 %v13938_v40, %s14135_s29  ;;  %v13978_v61 = vpack.i.bf16 %v12321_v60, %v12049_v35  ;;  %v12052_v8 = vcombine.high %v16106_v5, %v16237_v54  ;;  %v12324_v46 = vcombine.high %v16090_v2, %v16207_v22 }
 0x630   : > { %v13968_v56 = vpack.i.bf16 %v12190_v0, %v11918_v10  ;;  %v13983_v11 = vpack.i.bf16 %v12322_v4, %v12050_v3  ;;  %v12053_v49 = vcombine.low %v16109_v29, %v16240_v14  ;;  %v12325_v16 = vcombine.low %v16093_v9, %v16210_v37 }
 0x631   : > { %v13988_v55 = vpack.i.bf16 %v12323_v38, %v12051_v36  ;;  %v13993_v25 = vpack.i.bf16 %v12324_v46, %v12052_v8  ;;  %v12054_v5 = vcombine.high %v16109_v29, %v16240_v14  ;;  %v12326_v2 = vcombine.high %v16093_v9, %v16210_v37  ;;  %v12678_v36 = vld [vmem:[%s16502_s10 + $0x8] sm:$0x3f]  ;;  %v12677_v38 = vld [vmem:[%s16502_s10] sm:$0xff] }
 0x632   : > { %13944 = vrot.lane.b32.xlu0 %v13943_v17, %s14133_s9  ;;  %v14003_v22 = vpack.i.bf16 %v12325_v16, %v12053_v49  ;;  %v12661_v54 = vcombine.high %v13156_v26, %v13156_v26  ;;  %v16591_v9 = vpack.i.bf16 %v15446_v24, %v15443_v39  ;;  %v14145_v37 = vmov 0  }
 0x633   : > { %13964 = vrot.lane.b32.xlu1 %v13963_v18, %s16572_s20  ;;  %v14008_v33 = vpack.i.bf16 %v12326_v2, %v12054_v5  ;;  %12759 = vmatprep.mubr.bf16.mxu1 %v14145_v37  ;;  %v16592_v21 = vcombine.low %v15804_v23, %v15831_v45  ;;  %v16594_v15 = vcombine.low %v15816_v43, %v16593_v42 }
 0x634   : > { %v13189_v63 = vpack.c.bf16 %v12661_v54, %v13156_v26  ;;  %14014 = vset.pattern.permute.xlu0 %v14145_v37  ;;  %14013 = vset.pattern.permute.xlu1 %v14145_v37 }
 0x636   : > { %13949 = vrot.lane.b32.xlu0 %v13948_v34, %s14134_s14  ;;  %v12671_v30 = vrot.slane %v13189_v63, 6 }
 0x637   : > { %13974 = vrot.lane.b32.xlu1 %v13973_v48, %s14135_s29 }
 0x638   : > { %12673 = vst [vmem:[#allocation2 + $0x18] sm:$0x44] %v12671_v30  ;;  %12674 = vst [vmem:[#allocation2 + $0x38] sm:$0x44] %v12671_v30 }
 0x63a   : > { %13954 = vrot.lane.b32.xlu0 %v13953_v58, %s14131_s24 }
 0x63b   : > { %13979 = vrot.lane.b32.xlu1 %v13978_v61, %s14133_s9 }
 0x63e   : > { %13959 = vrot.lane.b32.xlu0 %v13958_v53, %s14129_s18 }
 0x63f   : > { %13984 = vrot.lane.b32.xlu1 %v13983_v11, %s14134_s14 }
 0x642   : > { %13969 = vrot.lane.b32.xlu0 %v13968_v56, %s14130_s27 }
 0x643   : > { %13994 = vrot.lane.b32.xlu1 %v13993_v25, %s14129_s18 }
 0x646   : > { %13989 = vrot.lane.b32.xlu0 %v13988_v55, %s14131_s24 }
 0x647   : > { %13999 = vrot.lane.b32.xlu1 %v16591_v9, %s14130_s27  ;;  %v16595_v9 = vld [vmem:[#allocation13_spill] sm:$0xff] }
 0x648   : > { %v13840_v29 = vpop.permute.xlu0 %13839 }
 0x649   : > { %v13835_v14 = vpop.permute.xlu1 %13834  ;;  %v13842_v41 = vunpack.i.h.bf16 %v13840_v29  ;;  %v13841_v39 = vunpack.i.l.bf16 %v13840_v29  ;;  %v16596_v29 = vld [vmem:[#allocation16_spill] sm:$0xff] }
 0x64a   : > { %14004 = vrot.lane.b32.xlu0 %v14003_v22, %s16572_s20  ;;  %v13837_v10 = vunpack.i.h.bf16 %v13835_v14  ;;  %v13836_v32 = vunpack.i.l.bf16 %v13835_v14  ;;  %v16597_v14 = vcombine.low %v16595_v9, %v16596_v29  ;;  %v16601_v9 = vld [vmem:[#allocation14_spill] sm:$0xff]  ;;  %v16602_v29 = vld [vmem:[#allocation19_spill] sm:$0xff] }
 0x64b   : > { %12685 = vperm.xlu1 %14013, %v12677_v38  }
 0x64c   : > { %v13845_v59 = vpop.permute.xlu0 %13844  ;;  %v12579_v28 = vsel %vm3992_vm0, %v16592_v21, %v13837_v10  ;;  %v12551_v44 = vsel %vm3992_vm0, %v16594_v15, %v13836_v32  ;;  %v16598_v10 = vld [vmem:[#allocation12_spill] sm:$0xff]  ;;  %v16599_v32 = vld [vmem:[#allocation17_spill] sm:$0xff] }
 0x64d   : > { %v13860_v27 = vpop.permute.xlu1 %13859  ;;  %v13847_v17 = vunpack.i.h.bf16 %v13845_v59  ;;  %v13846_v40 = vunpack.i.l.bf16 %v13845_v59  ;;  %v12555_v18 = vsel %vm5035_vm6, %v12551_v44, %v13841_v39  ;;  %v12583_v58 = vsel %vm5035_vm6, %v12579_v28, %v13842_v41 }
 0x64e   : > { %14009 = vrot.lane.b32.xlu0 %v14008_v33, %s14130_s27  ;;  %v13862_v60 = vunpack.i.h.bf16 %v13860_v27  ;;  %v13861_v43 = vunpack.i.l.bf16 %v13860_v27  ;;  %v16600_v27 = vcombine.low %v16598_v10, %v16599_v32  ;;  %v16604_v10 = vld [vmem:[#allocation18_spill] sm:$0xff]  ;;  %v16605_v32 = vld [vmem:[#allocation20_spill] sm:$0xff] }
 0x64f   : > { %v12559_v48 = vsel %vm5038_vm7, %v12555_v18, %v13846_v40  ;;  %v12587_v23 = vsel %vm5038_vm7, %v12583_v58, %v13847_v17 }
 0x650   : > { %v13850_v24 = vpop.permute.xlu0 %13849 }
 0x651   : > { %v13852_v13 = vunpack.i.h.bf16 %v13850_v24  ;;  %v13851_v19 = vunpack.i.l.bf16 %v13850_v24  ;;  %v13865_v34 = vpop.permute.xlu1 %13864 }
 0x652   : > { %v13867_v61 = vunpack.i.h.bf16 %v13865_v34  ;;  %v13866_v56 = vunpack.i.l.bf16 %v13865_v34  ;;  %12690 = vperm.xlu0 %14014, %v12678_v36  }
 0x653   : > { %v12563_v0 = vsel %vm5041_vm8, %v12559_v48, %v13851_v19  ;;  %v12591_v3 = vsel %vm5041_vm8, %v12587_v23, %v13852_v13 }
 0x654   : > { %v13855_v35 = vpop.permute.xlu0 %13854 }
 0x655   : > { %v13857_v45 = vunpack.i.h.bf16 %v13855_v35  ;;  %v13856_v53 = vunpack.i.l.bf16 %v13855_v35  ;;  %v13870_v4 = vpop.permute.xlu1 %13869 }
 0x656   : > { %v13872_v25 = vunpack.i.h.bf16 %v13870_v4  ;;  %v13871_v5 = vunpack.i.l.bf16 %v13870_v4 }
 0x657   : > { %v12567_v8 = vsel %vm5044_vm9, %v12563_v0, %v13856_v53  ;;  %v12595_v46 = vsel %vm5044_vm9, %v12591_v3, %v13857_v45 }
 0x658   : > { %v12571_v26 = vsel %vm5047_vm10, %v12567_v8, %v13861_v43  ;;  %v12599_v11 = vsel %vm5047_vm10, %v12595_v46, %v13862_v60  ;;  %v13880_v55 = vpop.permute.xlu0 %13879  ;;  %v8413_v59 = vsel %vm3992_vm0, %v16597_v14, %v13872_v25  ;;  %v8399_v41 = vsel %vm3992_vm0, %v16600_v27, %v13871_v5 }
 0x659   : > { %v12575_v49 = vsel %vm5050_vm11, %v12571_v26, %v13866_v56  ;;  %v12603_v16 = vsel %vm5050_vm11, %v12599_v11, %v13867_v61  ;;  %v13875_v22 = vpop.permute.xlu1 %13874  ;;  %v13882_v39 = vunpack.i.h.bf16 %v13880_v55  ;;  %v13881_v24 = vunpack.i.l.bf16 %v13880_v55 }
 0x65a   : > { %v13185_v2 = vpack.c.bf16 %v12603_v16, %v12575_v49  ;;  %v13877_v54 = vunpack.i.h.bf16 %v13875_v22  ;;  %v13876_v33 = vunpack.i.l.bf16 %v13875_v22  ;;  %v16603_v14 = vcombine.low %v16601_v9, %v16602_v29 }
 0x65b   : > { %v16606_v27 = vcombine.low %v16604_v10, %v16605_v32 }
 0x65c   : > { %v16369_v63 = vrot.slane %v13185_v2, 6  ;;  %v13890_v30 = vpop.permute.xlu0 %13889  ;;  %v8401_v21 = vsel %vm5035_vm6, %v8399_v41, %v13876_v33  ;;  %v8415_v28 = vsel %vm5035_vm6, %v8413_v59, %v13877_v54 }
 0x65d   : > { %v13885_v42 = vpop.permute.xlu1 %13884  ;;  %v13892_v40 = vunpack.i.h.bf16 %v13890_v30  ;;  %v13891_v13 = vunpack.i.l.bf16 %v13890_v30  ;;  %v8403_v19 = vsel %vm5038_vm7, %v8401_v21, %v13881_v24  ;;  %v8417_v34 = vsel %vm5038_vm7, %v8415_v28, %v13882_v39 }
 0x65e   : > { %12646 = vst [vmem:[#allocation2 + $0x8] sm:$0xcc] %v16369_v63  ;;  %v13887_v15 = vunpack.i.h.bf16 %v13885_v42  ;;  %v13886_v44 = vunpack.i.l.bf16 %v13885_v42 }
 0x660   : > { %v13895_v17 = vpop.permute.xlu0 %13894  ;;  %v8405_v18 = vsel %vm5041_vm8, %v8403_v19, %v13886_v44  ;;  %v8419_v58 = vsel %vm5041_vm8, %v8417_v34, %v13887_v15 }
 0x661   : > { %v13897_v35 = vunpack.i.h.bf16 %v13895_v17  ;;  %v13896_v48 = vunpack.i.l.bf16 %v13895_v17  ;;  %v8407_v45 = vsel %vm5044_vm9, %v8405_v18, %v13891_v13  ;;  %v8421_v53 = vsel %vm5044_vm9, %v8419_v58, %v13892_v40 }
 0x663   : > { %v8409_v4 = vsel %vm5047_vm10, %v8407_v45, %v13896_v48  ;;  %v8423_v36 = vsel %vm5047_vm10, %v8421_v53, %v13897_v35 }
 0x664   : > { %v13900_v23 = vpop.permute.xlu0 %13899 }
 0x665   : > { %v13902_v60 = vunpack.i.h.bf16 %v13900_v23  ;;  %v13901_v43 = vunpack.i.l.bf16 %v13900_v23  ;;  %v14015_v0 = vld [vmem:[#allocation2] ss:$8 sps:$4 sm:$0xff]   ;;  %v14017_v3 = vld [vmem:[#allocation2 + $0x4] ss:$8 sps:$4 sm:$0xff]  }
 0x666   : > { %12727 = vmatprep.subr.bf16.mxu1 %v14017_v3 }
 0x667   : > { %v8411_v38 = vsel %vm5050_vm11, %v8409_v4, %v13901_v43  ;;  %v8425_v61 = vsel %vm5050_vm11, %v8423_v36, %v13902_v60  ;;  %12728 = vmatpush1.bf16.msra.mxu1 %v14015_v0 }
 0x668   : > { %v13184_v56 = vpack.c.bf16 %v8425_v61, %v8411_v38 }
 0x66a   : > { %v8442_v8 = vrot.slane %v13184_v56, 6  ;;  %v12631_v56 = vrot.slane %v16369_v63, 4 }
 0x66c   : > { %v8443_v46 = vrot.slane %v8442_v8, 4  ;;  %8450 = vst [vmem:[#allocation2 + $0x20] sm:$0xcc] %v8442_v8 }
 0x66e   : > { %8451 = vst [vmem:[#allocation2 + $0x28] sm:$0x33] %v8443_v46 }
 0x68b   : > { %v13920_v26 = vpop.permute.xlu0 %13919 }
 0x68c   : > { %v13905_v11 = vpop.permute.xlu1 %13904  ;;  %v13922_v54 = vunpack.i.h.bf16 %v13920_v26  ;;  %v13921_v33 = vunpack.i.l.bf16 %v13920_v26 }
 0x68d   : > { %v13907_v16 = vunpack.i.h.bf16 %v13905_v11  ;;  %v13906_v25 = vunpack.i.l.bf16 %v13905_v11 }
 0x68f   : > { %v13925_v55 = vpop.permute.xlu0 %13924  ;;  %v12580_v59 = vsel %vm3992_vm0, %v16603_v14, %v13907_v16  ;;  %v12552_v41 = vsel %vm3992_vm0, %v16606_v27, %v13906_v25 }
 0x690   : > { %v13927_v28 = vunpack.i.h.bf16 %v13925_v55  ;;  %v13926_v42 = vunpack.i.l.bf16 %v13925_v55 }
 0x696   : > { %v13910_v49 = vpop.permute.xlu1 %13909 }
 0x697   : > { %v13912_v2 = vunpack.i.h.bf16 %v13910_v49  ;;  %v13911_v22 = vunpack.i.l.bf16 %v13910_v49 }
 0x699   : > { %v12556_v15 = vsel %vm5035_vm6, %v12552_v41, %v13911_v22  ;;  %v12584_v44 = vsel %vm5035_vm6, %v12580_v59, %v13912_v2 }
 0x69c   : > { %v13930_v5 = vpop.permute.xlu0 %13929 }
 0x69d   : > { %v13915_v30 = vpop.permute.xlu1 %13914  ;;  %v13932_v34 = vunpack.i.h.bf16 %v13930_v5  ;;  %v13931_v18 = vunpack.i.l.bf16 %v13930_v5 }
 0x69e   : > { %v13917_v39 = vunpack.i.h.bf16 %v13915_v30  ;;  %v13916_v24 = vunpack.i.l.bf16 %v13915_v30 }
 0x6a0   : > { %v13935_v21 = vpop.permute.xlu0 %13934  ;;  %v12560_v17 = vsel %vm5038_vm7, %v12556_v15, %v13916_v24  ;;  %v12588_v40 = vsel %vm5038_vm7, %v12584_v44, %v13917_v39 }
 0x6a1   : > { %v13937_v13 = vunpack.i.h.bf16 %v13935_v21  ;;  %v13936_v19 = vunpack.i.l.bf16 %v13935_v21  ;;  %v12564_v58 = vsel %vm5041_vm8, %v12560_v17, %v13921_v33  ;;  %v12592_v35 = vsel %vm5041_vm8, %v12588_v40, %v13922_v54  ;;  %v13940_v48 = vpop.permute.xlu1 %13939 }
 0x6a2   : > { %v12568_v23 = vsel %vm5044_vm9, %v12564_v58, %v13926_v42  ;;  %v12596_v45 = vsel %vm5044_vm9, %v12592_v35, %v13927_v28  ;;  %v13942_v46 = vunpack.i.h.bf16 %v13940_v48  ;;  %v13941_v26 = vunpack.i.l.bf16 %v13940_v48 }
 0x6a3   : > { %v12572_v60 = vsel %vm5047_vm10, %v12568_v23, %v13931_v18  ;;  %v12600_v43 = vsel %vm5047_vm10, %v12596_v45, %v13932_v34  ;;  %v14021_v45 = vld [vmem:[%s16609_s28] sm:$0x7f]  }
 0x6a4   : > { %v13945_v53 = vpop.permute.xlu0 %13944  ;;  %v12576_v0 = vsel %vm5050_vm11, %v12572_v60, %v13936_v19  ;;  %v12604_v3 = vsel %vm5050_vm11, %v12600_v43, %v13937_v13  ;;  %v12581_v2 = vsel %vm3992_vm0, %v12183_v6, %v13942_v46  ;;  %v12553_v63 = vsel %vm3992_vm0, %v11911_v1, %v13941_v26 }
 0x6a5   : > { %v13186_v4 = vpack.c.bf16 %v12604_v3, %v12576_v0  ;;  %v13965_v36 = vpop.permute.xlu1 %13964  ;;  %v13947_v16 = vunpack.i.h.bf16 %v13945_v53  ;;  %v13946_v25 = vunpack.i.l.bf16 %v13945_v53 }
 0x6a6   : > { %v13967_v41 = vunpack.i.h.bf16 %v13965_v36  ;;  %v13966_v39 = vunpack.i.l.bf16 %v13965_v36 }
 0x6a7   : > { %v12632_v8 = vrot.slane %v13186_v4, 6  ;;  %v12557_v29 = vsel %vm5035_vm6, %v12553_v63, %v13946_v25  ;;  %v12585_v14 = vsel %vm5035_vm6, %v12581_v2, %v13947_v16  ;;  %v16611_v63 = vld [vmem:[#allocation10_spill] sm:$0xff] }
 0x6a8   : > { %v13950_v61 = vpop.permute.xlu0 %13949 }
 0x6a9   : > { %v12633_v11 = vsel %vm16412_vm14, %v12631_v56, %v12632_v8  ;;  %v12634_v55 = vrot.slane %v12632_v8, 4  ;;  %v13975_v49 = vpop.permute.xlu1 %13974  ;;  %v13952_v22 = vunpack.i.h.bf16 %v13950_v61  ;;  %v13951_v54 = vunpack.i.l.bf16 %v13950_v61 }
 0x6aa   : > { %v13977_v24 = vunpack.i.h.bf16 %v13975_v49  ;;  %v13976_v40 = vunpack.i.l.bf16 %v13975_v49 }
 0x6ab   : > { %12648 = vst [vmem:[#allocation2 + $0x18] sm:$0x33] %v12634_v55  ;;  %v12561_v10 = vsel %vm5038_vm7, %v12557_v29, %v13951_v54  ;;  %v12589_v47 = vsel %vm5038_vm7, %v12585_v14, %v13952_v22 }
 0x6ac   : > { %v13955_v5 = vpop.permute.xlu0 %13954  ;;  %v12582_v4 = vsel %vm3992_vm0, %v12319_v50, %v13977_v24  ;;  %v12554_v36 = vsel %vm3992_vm0, %v12047_v20, %v13976_v40 }
 0x6ad   : > { %v13957_v33 = vunpack.i.h.bf16 %v13955_v5  ;;  %v13956_v30 = vunpack.i.l.bf16 %v13955_v5  ;;  %v13980_v9 = vpop.permute.xlu1 %13979  ;;  %v16610_v5 = vld [vmem:[#allocation11_spill] sm:$0xff] }
 0x6ae   : > { %v13982_v13 = vunpack.i.h.bf16 %v13980_v9  ;;  %v13981_v18 = vunpack.i.l.bf16 %v13980_v9 }
 0x6af   : > { %v12565_v7 = vsel %vm5041_vm8, %v12561_v10, %v13956_v30  ;;  %v12593_v62 = vsel %vm5041_vm8, %v12589_v47, %v13957_v33 }
 0x6b0   : > { %v13960_v59 = vpop.permute.xlu0 %13959  ;;  %v12558_v8 = vsel %vm5035_vm6, %v12554_v36, %v13981_v18  ;;  %v12586_v46 = vsel %vm5035_vm6, %v12582_v4, %v13982_v13 }
 0x6b1   : > { %v13962_v52 = vunpack.i.h.bf16 %v13960_v59  ;;  %v13961_v6 = vunpack.i.l.bf16 %v13960_v59  ;;  %v13985_v27 = vpop.permute.xlu1 %13984 }
 0x6b2   : > { %v12682_v28 = vld [vmem:[#allocation2 + $0x18] sm:$0x77]  ;;  %v13987_v60 = vunpack.i.h.bf16 %v13985_v27  ;;  %v13986_v43 = vunpack.i.l.bf16 %v13985_v27 }
 0x6b3   : > { %v12569_v1 = vsel %vm5044_vm9, %v12565_v7, %v13961_v6  ;;  %v12597_v32 = vsel %vm5044_vm9, %v12593_v62, %v13962_v52  ;;  %v13162_v44 = vcombine.high %v12633_v11, %v12682_v28  ;;  %v13161_v17 = vcombine.low %v12633_v11, %v12682_v28 }
 0x6b4   : > { %v13970_v21 = vpop.permute.xlu0 %13969  ;;  %v12573_v19 = vsel %vm5047_vm10, %v12569_v1, %v13966_v39  ;;  %v12601_v34 = vsel %vm5047_vm10, %v12597_v32, %v13967_v41  ;;  %v12562_v11 = vsel %vm5038_vm7, %v12558_v8, %v13986_v43  ;;  %v12590_v57 = vsel %vm5038_vm7, %v12586_v46, %v13987_v60 }
 0x6b5   : > { %v13972_v42 = vunpack.i.h.bf16 %v13970_v21  ;;  %v13971_v15 = vunpack.i.l.bf16 %v13970_v21  ;;  %13163 = vmatprep.subr.msk.bf16.mxu1 %vm12720_vm15, %v13162_v44  ;;  %v12722_v48 = vsel %vm12720_vm15, %v13161_v17, 0  ;;  %v13995_v23 = vpop.permute.xlu1 %13994 }
 0x6b6   : > { %12730 = vmatpush1.bf16.msra.mxu1 %v12722_v48  ;;  %v13997_v12 = vunpack.i.h.bf16 %v13995_v23  ;;  %v13996_v20 = vunpack.i.l.bf16 %v13995_v23 }
 0x6b7   : > { %v12577_v58 = vsel %vm5050_vm11, %v12573_v19, %v13971_v15  ;;  %v12605_v35 = vsel %vm5050_vm11, %v12601_v34, %v13972_v42 }
 0x6b8   : > { %v13187_v53 = vpack.c.bf16 %v12605_v35, %v12577_v58  ;;  %v13990_v0 = vpop.permute.xlu0 %13989 }
 0x6b9   : > { %v13991_v3 = vunpack.i.l.bf16 %v13990_v0  ;;  %v13992_v56 = vunpack.i.h.bf16 %v13990_v0  ;;  %v14000_v26 = vpop.permute.xlu1 %13999  ;;  %13164 = vmatmul.mubr.msk.bf16.vlgmr.msra.gmra.mrb[76].mxu1 %vm12716_vm1, %v14021_v45 }
 0x6ba   : > { %v12635_v61 = vrot.slane %v13187_v53, 6  ;;  %v14002_v50 = vunpack.i.h.bf16 %v14000_v26  ;;  %12835 = vmatprep.mubr.bf16.mxu1 %v14145_v37  ;;  %v14001_v55 = vunpack.i.l.bf16 %v14000_v26 }
 0x6bb   : > { %v12566_v31 = vsel %vm5041_vm8, %v12562_v11, %v13991_v3  ;;  %v12594_v49 = vsel %vm5041_vm8, %v12590_v57, %v13992_v56 }
 0x6bc   : > { %12649 = vst [vmem:[#allocation2 + $0x28] sm:$0xcc] %v12635_v61  ;;  %v14005_v51 = vpop.permute.xlu0 %14004  ;;  %v5066_v2 = vsel %vm5050_vm11, %v16610_v5, %v14002_v50  ;;  %v5052_v22 = vsel %vm5050_vm11, %v16611_v63, %v14001_v55  ;;  %v12570_v30 = vsel %vm5044_vm9, %v12566_v31, %v13996_v20  ;;  %v12598_v37 = vsel %vm5044_vm9, %v12594_v49, %v13997_v12 }
 0x6bd   : > { %v14007_v16 = vunpack.i.h.bf16 %v14005_v51  ;;  %v14006_v25 = vunpack.i.l.bf16 %v14005_v51  ;;  %v13182_v54 = vpack.c.bf16 %v5066_v2, %v5052_v22  ;;  %v12636_v6 = vrot.slane %v12635_v61, 4 }
 0x6bf   : > { %v12574_v14 = vsel %vm5047_vm10, %v12570_v30, %v14006_v25  ;;  %v12602_v59 = vsel %vm5047_vm10, %v12598_v37, %v14007_v16  ;;  %5084 = vst [vmem:[#allocation2 + $0x20] sm:$0x33] %v13182_v54 }
 0x6c0   : > { %v14010_v33 = vpop.permute.xlu0 %14009 }
 0x6c1   : > { %v14012_v9 = vunpack.i.h.bf16 %v14010_v33  ;;  %v14011_v29 = vunpack.i.l.bf16 %v14010_v33 }
 0x6c3   : > { %v12578_v10 = vsel %vm5050_vm11, %v12574_v14, %v14011_v29  ;;  %v12606_v47 = vsel %vm5050_vm11, %v12602_v59, %v14012_v9 }
 0x6c4   : > { %v13188_v52 = vpack.c.bf16 %v12606_v47, %v12578_v10 }
 0x6c6   : > { %v12637_v7 = vrot.slane %v13188_v52, 6  ;;  %v14018_v32 = vld [vmem:[#allocation2 + $0x20] ss:$8 sps:$4 sm:$0xff]   ;;  %v14020_v27 = vld [vmem:[#allocation2 + $0x24] ss:$8 sps:$4 sm:$0xff]  }
 0x6c7   : > { %12803 = vmatprep.subr.bf16.mxu1 %v14020_v27 }
 0x6c8   : > { %v12638_v62 = vsel %vm16412_vm14, %v12636_v6, %v12637_v7  ;;  %v12639_v1 = vrot.slane %v12637_v7, 4  ;;  %12804 = vmatpush1.bf16.msra.mxu1 %v14018_v32 }
 0x6ca   : > { %12651 = vst [vmem:[#allocation2 + $0x38] sm:$0x33] %v12639_v1  ;;  %v12686_v28 = vpop.permute.xlu1 %12685 }
 0x6d1   : > { %v12778_v41 = vld [vmem:[#allocation2 + $0x38] sm:$0x77]  ;;  %v12691_v42 = vpop.permute.xlu0 %12690 }
 0x6d2   : > { %v13168_v39 = vcombine.high %v12638_v62, %v12778_v41  ;;  %v13167_v24 = vcombine.low %v12638_v62, %v12778_v41 }
 0x6d4   : > { %13169 = vmatprep.subr.msk.bf16.mxu1 %vm12720_vm15, %v13168_v39  ;;  %v12798_v21 = vsel %vm12720_vm15, %v13167_v24, 0 }
 0x6d5   : > { %12806 = vmatpush1.bf16.msra.mxu1 %v12798_v21 }
 0x6d8   : > { %13170 = vmatmul.mubr.msk.bf16.vlgmr.msra.gmra.mrb[80].mxu1 %vm12716_vm1, %v14021_v45 }
 0x78c   : > { %v12761_v38 = vpop.f32.mrb[76].mxu1 }
 0x78d   : > { %v12763_v15 = vpop.f32.mrb[77].mxu1  ;;  %v12762_v44 = vadd.f32 %v12761_v38, %v12686_v28 }
 0x78e   : > { %v12765_v17 = vpop.f32.mrb[78].mxu1  ;;  %v12764_v40 = vadd.f32 %v12763_v15, %v12686_v28 }
 0x78f   : > { %v12766_v13 = vadd.f32 %v12765_v17, %v12691_v42  ;;  %12770 = vst [vmem:[%s501_s16] sm:$0xff] %v12762_v44  ;;  %v12767_v19 = vpop.f32.mrb[79].mxu1 }
 0x790   : > { %12771 = vst [vmem:[%s501_s16 + $0x8] sm:$0xff] %v12764_v40  ;;  %v12768_v34 = vadd.f32 %v12767_v19, %v12691_v42 }
 0x791   : > { %12772 = vst [vmem:[%s501_s16 + $0x10] sm:$0x3f] %v12766_v13 }
 0x792   : > { %12773 = vst [vmem:[%s501_s16 + $0x18] sm:$0x3f] %v12768_v34 }
 0x7ab   : > { %v12837_v18 = vpop.f32.mrb[80].mxu1 }
 0x7ac   : > { %v12838_v58 = vadd.f32 %v12837_v18, %v12686_v28  ;;  %v12839_v35 = vpop.f32.mrb[81].mxu1 }
 0x7ad   : > { %v12840_v48 = vadd.f32 %v12839_v35, %v12686_v28  ;;  %v12841_v23 = vpop.f32.mrb[82].mxu1 }
 0x7ae   : > { %13171 = vst [vmem:[%s501_s16 + $0x20] sm:$0xff] %v12838_v58  ;;  %v12842_v45 = vadd.f32 %v12841_v23, %v12691_v42  ;;  %v12843_v53 = vpop.f32.mrb[83].mxu1 }
 0x7af   : > { %13172 = vst [vmem:[%s501_s16 + $0x28] sm:$0xff] %v12840_v48  ;;  %v12844_v60 = vadd.f32 %v12843_v53, %v12691_v42 }
 0x7b0   : > { %13173 = vst [vmem:[%s501_s16 + $0x30] sm:$0x3f] %v12842_v45 }
 0x7b1   : > { %13174 = vst [vmem:[%s501_s16 + $0x38] sm:$0x3f] %v12844_v60 }
 0x7b2 PF: > { %s16613_s24 = sld [smem:[#allocation9_spill]]  ;;  %s16614_s21 = smov %s14115_s22 }
 0x7b3   : > { %s16615_s22 = smov %s14119_s23  ;;  %s16616_s23 = smov %s14287_s12 }
 0x7b8   : > { %p23_p6 = scmp.ge.s32.totalorder %s16613_s24, 4  }
 0x7ba   :  { %25 = sbr.rel (!%p23_p6) target bundleno = 7 (0x7), region = 121 }
 0x7c1   :  { %12875 = vsyncpa [#allocation4], 1 }
 0x7c2   :  { %12877 = vsyncpa [#allocation4 + $0x1], 1 }
 0x7c3   :  { %12878 = vsyncpa [#allocation6], 1 }
 0x7c4   :  { %12880 = vsyncpa [#allocation6 + $0x1], 1 }

</bundles_post_ra>
